<compile_context>
chip_gen: v5e
topology: v5e:2x2
jax: 0.10.0
libtpu: 0.0.40
codegen_flags: <defaults>
</compile_context>

<pallas_src>
import numpy as np
import jax
import jax.numpy as jnp
from jax.experimental import pallas as pl
from jax.experimental.pallas import tpu as pltpu

# ----- small, deterministic hyperparameters consistent with the module -----
NUM_LABELS = 4
VOCAB = 50
EMB = 32        # embedding_size
HID = 32        # hidden_size
SEQ = 16        # seq_len
STEP = 4
POOL = SEQ // STEP   # AdaptiveMaxPool1d output size
BATCH = 2

# -------- packed parameter slab layout (lane width = 8*HID = 256) ---------
SLAB_LANES = 8 * HID   # 256
OFF_TPF = 0            # rows [0,50):   (VOCAB, 8H) fwd input-proj table (+bias), zeros in bwd lanes
OFF_TPB = 56           # rows [56,106): (VOCAB, 8H) bwd input-proj table (+bias), zeros in fwd lanes
OFF_WH = 112           # rows [112,176): (2H, 8H) block-diagonal recurrent weight (gate-interleaved)
OFF_HEAD = 176         # rows [176,216): head parameters (w1f | w1b | labT | wc col; b1/wa/wc/ba/bc rows)
SLAB_ROWS = 216
OUT_ROWS, OUT_LANES = 16, 128


# ------------------------- fused LSTM + head kernel ------------------------------
def _fused_lstm_head_kernel(ids_ref, slab_ref, out_ref, gx_ref, fwd_ref, bwd_ref):
    # ids_ref : (B, S) int32 in SMEM
    # slab_ref: (216, 256) f32 packed parameters in VMEM
    # out_ref : (16, 128) f32 output slab
    # gx_ref  : (S*B, 8H) per-step gate inputs (gathered), fwd@t / bwd@(S-1-t) combined
    # fwd_ref / bwd_ref: (S*B, H) per-direction hidden outputs, time-major (row = t*B + b)
    B, S = ids_ref.shape
    H = HID
    H2 = 2 * H
    P = POOL
    STEP_ = S // P
    L = NUM_LABELS

    # ---- phase 1: in-kernel embedding "gather" -----------------------------------
    # Input projections (x @ W_ih + b) are precomputed per vocab row into the slab,
    # so one row-add per (t, b) yields the full interleaved (1, 8H) gate input.
    for t in range(S):
        tb = S - 1 - t
        for b in range(B):
            rf = slab_ref[pl.ds(OFF_TPF + ids_ref[b, t], 1), :]    # fwd gates, token (b, t)
            rb = slab_ref[pl.ds(OFF_TPB + ids_ref[b, tb], 1), :]   # bwd gates, token (b, S-1-t)
            r = t * B + b
            gx_ref[r:r + 1, :] = rf + rb

    # ---- phase 2: fused bidirectional recurrence ----------------------------------
    # Gate layout along 8H lanes: [i_f i_b | f_f f_b | g_f g_b | o_f o_b]
    whb = slab_ref[OFF_WH:OFF_WH + H2, :]          # (2H, 8H) block-diagonal, hoisted
    h = jnp.zeros((B, H2), jnp.float32)            # [h_f | h_b]
    c = jnp.zeros((B, H2), jnp.float32)            # [c_f | c_b]
    for t in range(S):
        gates = gx_ref[t * B:(t + 1) * B, :] + jnp.dot(
            h, whb, preferred_element_type=jnp.float32)            # (B, 8H)
        i = jax.nn.sigmoid(gates[:, 0:H2])
        f = jax.nn.sigmoid(gates[:, H2:2 * H2])
        g = jnp.tanh(gates[:, 2 * H2:3 * H2])
        o = jax.nn.sigmoid(gates[:, 3 * H2:4 * H2])
        c = f * c + i * g
        h = o * jnp.tanh(c)
        # contiguous (B, H) stores, off the recurrence-critical path
        fwd_ref[t * B:(t + 1) * B, :] = h[:, 0:H]
        bwd_ref[(S - 1 - t) * B:(S - t) * B, :] = h[:, H:H2]

    # ---- phase 3: head -------------------------------------------------------------
    w1f = slab_ref[OFF_HEAD:OFF_HEAD + H, 0:H]                 # (H, H)
    w1b = slab_ref[OFF_HEAD:OFF_HEAD + H, H:H2]                # (H, H)
    labT = slab_ref[OFF_HEAD:OFF_HEAD + H, H2:H2 + L]          # (H, L)
    b1 = slab_ref[OFF_HEAD + H:OFF_HEAD + H + 1, 0:H]          # (1, H)
    wa = slab_ref[OFF_HEAD + H + 1:OFF_HEAD + H + 2, 0:H]      # (1, H)
    wc = slab_ref[OFF_HEAD + H + 2:OFF_HEAD + H + 3, 0:S]      # (1, S)
    ba = slab_ref[OFF_HEAD + H + 3:OFF_HEAD + H + 4, 0:1]      # (1, 1)
    bc = slab_ref[OFF_HEAD + H + 3:OFF_HEAD + H + 4, 1:2]      # (1, 1)

    # linear1 + ReLU with split weight (no 2H concat), time-major then one small
    # leading-dim transpose to batch-major for pooling / conv ordering.
    o_tm = jnp.maximum(
        jnp.dot(fwd_ref[...], w1f, preferred_element_type=jnp.float32)
        + jnp.dot(bwd_ref[...], w1b, preferred_element_type=jnp.float32)
        + b1, 0.0)                                                       # (S*B, H)
    o_bm = jnp.transpose(o_tm.reshape(S, B, H), (1, 0, 2)).reshape(B * S, H)

    # AdaptiveMaxPool1d over the sequence axis (S % P == 0)
    pool = jnp.max(o_bm.reshape(B * P, STEP_, H), axis=1)                # (B*P, H)
    out = jnp.dot(pool, labT, preferred_element_type=jnp.float32)        # (B*P, L)

    # adaptive_factor = softmax_P(tanh(Linear_{H->1}(pool)))
    score = jnp.tanh(
        jnp.sum(pool.reshape(B, P, H) * wa.reshape(1, 1, H), axis=-1) + ba)   # (B, P)
    m = jnp.max(score, axis=-1, keepdims=True)
    e = jnp.exp(score - m)
    af = e / jnp.sum(e, axis=-1, keepdims=True)

    # Conv1d(in_channels=S, out_channels=1, kernel_size=1): weighted sum over seq axis
    high = jnp.sum(o_bm.reshape(B, S, H) * wc.reshape(1, S, 1), axis=1) + bc   # (B, H)
    out2 = jnp.dot(high, labT, preferred_element_type=jnp.float32)             # (B, L)

    # single merged output slab (one writeback DMA); wrapper slices it
    out_ref[...] = jnp.zeros_like(out_ref)
    out_ref[0:B * P, 0:L] = out
    out_ref[B * P:B * P + B, 0:L] = out2
    out_ref[B * P + B:B * P + 2 * B, 0:P] = af


# ----------------------- host-side one-time parameter packing --------------------
def pack_params(params):
    """Build the single (216, 256) parameter slab (done ONCE, outside the per-call graph)."""
    H, S, V, L = HID, SEQ, VOCAB, NUM_LABELS
    H2, H8 = 2 * H, 8 * H

    def interleave(m4h, d):
        # (R, 4H) in gate order [i|f|g|o]  ->  (R, 8H), column q*2H + d*H + j
        out = np.zeros((m4h.shape[0], H8), np.float32)
        for q in range(4):
            out[:, q * H2 + d * H:q * H2 + (d + 1) * H] = m4h[:, q * H:(q + 1) * H]
        return out

    emb = np.asarray(params['emb_table'], np.float32)
    proj_f = emb @ np.asarray(params['wifT'], np.float32) + np.asarray(params['bf'], np.float32)
    proj_b = emb @ np.asarray(params['wibT'], np.float32) + np.asarray(params['bb'], np.float32)

    slab = np.zeros((SLAB_ROWS, SLAB_LANES), np.float32)
    slab[OFF_TPF:OFF_TPF + V] = interleave(proj_f, 0)
    slab[OFF_TPB:OFF_TPB + V] = interleave(proj_b, 1)
    slab[OFF_WH:OFF_WH + H] = interleave(np.asarray(params['whfT'], np.float32), 0)
    slab[OFF_WH + H:OFF_WH + H2] = interleave(np.asarray(params['whbT'], np.float32), 1)

    w1T = np.asarray(params['w1T'], np.float32)                 # (2H, H)
    slab[OFF_HEAD:OFF_HEAD + H, 0:H] = w1T[0:H]                 # forward half
    slab[OFF_HEAD:OFF_HEAD + H, H:H2] = w1T[H:H2]               # backward half
    slab[OFF_HEAD:OFF_HEAD + H, H2:H2 + L] = np.asarray(params['labT'], np.float32)
    slab[OFF_HEAD + H, 0:H] = np.asarray(params['b1'], np.float32)[0]
    slab[OFF_HEAD + H + 1, 0:H] = np.asarray(params['wa'], np.float32)[0]
    slab[OFF_HEAD + H + 2, 0:S] = np.asarray(params['wc'], np.float32)[0]
    slab[OFF_HEAD + H + 3, 0] = float(np.asarray(params['ba'])[0, 0])
    slab[OFF_HEAD + H + 3, 1] = float(np.asarray(params['bc'])[0, 0])
    return jnp.asarray(slab)


# -------------------------------- full forward -----------------------------------
def lstm_model_forward(token_ids, param_slab):
    ids = token_ids.astype(jnp.int32)
    B, S = ids.shape
    assert S % POOL == 0

    res = pl.pallas_call(
        _fused_lstm_head_kernel,
        out_shape=jax.ShapeDtypeStruct((OUT_ROWS, OUT_LANES), jnp.float32),
        in_specs=[pl.BlockSpec(memory_space=pltpu.MemorySpace.SMEM),
                  pl.BlockSpec(memory_space=pltpu.MemorySpace.VMEM)],
        out_specs=pl.BlockSpec(memory_space=pltpu.MemorySpace.VMEM),
        scratch_shapes=[pltpu.VMEM((S * B, 8 * HID), jnp.float32),
                        pltpu.VMEM((S * B, HID), jnp.float32),
                        pltpu.VMEM((S * B, HID), jnp.float32)],
    )(ids, param_slab)

    out = res[0:B * POOL, 0:NUM_LABELS]
    out2 = res[B * POOL:B * POOL + B, 0:NUM_LABELS]
    af = res[B * POOL + B:B * POOL + 2 * B, 0:POOL]
    channel = POOL
    # TODO(synk): test=True branch (softmax mixing of out/out1) not implemented; this
    # mirrors the default training path `forward(x, test=False)`.
    return out, out2, channel, af


# ----------------------------- pure-JAX reference --------------------------------
def reference_forward(token_ids, params):
    emb = params['emb_table'][token_ids]
    B, S, _ = emb.shape
    H = HID

    def run_dir(xs, wiT, whT, b):
        h = jnp.zeros((B, H), jnp.float32)
        c = jnp.zeros((B, H), jnp.float32)
        hs = []
        for t in range(S):
            gates = xs[:, t] @ wiT + h @ whT + b
            i = jax.nn.sigmoid(gates[:, :H])
            f = jax.nn.sigmoid(gates[:, H:2 * H])
            g = jnp.tanh(gates[:, 2 * H:3 * H])
            o = jax.nn.sigmoid(gates[:, 3 * H:])
            c = f * c + i * g
            h = o * jnp.tanh(c)
            hs.append(h)
        return jnp.stack(hs, axis=1)

    out_f = run_dir(emb, params['wifT'], params['whfT'], params['bf'][0])
    out_b = run_dir(emb[:, ::-1], params['wibT'], params['whbT'], params['bb'][0])[:, ::-1]
    output = jnp.concatenate([out_f, out_b], axis=-1)
    o = jax.nn.relu(output @ params['w1T'] + params['b1'][0])  # (B, S, H)
    rows = []
    for p in range(POOL):
        s0 = (p * S) // POOL
        s1 = -((-(p + 1) * S) // POOL)
        rows.append(jnp.max(o[:, s0:s1, :], axis=1))
    pool_t = jnp.stack(rows, axis=1)                           # (B, P, H)
    af = jax.nn.softmax(
        jnp.tanh(jnp.sum(pool_t * params['wa'][0], axis=-1) + params['ba'][0, 0]), axis=-1)
    out = (pool_t @ params['labT']).reshape(-1, NUM_LABELS)
    high = jnp.einsum('s,bsh->bh', params['wc'][0], o) + params['bc'][0, 0]
    out2 = high @ params['labT']
    return out, out2, POOL, af


if __name__ == "__main__":
    key = jax.random.PRNGKey(0)
    keys = jax.random.split(key, 16)
    s = 0.1
    params = {
        'emb_table': jax.random.normal(keys[0], (VOCAB, EMB), jnp.float32),
        'wifT': s * jax.random.normal(keys[1], (EMB, 4 * HID), jnp.float32),
        'whfT': s * jax.random.normal(keys[2], (HID, 4 * HID), jnp.float32),
        'bf':   s * jax.random.normal(keys[3], (1, 4 * HID), jnp.float32),
        'wibT': s * jax.random.normal(keys[4], (EMB, 4 * HID), jnp.float32),
        'whbT': s * jax.random.normal(keys[5], (HID, 4 * HID), jnp.float32),
        'bb':   s * jax.random.normal(keys[6], (1, 4 * HID), jnp.float32),
        'w1T':  s * jax.random.normal(keys[7], (2 * HID, HID), jnp.float32),
        'b1':   s * jax.random.normal(keys[8], (1, HID), jnp.float32),
        'wa':   s * jax.random.normal(keys[9], (1, HID), jnp.float32),
        'ba':   s * jax.random.normal(keys[10], (1, 1), jnp.float32),
        'wc':   s * jax.random.normal(keys[11], (1, SEQ), jnp.float32),
        'bc':   s * jax.random.normal(keys[12], (1, 1), jnp.float32),
        'labT': s * jax.random.normal(keys[13], (HID, NUM_LABELS), jnp.float32),
    }
    token_ids = jax.random.randint(keys[14], (BATCH, SEQ), 0, VOCAB)

    # One-time parameter packing (outside the per-call graph), then the fused call.
    param_slab = pack_params(params)
    forward = jax.jit(lstm_model_forward)
    out, out2, channel, af = forward(token_ids, param_slab)
    jax.block_until_ready((out, out2, af))

    r_out, r_out2, r_channel, r_af = reference_forward(token_ids, params)
    np.testing.assert_allclose(np.asarray(out), np.asarray(r_out), rtol=1e-4, atol=1e-4)
    np.testing.assert_allclose(np.asarray(out2), np.asarray(r_out2), rtol=1e-4, atol=1e-4)
    np.testing.assert_allclose(np.asarray(af), np.asarray(r_af), rtol=1e-4, atol=1e-4)
    assert int(channel) == r_channel == POOL
    print("KERNEL_OK")
</pallas_src>

<mosaic_0001>
module attributes {stable_mosaic.version = 11 : i64} {
  func.func @_fused_lstm_head_kernel(%arg0: memref<2x16xi32, #tpu.memory_space<smem>>, %arg1: memref<216x256xf32, #tpu.memory_space<vmem>>, %arg2: memref<16x128xf32, #tpu.memory_space<vmem>>, %arg3: memref<32x256xf32, #tpu.memory_space<vmem>>, %arg4: memref<32x32xf32, #tpu.memory_space<vmem>>, %arg5: memref<32x32xf32, #tpu.memory_space<vmem>>) attributes {dimension_semantics = [], scalar_prefetch = 0 : i64, scratch_operands = 3 : i64, tpu.core_type = #tpu.core_type<tc>} {
    %c0 = arith.constant 0 : index
    %c0_0 = arith.constant 0 : index
    %0 = memref.load %arg0[%c0, %c0_0] : memref<2x16xi32, #tpu.memory_space<smem>>
    %c0_i32 = arith.constant 0 : i32
    %1 = arith.addi %c0_i32, %0 : i32
    %2 = arith.index_cast %1 : i32 to index
    %c0_1 = arith.constant 0 : index
    %3 = vector.load %arg1[%2, %c0_1] : memref<216x256xf32, #tpu.memory_space<vmem>>, vector<1x256xf32>
    %c0_2 = arith.constant 0 : index
    %c15 = arith.constant 15 : index
    %4 = memref.load %arg0[%c0_2, %c15] : memref<2x16xi32, #tpu.memory_space<smem>>
    %c56_i32 = arith.constant 56 : i32
    %5 = arith.addi %c56_i32, %4 : i32
    %6 = arith.index_cast %5 : i32 to index
    %c0_3 = arith.constant 0 : index
    %7 = vector.load %arg1[%6, %c0_3] : memref<216x256xf32, #tpu.memory_space<vmem>>, vector<1x256xf32>
    %8 = arith.addf %3, %7 : vector<1x256xf32>
    %c0_4 = arith.constant 0 : index
    %c0_5 = arith.constant 0 : index
    %9 = vector.load %arg3[%c0_4, %c0_5] : memref<32x256xf32, #tpu.memory_space<vmem>>, vector<1x256xf32>
    tpu.vector_store %arg3[%c0_4, %c0_5], %8 {strides = array<i32>} : memref<32x256xf32, #tpu.memory_space<vmem>>, vector<1x256xf32>,
    %c1 = arith.constant 1 : index
    %c0_6 = arith.constant 0 : index
    %10 = memref.load %arg0[%c1, %c0_6] : memref<2x16xi32, #tpu.memory_space<smem>>
    %c0_i32_7 = arith.constant 0 : i32
    %11 = arith.addi %c0_i32_7, %10 : i32
    %12 = arith.index_cast %11 : i32 to index
    %c0_8 = arith.constant 0 : index
    %13 = vector.load %arg1[%12, %c0_8] : memref<216x256xf32, #tpu.memory_space<vmem>>, vector<1x256xf32>
    %c1_9 = arith.constant 1 : index
    %c15_10 = arith.constant 15 : index
    %14 = memref.load %arg0[%c1_9, %c15_10] : memref<2x16xi32, #tpu.memory_space<smem>>
    %c56_i32_11 = arith.constant 56 : i32
    %15 = arith.addi %c56_i32_11, %14 : i32
    %16 = arith.index_cast %15 : i32 to index
    %c0_12 = arith.constant 0 : index
    %17 = vector.load %arg1[%16, %c0_12] : memref<216x256xf32, #tpu.memory_space<vmem>>, vector<1x256xf32>
    %18 = arith.addf %13, %17 : vector<1x256xf32>
    %c1_13 = arith.constant 1 : index
    %c0_14 = arith.constant 0 : index
    %19 = vector.load %arg3[%c1_13, %c0_14] : memref<32x256xf32, #tpu.memory_space<vmem>>, vector<1x256xf32>
    tpu.vector_store %arg3[%c1_13, %c0_14], %18 {strides = array<i32>} : memref<32x256xf32, #tpu.memory_space<vmem>>, vector<1x256xf32>,
    %c0_15 = arith.constant 0 : index
    %c1_16 = arith.constant 1 : index
    %20 = memref.load %arg0[%c0_15, %c1_16] : memref<2x16xi32, #tpu.memory_space<smem>>
    %c0_i32_17 = arith.constant 0 : i32
    %21 = arith.addi %c0_i32_17, %20 : i32
    %22 = arith.index_cast %21 : i32 to index
    %c0_18 = arith.constant 0 : index
    %23 = vector.load %arg1[%22, %c0_18] : memref<216x256xf32, #tpu.memory_space<vmem>>, vector<1x256xf32>
    %c0_19 = arith.constant 0 : index
    %c14 = arith.constant 14 : index
    %24 = memref.load %arg0[%c0_19, %c14] : memref<2x16xi32, #tpu.memory_space<smem>>
    %c56_i32_20 = arith.constant 56 : i32
    %25 = arith.addi %c56_i32_20, %24 : i32
    %26 = arith.index_cast %25 : i32 to index
    %c0_21 = arith.constant 0 : index
    %27 = vector.load %arg1[%26, %c0_21] : memref<216x256xf32, #tpu.memory_space<vmem>>, vector<1x256xf32>
    %28 = arith.addf %23, %27 : vector<1x256xf32>
    %c2 = arith.constant 2 : index
    %c0_22 = arith.constant 0 : index
    %29 = vector.load %arg3[%c2, %c0_22] : memref<32x256xf32, #tpu.memory_space<vmem>>, vector<1x256xf32>
    tpu.vector_store %arg3[%c2, %c0_22], %28 {strides = array<i32>} : memref<32x256xf32, #tpu.memory_space<vmem>>, vector<1x256xf32>,
    %c1_23 = arith.constant 1 : index
    %c1_24 = arith.constant 1 : index
    %30 = memref.load %arg0[%c1_23, %c1_24] : memref<2x16xi32, #tpu.memory_space<smem>>
    %c0_i32_25 = arith.constant 0 : i32
    %31 = arith.addi %c0_i32_25, %30 : i32
    %32 = arith.index_cast %31 : i32 to index
    %c0_26 = arith.constant 0 : index
    %33 = vector.load %arg1[%32, %c0_26] : memref<216x256xf32, #tpu.memory_space<vmem>>, vector<1x256xf32>
    %c1_27 = arith.constant 1 : index
    %c14_28 = arith.constant 14 : index
    %34 = memref.load %arg0[%c1_27, %c14_28] : memref<2x16xi32, #tpu.memory_space<smem>>
    %c56_i32_29 = arith.constant 56 : i32
    %35 = arith.addi %c56_i32_29, %34 : i32
    %36 = arith.index_cast %35 : i32 to index
    %c0_30 = arith.constant 0 : index
    %37 = vector.load %arg1[%36, %c0_30] : memref<216x256xf32, #tpu.memory_space<vmem>>, vector<1x256xf32>
    %38 = arith.addf %33, %37 : vector<1x256xf32>
    %c3 = arith.constant 3 : index
    %c0_31 = arith.constant 0 : index
    %39 = vector.load %arg3[%c3, %c0_31] : memref<32x256xf32, #tpu.memory_space<vmem>>, vector<1x256xf32>
    tpu.vector_store %arg3[%c3, %c0_31], %38 {strides = array<i32>} : memref<32x256xf32, #tpu.memory_space<vmem>>, vector<1x256xf32>,
    %c0_32 = arith.constant 0 : index
    %c2_33 = arith.constant 2 : index
    %40 = memref.load %arg0[%c0_32, %c2_33] : memref<2x16xi32, #tpu.memory_space<smem>>
    %c0_i32_34 = arith.constant 0 : i32
    %41 = arith.addi %c0_i32_34, %40 : i32
    %42 = arith.index_cast %41 : i32 to index
    %c0_35 = arith.constant 0 : index
    %43 = vector.load %arg1[%42, %c0_35] : memref<216x256xf32, #tpu.memory_space<vmem>>, vector<1x256xf32>
    %c0_36 = arith.constant 0 : index
    %c13 = arith.constant 13 : index
    %44 = memref.load %arg0[%c0_36, %c13] : memref<2x16xi32, #tpu.memory_space<smem>>
    %c56_i32_37 = arith.constant 56 : i32
    %45 = arith.addi %c56_i32_37, %44 : i32
    %46 = arith.index_cast %45 : i32 to index
    %c0_38 = arith.constant 0 : index
    %47 = vector.load %arg1[%46, %c0_38] : memref<216x256xf32, #tpu.memory_space<vmem>>, vector<1x256xf32>
    %48 = arith.addf %43, %47 : vector<1x256xf32>
    %c4 = arith.constant 4 : index
    %c0_39 = arith.constant 0 : index
    %49 = vector.load %arg3[%c4, %c0_39] : memref<32x256xf32, #tpu.memory_space<vmem>>, vector<1x256xf32>
    tpu.vector_store %arg3[%c4, %c0_39], %48 {strides = array<i32>} : memref<32x256xf32, #tpu.memory_space<vmem>>, vector<1x256xf32>,
    %c1_40 = arith.constant 1 : index
    %c2_41 = arith.constant 2 : index
    %50 = memref.load %arg0[%c1_40, %c2_41] : memref<2x16xi32, #tpu.memory_space<smem>>
    %c0_i32_42 = arith.constant 0 : i32
    %51 = arith.addi %c0_i32_42, %50 : i32
    %52 = arith.index_cast %51 : i32 to index
    %c0_43 = arith.constant 0 : index
    %53 = vector.load %arg1[%52, %c0_43] : memref<216x256xf32, #tpu.memory_space<vmem>>, vector<1x256xf32>
    %c1_44 = arith.constant 1 : index
    %c13_45 = arith.constant 13 : index
    %54 = memref.load %arg0[%c1_44, %c13_45] : memref<2x16xi32, #tpu.memory_space<smem>>
    %c56_i32_46 = arith.constant 56 : i32
    %55 = arith.addi %c56_i32_46, %54 : i32
    %56 = arith.index_cast %55 : i32 to index
    %c0_47 = arith.constant 0 : index
    %57 = vector.load %arg1[%56, %c0_47] : memref<216x256xf32, #tpu.memory_space<vmem>>, vector<1x256xf32>
    %58 = arith.addf %53, %57 : vector<1x256xf32>
    %c5 = arith.constant 5 : index
    %c0_48 = arith.constant 0 : index
    %59 = vector.load %arg3[%c5, %c0_48] : memref<32x256xf32, #tpu.memory_space<vmem>>, vector<1x256xf32>
    tpu.vector_store %arg3[%c5, %c0_48], %58 {strides = array<i32>} : memref<32x256xf32, #tpu.memory_space<vmem>>, vector<1x256xf32>,
    %c0_49 = arith.constant 0 : index
    %c3_50 = arith.constant 3 : index
    %60 = memref.load %arg0[%c0_49, %c3_50] : memref<2x16xi32, #tpu.memory_space<smem>>
    %c0_i32_51 = arith.constant 0 : i32
    %61 = arith.addi %c0_i32_51, %60 : i32
    %62 = arith.index_cast %61 : i32 to index
    %c0_52 = arith.constant 0 : index
    %63 = vector.load %arg1[%62, %c0_52] : memref<216x256xf32, #tpu.memory_space<vmem>>, vector<1x256xf32>
    %c0_53 = arith.constant 0 : index
    %c12 = arith.constant 12 : index
    %64 = memref.load %arg0[%c0_53, %c12] : memref<2x16xi32, #tpu.memory_space<smem>>
    %c56_i32_54 = arith.constant 56 : i32
    %65 = arith.addi %c56_i32_54, %64 : i32
    %66 = arith.index_cast %65 : i32 to index
    %c0_55 = arith.constant 0 : index
    %67 = vector.load %arg1[%66, %c0_55] : memref<216x256xf32, #tpu.memory_space<vmem>>, vector<1x256xf32>
    %68 = arith.addf %63, %67 : vector<1x256xf32>
    %c6 = arith.constant 6 : index
    %c0_56 = arith.constant 0 : index
    %69 = vector.load %arg3[%c6, %c0_56] : memref<32x256xf32, #tpu.memory_space<vmem>>, vector<1x256xf32>
    tpu.vector_store %arg3[%c6, %c0_56], %68 {strides = array<i32>} : memref<32x256xf32, #tpu.memory_space<vmem>>, vector<1x256xf32>,
    %c1_57 = arith.constant 1 : index
    %c3_58 = arith.constant 3 : index
    %70 = memref.load %arg0[%c1_57, %c3_58] : memref<2x16xi32, #tpu.memory_space<smem>>
    %c0_i32_59 = arith.constant 0 : i32
    %71 = arith.addi %c0_i32_59, %70 : i32
    %72 = arith.index_cast %71 : i32 to index
    %c0_60 = arith.constant 0 : index
    %73 = vector.load %arg1[%72, %c0_60] : memref<216x256xf32, #tpu.memory_space<vmem>>, vector<1x256xf32>
    %c1_61 = arith.constant 1 : index
    %c12_62 = arith.constant 12 : index
    %74 = memref.load %arg0[%c1_61, %c12_62] : memref<2x16xi32, #tpu.memory_space<smem>>
    %c56_i32_63 = arith.constant 56 : i32
    %75 = arith.addi %c56_i32_63, %74 : i32
    %76 = arith.index_cast %75 : i32 to index
    %c0_64 = arith.constant 0 : index
    %77 = vector.load %arg1[%76, %c0_64] : memref<216x256xf32, #tpu.memory_space<vmem>>, vector<1x256xf32>
    %78 = arith.addf %73, %77 : vector<1x256xf32>
    %c7 = arith.constant 7 : index
    %c0_65 = arith.constant 0 : index
    %79 = vector.load %arg3[%c7, %c0_65] : memref<32x256xf32, #tpu.memory_space<vmem>>, vector<1x256xf32>
    tpu.vector_store %arg3[%c7, %c0_65], %78 {strides = array<i32>} : memref<32x256xf32, #tpu.memory_space<vmem>>, vector<1x256xf32>,
    %c0_66 = arith.constant 0 : index
    %c4_67 = arith.constant 4 : index
    %80 = memref.load %arg0[%c0_66, %c4_67] : memref<2x16xi32, #tpu.memory_space<smem>>
    %c0_i32_68 = arith.constant 0 : i32
    %81 = arith.addi %c0_i32_68, %80 : i32
    %82 = arith.index_cast %81 : i32 to index
    %c0_69 = arith.constant 0 : index
    %83 = vector.load %arg1[%82, %c0_69] : memref<216x256xf32, #tpu.memory_space<vmem>>, vector<1x256xf32>
    %c0_70 = arith.constant 0 : index
    %c11 = arith.constant 11 : index
    %84 = memref.load %arg0[%c0_70, %c11] : memref<2x16xi32, #tpu.memory_space<smem>>
    %c56_i32_71 = arith.constant 56 : i32
    %85 = arith.addi %c56_i32_71, %84 : i32
    %86 = arith.index_cast %85 : i32 to index
    %c0_72 = arith.constant 0 : index
    %87 = vector.load %arg1[%86, %c0_72] : memref<216x256xf32, #tpu.memory_space<vmem>>, vector<1x256xf32>
    %88 = arith.addf %83, %87 : vector<1x256xf32>
    %c8 = arith.constant 8 : index
    %c0_73 = arith.constant 0 : index
    %89 = vector.load %arg3[%c8, %c0_73] : memref<32x256xf32, #tpu.memory_space<vmem>>, vector<1x256xf32>
    tpu.vector_store %arg3[%c8, %c0_73], %88 {strides = array<i32>} : memref<32x256xf32, #tpu.memory_space<vmem>>, vector<1x256xf32>,
    %c1_74 = arith.constant 1 : index
    %c4_75 = arith.constant 4 : index
    %90 = memref.load %arg0[%c1_74, %c4_75] : memref<2x16xi32, #tpu.memory_space<smem>>
    %c0_i32_76 = arith.constant 0 : i32
    %91 = arith.addi %c0_i32_76, %90 : i32
    %92 = arith.index_cast %91 : i32 to index
    %c0_77 = arith.constant 0 : index
    %93 = vector.load %arg1[%92, %c0_77] : memref<216x256xf32, #tpu.memory_space<vmem>>, vector<1x256xf32>
    %c1_78 = arith.constant 1 : index
    %c11_79 = arith.constant 11 : index
    %94 = memref.load %arg0[%c1_78, %c11_79] : memref<2x16xi32, #tpu.memory_space<smem>>
    %c56_i32_80 = arith.constant 56 : i32
    %95 = arith.addi %c56_i32_80, %94 : i32
    %96 = arith.index_cast %95 : i32 to index
    %c0_81 = arith.constant 0 : index
    %97 = vector.load %arg1[%96, %c0_81] : memref<216x256xf32, #tpu.memory_space<vmem>>, vector<1x256xf32>
    %98 = arith.addf %93, %97 : vector<1x256xf32>
    %c9 = arith.constant 9 : index
    %c0_82 = arith.constant 0 : index
    %99 = vector.load %arg3[%c9, %c0_82] : memref<32x256xf32, #tpu.memory_space<vmem>>, vector<1x256xf32>
    tpu.vector_store %arg3[%c9, %c0_82], %98 {strides = array<i32>} : memref<32x256xf32, #tpu.memory_space<vmem>>, vector<1x256xf32>,
    %c0_83 = arith.constant 0 : index
    %c5_84 = arith.constant 5 : index
    %100 = memref.load %arg0[%c0_83, %c5_84] : memref<2x16xi32, #tpu.memory_space<smem>>
    %c0_i32_85 = arith.constant 0 : i32
    %101 = arith.addi %c0_i32_85, %100 : i32
    %102 = arith.index_cast %101 : i32 to index
    %c0_86 = arith.constant 0 : index
    %103 = vector.load %arg1[%102, %c0_86] : memref<216x256xf32, #tpu.memory_space<vmem>>, vector<1x256xf32>
    %c0_87 = arith.constant 0 : index
    %c10 = arith.constant 10 : index
    %104 = memref.load %arg0[%c0_87, %c10] : memref<2x16xi32, #tpu.memory_space<smem>>
    %c56_i32_88 = arith.constant 56 : i32
    %105 = arith.addi %c56_i32_88, %104 : i32
    %106 = arith.index_cast %105 : i32 to index
    %c0_89 = arith.constant 0 : index
    %107 = vector.load %arg1[%106, %c0_89] : memref<216x256xf32, #tpu.memory_space<vmem>>, vector<1x256xf32>
    %108 = arith.addf %103, %107 : vector<1x256xf32>
    %c10_90 = arith.constant 10 : index
    %c0_91 = arith.constant 0 : index
    %109 = vector.load %arg3[%c10_90, %c0_91] : memref<32x256xf32, #tpu.memory_space<vmem>>, vector<1x256xf32>
    tpu.vector_store %arg3[%c10_90, %c0_91], %108 {strides = array<i32>} : memref<32x256xf32, #tpu.memory_space<vmem>>, vector<1x256xf32>,
    %c1_92 = arith.constant 1 : index
    %c5_93 = arith.constant 5 : index
    %110 = memref.load %arg0[%c1_92, %c5_93] : memref<2x16xi32, #tpu.memory_space<smem>>
    %c0_i32_94 = arith.constant 0 : i32
    %111 = arith.addi %c0_i32_94, %110 : i32
    %112 = arith.index_cast %111 : i32 to index
    %c0_95 = arith.constant 0 : index
    %113 = vector.load %arg1[%112, %c0_95] : memref<216x256xf32, #tpu.memory_space<vmem>>, vector<1x256xf32>
    %c1_96 = arith.constant 1 : index
    %c10_97 = arith.constant 10 : index
    %114 = memref.load %arg0[%c1_96, %c10_97] : memref<2x16xi32, #tpu.memory_space<smem>>
    %c56_i32_98 = arith.constant 56 : i32
    %115 = arith.addi %c56_i32_98, %114 : i32
    %116 = arith.index_cast %115 : i32 to index
    %c0_99 = arith.constant 0 : index
    %117 = vector.load %arg1[%116, %c0_99] : memref<216x256xf32, #tpu.memory_space<vmem>>, vector<1x256xf32>
    %118 = arith.addf %113, %117 : vector<1x256xf32>
    %c11_100 = arith.constant 11 : index
    %c0_101 = arith.constant 0 : index
    %119 = vector.load %arg3[%c11_100, %c0_101] : memref<32x256xf32, #tpu.memory_space<vmem>>, vector<1x256xf32>
    tpu.vector_store %arg3[%c11_100, %c0_101], %118 {strides = array<i32>} : memref<32x256xf32, #tpu.memory_space<vmem>>, vector<1x256xf32>,
    %c0_102 = arith.constant 0 : index
    %c6_103 = arith.constant 6 : index
    %120 = memref.load %arg0[%c0_102, %c6_103] : memref<2x16xi32, #tpu.memory_space<smem>>
    %c0_i32_104 = arith.constant 0 : i32
    %121 = arith.addi %c0_i32_104, %120 : i32
    %122 = arith.index_cast %121 : i32 to index
    %c0_105 = arith.constant 0 : index
    %123 = vector.load %arg1[%122, %c0_105] : memref<216x256xf32, #tpu.memory_space<vmem>>, vector<1x256xf32>
    %c0_106 = arith.constant 0 : index
    %c9_107 = arith.constant 9 : index
    %124 = memref.load %arg0[%c0_106, %c9_107] : memref<2x16xi32, #tpu.memory_space<smem>>
    %c56_i32_108 = arith.constant 56 : i32
    %125 = arith.addi %c56_i32_108, %124 : i32
    %126 = arith.index_cast %125 : i32 to index
    %c0_109 = arith.constant 0 : index
    %127 = vector.load %arg1[%126, %c0_109] : memref<216x256xf32, #tpu.memory_space<vmem>>, vector<1x256xf32>
    %128 = arith.addf %123, %127 : vector<1x256xf32>
    %c12_110 = arith.constant 12 : index
    %c0_111 = arith.constant 0 : index
    %129 = vector.load %arg3[%c12_110, %c0_111] : memref<32x256xf32, #tpu.memory_space<vmem>>, vector<1x256xf32>
    tpu.vector_store %arg3[%c12_110, %c0_111], %128 {strides = array<i32>} : memref<32x256xf32, #tpu.memory_space<vmem>>, vector<1x256xf32>,
    %c1_112 = arith.constant 1 : index
    %c6_113 = arith.constant 6 : index
    %130 = memref.load %arg0[%c1_112, %c6_113] : memref<2x16xi32, #tpu.memory_space<smem>>
    %c0_i32_114 = arith.constant 0 : i32
    %131 = arith.addi %c0_i32_114, %130 : i32
    %132 = arith.index_cast %131 : i32 to index
    %c0_115 = arith.constant 0 : index
    %133 = vector.load %arg1[%132, %c0_115] : memref<216x256xf32, #tpu.memory_space<vmem>>, vector<1x256xf32>
    %c1_116 = arith.constant 1 : index
    %c9_117 = arith.constant 9 : index
    %134 = memref.load %arg0[%c1_116, %c9_117] : memref<2x16xi32, #tpu.memory_space<smem>>
    %c56_i32_118 = arith.constant 56 : i32
    %135 = arith.addi %c56_i32_118, %134 : i32
    %136 = arith.index_cast %135 : i32 to index
    %c0_119 = arith.constant 0 : index
    %137 = vector.load %arg1[%136, %c0_119] : memref<216x256xf32, #tpu.memory_space<vmem>>, vector<1x256xf32>
    %138 = arith.addf %133, %137 : vector<1x256xf32>
    %c13_120 = arith.constant 13 : index
    %c0_121 = arith.constant 0 : index
    %139 = vector.load %arg3[%c13_120, %c0_121] : memref<32x256xf32, #tpu.memory_space<vmem>>, vector<1x256xf32>
    tpu.vector_store %arg3[%c13_120, %c0_121], %138 {strides = array<i32>} : memref<32x256xf32, #tpu.memory_space<vmem>>, vector<1x256xf32>,
    %c0_122 = arith.constant 0 : index
    %c7_123 = arith.constant 7 : index
    %140 = memref.load %arg0[%c0_122, %c7_123] : memref<2x16xi32, #tpu.memory_space<smem>>
    %c0_i32_124 = arith.constant 0 : i32
    %141 = arith.addi %c0_i32_124, %140 : i32
    %142 = arith.index_cast %141 : i32 to index
    %c0_125 = arith.constant 0 : index
    %143 = vector.load %arg1[%142, %c0_125] : memref<216x256xf32, #tpu.memory_space<vmem>>, vector<1x256xf32>
    %c0_126 = arith.constant 0 : index
    %c8_127 = arith.constant 8 : index
    %144 = memref.load %arg0[%c0_126, %c8_127] : memref<2x16xi32, #tpu.memory_space<smem>>
    %c56_i32_128 = arith.constant 56 : i32
    %145 = arith.addi %c56_i32_128, %144 : i32
    %146 = arith.index_cast %145 : i32 to index
    %c0_129 = arith.constant 0 : index
    %147 = vector.load %arg1[%146, %c0_129] : memref<216x256xf32, #tpu.memory_space<vmem>>, vector<1x256xf32>
    %148 = arith.addf %143, %147 : vector<1x256xf32>
    %c14_130 = arith.constant 14 : index
    %c0_131 = arith.constant 0 : index
    %149 = vector.load %arg3[%c14_130, %c0_131] : memref<32x256xf32, #tpu.memory_space<vmem>>, vector<1x256xf32>
    tpu.vector_store %arg3[%c14_130, %c0_131], %148 {strides = array<i32>} : memref<32x256xf32, #tpu.memory_space<vmem>>, vector<1x256xf32>,
    %c1_132 = arith.constant 1 : index
    %c7_133 = arith.constant 7 : index
    %150 = memref.load %arg0[%c1_132, %c7_133] : memref<2x16xi32, #tpu.memory_space<smem>>
    %c0_i32_134 = arith.constant 0 : i32
    %151 = arith.addi %c0_i32_134, %150 : i32
    %152 = arith.index_cast %151 : i32 to index
    %c0_135 = arith.constant 0 : index
    %153 = vector.load %arg1[%152, %c0_135] : memref<216x256xf32, #tpu.memory_space<vmem>>, vector<1x256xf32>
    %c1_136 = arith.constant 1 : index
    %c8_137 = arith.constant 8 : index
    %154 = memref.load %arg0[%c1_136, %c8_137] : memref<2x16xi32, #tpu.memory_space<smem>>
    %c56_i32_138 = arith.constant 56 : i32
    %155 = arith.addi %c56_i32_138, %154 : i32
    %156 = arith.index_cast %155 : i32 to index
    %c0_139 = arith.constant 0 : index
    %157 = vector.load %arg1[%156, %c0_139] : memref<216x256xf32, #tpu.memory_space<vmem>>, vector<1x256xf32>
    %158 = arith.addf %153, %157 : vector<1x256xf32>
    %c15_140 = arith.constant 15 : index
    %c0_141 = arith.constant 0 : index
    %159 = vector.load %arg3[%c15_140, %c0_141] : memref<32x256xf32, #tpu.memory_space<vmem>>, vector<1x256xf32>
    tpu.vector_store %arg3[%c15_140, %c0_141], %158 {strides = array<i32>} : memref<32x256xf32, #tpu.memory_space<vmem>>, vector<1x256xf32>,
    %c0_142 = arith.constant 0 : index
    %c8_143 = arith.constant 8 : index
    %160 = memref.load %arg0[%c0_142, %c8_143] : memref<2x16xi32, #tpu.memory_space<smem>>
    %c0_i32_144 = arith.constant 0 : i32
    %161 = arith.addi %c0_i32_144, %160 : i32
    %162 = arith.index_cast %161 : i32 to index
    %c0_145 = arith.constant 0 : index
    %163 = vector.load %arg1[%162, %c0_145] : memref<216x256xf32, #tpu.memory_space<vmem>>, vector<1x256xf32>
    %c0_146 = arith.constant 0 : index
    %c7_147 = arith.constant 7 : index
    %164 = memref.load %arg0[%c0_146, %c7_147] : memref<2x16xi32, #tpu.memory_space<smem>>
    %c56_i32_148 = arith.constant 56 : i32
    %165 = arith.addi %c56_i32_148, %164 : i32
    %166 = arith.index_cast %165 : i32 to index
    %c0_149 = arith.constant 0 : index
    %167 = vector.load %arg1[%166, %c0_149] : memref<216x256xf32, #tpu.memory_space<vmem>>, vector<1x256xf32>
    %168 = arith.addf %163, %167 : vector<1x256xf32>
    %c16 = arith.constant 16 : index
    %c0_150 = arith.constant 0 : index
    %169 = vector.load %arg3[%c16, %c0_150] : memref<32x256xf32, #tpu.memory_space<vmem>>, vector<1x256xf32>
    tpu.vector_store %arg3[%c16, %c0_150], %168 {strides = array<i32>} : memref<32x256xf32, #tpu.memory_space<vmem>>, vector<1x256xf32>,
    %c1_151 = arith.constant 1 : index
    %c8_152 = arith.constant 8 : index
    %170 = memref.load %arg0[%c1_151, %c8_152] : memref<2x16xi32, #tpu.memory_space<smem>>
    %c0_i32_153 = arith.constant 0 : i32
    %171 = arith.addi %c0_i32_153, %170 : i32
    %172 = arith.index_cast %171 : i32 to index
    %c0_154 = arith.constant 0 : index
    %173 = vector.load %arg1[%172, %c0_154] : memref<216x256xf32, #tpu.memory_space<vmem>>, vector<1x256xf32>
    %c1_155 = arith.constant 1 : index
    %c7_156 = arith.constant 7 : index
    %174 = memref.load %arg0[%c1_155, %c7_156] : memref<2x16xi32, #tpu.memory_space<smem>>
    %c56_i32_157 = arith.constant 56 : i32
    %175 = arith.addi %c56_i32_157, %174 : i32
    %176 = arith.index_cast %175 : i32 to index
    %c0_158 = arith.constant 0 : index
    %177 = vector.load %arg1[%176, %c0_158] : memref<216x256xf32, #tpu.memory_space<vmem>>, vector<1x256xf32>
    %178 = arith.addf %173, %177 : vector<1x256xf32>
    %c17 = arith.constant 17 : index
    %c0_159 = arith.constant 0 : index
    %179 = vector.load %arg3[%c17, %c0_159] : memref<32x256xf32, #tpu.memory_space<vmem>>, vector<1x256xf32>
    tpu.vector_store %arg3[%c17, %c0_159], %178 {strides = array<i32>} : memref<32x256xf32, #tpu.memory_space<vmem>>, vector<1x256xf32>,
    %c0_160 = arith.constant 0 : index
    %c9_161 = arith.constant 9 : index
    %180 = memref.load %arg0[%c0_160, %c9_161] : memref<2x16xi32, #tpu.memory_space<smem>>
    %c0_i32_162 = arith.constant 0 : i32
    %181 = arith.addi %c0_i32_162, %180 : i32
    %182 = arith.index_cast %181 : i32 to index
    %c0_163 = arith.constant 0 : index
    %183 = vector.load %arg1[%182, %c0_163] : memref<216x256xf32, #tpu.memory_space<vmem>>, vector<1x256xf32>
    %c0_164 = arith.constant 0 : index
    %c6_165 = arith.constant 6 : index
    %184 = memref.load %arg0[%c0_164, %c6_165] : memref<2x16xi32, #tpu.memory_space<smem>>
    %c56_i32_166 = arith.constant 56 : i32
    %185 = arith.addi %c56_i32_166, %184 : i32
    %186 = arith.index_cast %185 : i32 to index
    %c0_167 = arith.constant 0 : index
    %187 = vector.load %arg1[%186, %c0_167] : memref<216x256xf32, #tpu.memory_space<vmem>>, vector<1x256xf32>
    %188 = arith.addf %183, %187 : vector<1x256xf32>
    %c18 = arith.constant 18 : index
    %c0_168 = arith.constant 0 : index
    %189 = vector.load %arg3[%c18, %c0_168] : memref<32x256xf32, #tpu.memory_space<vmem>>, vector<1x256xf32>
    tpu.vector_store %arg3[%c18, %c0_168], %188 {strides = array<i32>} : memref<32x256xf32, #tpu.memory_space<vmem>>, vector<1x256xf32>,
    %c1_169 = arith.constant 1 : index
    %c9_170 = arith.constant 9 : index
    %190 = memref.load %arg0[%c1_169, %c9_170] : memref<2x16xi32, #tpu.memory_space<smem>>
    %c0_i32_171 = arith.constant 0 : i32
    %191 = arith.addi %c0_i32_171, %190 : i32
    %192 = arith.index_cast %191 : i32 to index
    %c0_172 = arith.constant 0 : index
    %193 = vector.load %arg1[%192, %c0_172] : memref<216x256xf32, #tpu.memory_space<vmem>>, vector<1x256xf32>
    %c1_173 = arith.constant 1 : index
    %c6_174 = arith.constant 6 : index
    %194 = memref.load %arg0[%c1_173, %c6_174] : memref<2x16xi32, #tpu.memory_space<smem>>
    %c56_i32_175 = arith.constant 56 : i32
    %195 = arith.addi %c56_i32_175, %194 : i32
    %196 = arith.index_cast %195 : i32 to index
    %c0_176 = arith.constant 0 : index
    %197 = vector.load %arg1[%196, %c0_176] : memref<216x256xf32, #tpu.memory_space<vmem>>, vector<1x256xf32>
    %198 = arith.addf %193, %197 : vector<1x256xf32>
    %c19 = arith.constant 19 : index
    %c0_177 = arith.constant 0 : index
    %199 = vector.load %arg3[%c19, %c0_177] : memref<32x256xf32, #tpu.memory_space<vmem>>, vector<1x256xf32>
    tpu.vector_store %arg3[%c19, %c0_177], %198 {strides = array<i32>} : memref<32x256xf32, #tpu.memory_space<vmem>>, vector<1x256xf32>,
    %c0_178 = arith.constant 0 : index
    %c10_179 = arith.constant 10 : index
    %200 = memref.load %arg0[%c0_178, %c10_179] : memref<2x16xi32, #tpu.memory_space<smem>>
    %c0_i32_180 = arith.constant 0 : i32
    %201 = arith.addi %c0_i32_180, %200 : i32
    %202 = arith.index_cast %201 : i32 to index
    %c0_181 = arith.constant 0 : index
    %203 = vector.load %arg1[%202, %c0_181] : memref<216x256xf32, #tpu.memory_space<vmem>>, vector<1x256xf32>
    %c0_182 = arith.constant 0 : index
    %c5_183 = arith.constant 5 : index
    %204 = memref.load %arg0[%c0_182, %c5_183] : memref<2x16xi32, #tpu.memory_space<smem>>
    %c56_i32_184 = arith.constant 56 : i32
    %205 = arith.addi %c56_i32_184, %204 : i32
    %206 = arith.index_cast %205 : i32 to index
    %c0_185 = arith.constant 0 : index
    %207 = vector.load %arg1[%206, %c0_185] : memref<216x256xf32, #tpu.memory_space<vmem>>, vector<1x256xf32>
    %208 = arith.addf %203, %207 : vector<1x256xf32>
    %c20 = arith.constant 20 : index
    %c0_186 = arith.constant 0 : index
    %209 = vector.load %arg3[%c20, %c0_186] : memref<32x256xf32, #tpu.memory_space<vmem>>, vector<1x256xf32>
    tpu.vector_store %arg3[%c20, %c0_186], %208 {strides = array<i32>} : memref<32x256xf32, #tpu.memory_space<vmem>>, vector<1x256xf32>,
    %c1_187 = arith.constant 1 : index
    %c10_188 = arith.constant 10 : index
    %210 = memref.load %arg0[%c1_187, %c10_188] : memref<2x16xi32, #tpu.memory_space<smem>>
    %c0_i32_189 = arith.constant 0 : i32
    %211 = arith.addi %c0_i32_189, %210 : i32
    %212 = arith.index_cast %211 : i32 to index
    %c0_190 = arith.constant 0 : index
    %213 = vector.load %arg1[%212, %c0_190] : memref<216x256xf32, #tpu.memory_space<vmem>>, vector<1x256xf32>
    %c1_191 = arith.constant 1 : index
    %c5_192 = arith.constant 5 : index
    %214 = memref.load %arg0[%c1_191, %c5_192] : memref<2x16xi32, #tpu.memory_space<smem>>
    %c56_i32_193 = arith.constant 56 : i32
    %215 = arith.addi %c56_i32_193, %214 : i32
    %216 = arith.index_cast %215 : i32 to index
    %c0_194 = arith.constant 0 : index
    %217 = vector.load %arg1[%216, %c0_194] : memref<216x256xf32, #tpu.memory_space<vmem>>, vector<1x256xf32>
    %218 = arith.addf %213, %217 : vector<1x256xf32>
    %c21 = arith.constant 21 : index
    %c0_195 = arith.constant 0 : index
    %219 = vector.load %arg3[%c21, %c0_195] : memref<32x256xf32, #tpu.memory_space<vmem>>, vector<1x256xf32>
    tpu.vector_store %arg3[%c21, %c0_195], %218 {strides = array<i32>} : memref<32x256xf32, #tpu.memory_space<vmem>>, vector<1x256xf32>,
    %c0_196 = arith.constant 0 : index
    %c11_197 = arith.constant 11 : index
    %220 = memref.load %arg0[%c0_196, %c11_197] : memref<2x16xi32, #tpu.memory_space<smem>>
    %c0_i32_198 = arith.constant 0 : i32
    %221 = arith.addi %c0_i32_198, %220 : i32
    %222 = arith.index_cast %221 : i32 to index
    %c0_199 = arith.constant 0 : index
    %223 = vector.load %arg1[%222, %c0_199] : memref<216x256xf32, #tpu.memory_space<vmem>>, vector<1x256xf32>
    %c0_200 = arith.constant 0 : index
    %c4_201 = arith.constant 4 : index
    %224 = memref.load %arg0[%c0_200, %c4_201] : memref<2x16xi32, #tpu.memory_space<smem>>
    %c56_i32_202 = arith.constant 56 : i32
    %225 = arith.addi %c56_i32_202, %224 : i32
    %226 = arith.index_cast %225 : i32 to index
    %c0_203 = arith.constant 0 : index
    %227 = vector.load %arg1[%226, %c0_203] : memref<216x256xf32, #tpu.memory_space<vmem>>, vector<1x256xf32>
    %228 = arith.addf %223, %227 : vector<1x256xf32>
    %c22 = arith.constant 22 : index
    %c0_204 = arith.constant 0 : index
    %229 = vector.load %arg3[%c22, %c0_204] : memref<32x256xf32, #tpu.memory_space<vmem>>, vector<1x256xf32>
    tpu.vector_store %arg3[%c22, %c0_204], %228 {strides = array<i32>} : memref<32x256xf32, #tpu.memory_space<vmem>>, vector<1x256xf32>,
    %c1_205 = arith.constant 1 : index
    %c11_206 = arith.constant 11 : index
    %230 = memref.load %arg0[%c1_205, %c11_206] : memref<2x16xi32, #tpu.memory_space<smem>>
    %c0_i32_207 = arith.constant 0 : i32
    %231 = arith.addi %c0_i32_207, %230 : i32
    %232 = arith.index_cast %231 : i32 to index
    %c0_208 = arith.constant 0 : index
    %233 = vector.load %arg1[%232, %c0_208] : memref<216x256xf32, #tpu.memory_space<vmem>>, vector<1x256xf32>
    %c1_209 = arith.constant 1 : index
    %c4_210 = arith.constant 4 : index
    %234 = memref.load %arg0[%c1_209, %c4_210] : memref<2x16xi32, #tpu.memory_space<smem>>
    %c56_i32_211 = arith.constant 56 : i32
    %235 = arith.addi %c56_i32_211, %234 : i32
    %236 = arith.index_cast %235 : i32 to index
    %c0_212 = arith.constant 0 : index
    %237 = vector.load %arg1[%236, %c0_212] : memref<216x256xf32, #tpu.memory_space<vmem>>, vector<1x256xf32>
    %238 = arith.addf %233, %237 : vector<1x256xf32>
    %c23 = arith.constant 23 : index
    %c0_213 = arith.constant 0 : index
    %239 = vector.load %arg3[%c23, %c0_213] : memref<32x256xf32, #tpu.memory_space<vmem>>, vector<1x256xf32>
    tpu.vector_store %arg3[%c23, %c0_213], %238 {strides = array<i32>} : memref<32x256xf32, #tpu.memory_space<vmem>>, vector<1x256xf32>,
    %c0_214 = arith.constant 0 : index
    %c12_215 = arith.constant 12 : index
    %240 = memref.load %arg0[%c0_214, %c12_215] : memref<2x16xi32, #tpu.memory_space<smem>>
    %c0_i32_216 = arith.constant 0 : i32
    %241 = arith.addi %c0_i32_216, %240 : i32
    %242 = arith.index_cast %241 : i32 to index
    %c0_217 = arith.constant 0 : index
    %243 = vector.load %arg1[%242, %c0_217] : memref<216x256xf32, #tpu.memory_space<vmem>>, vector<1x256xf32>
    %c0_218 = arith.constant 0 : index
    %c3_219 = arith.constant 3 : index
    %244 = memref.load %arg0[%c0_218, %c3_219] : memref<2x16xi32, #tpu.memory_space<smem>>
    %c56_i32_220 = arith.constant 56 : i32
    %245 = arith.addi %c56_i32_220, %244 : i32
    %246 = arith.index_cast %245 : i32 to index
    %c0_221 = arith.constant 0 : index
    %247 = vector.load %arg1[%246, %c0_221] : memref<216x256xf32, #tpu.memory_space<vmem>>, vector<1x256xf32>
    %248 = arith.addf %243, %247 : vector<1x256xf32>
    %c24 = arith.constant 24 : index
    %c0_222 = arith.constant 0 : index
    %249 = vector.load %arg3[%c24, %c0_222] : memref<32x256xf32, #tpu.memory_space<vmem>>, vector<1x256xf32>
    tpu.vector_store %arg3[%c24, %c0_222], %248 {strides = array<i32>} : memref<32x256xf32, #tpu.memory_space<vmem>>, vector<1x256xf32>,
    %c1_223 = arith.constant 1 : index
    %c12_224 = arith.constant 12 : index
    %250 = memref.load %arg0[%c1_223, %c12_224] : memref<2x16xi32, #tpu.memory_space<smem>>
    %c0_i32_225 = arith.constant 0 : i32
    %251 = arith.addi %c0_i32_225, %250 : i32
    %252 = arith.index_cast %251 : i32 to index
    %c0_226 = arith.constant 0 : index
    %253 = vector.load %arg1[%252, %c0_226] : memref<216x256xf32, #tpu.memory_space<vmem>>, vector<1x256xf32>
    %c1_227 = arith.constant 1 : index
    %c3_228 = arith.constant 3 : index
    %254 = memref.load %arg0[%c1_227, %c3_228] : memref<2x16xi32, #tpu.memory_space<smem>>
    %c56_i32_229 = arith.constant 56 : i32
    %255 = arith.addi %c56_i32_229, %254 : i32
    %256 = arith.index_cast %255 : i32 to index
    %c0_230 = arith.constant 0 : index
    %257 = vector.load %arg1[%256, %c0_230] : memref<216x256xf32, #tpu.memory_space<vmem>>, vector<1x256xf32>
    %258 = arith.addf %253, %257 : vector<1x256xf32>
    %c25 = arith.constant 25 : index
    %c0_231 = arith.constant 0 : index
    %259 = vector.load %arg3[%c25, %c0_231] : memref<32x256xf32, #tpu.memory_space<vmem>>, vector<1x256xf32>
    tpu.vector_store %arg3[%c25, %c0_231], %258 {strides = array<i32>} : memref<32x256xf32, #tpu.memory_space<vmem>>, vector<1x256xf32>,
    %c0_232 = arith.constant 0 : index
    %c13_233 = arith.constant 13 : index
    %260 = memref.load %arg0[%c0_232, %c13_233] : memref<2x16xi32, #tpu.memory_space<smem>>
    %c0_i32_234 = arith.constant 0 : i32
    %261 = arith.addi %c0_i32_234, %260 : i32
    %262 = arith.index_cast %261 : i32 to index
    %c0_235 = arith.constant 0 : index
    %263 = vector.load %arg1[%262, %c0_235] : memref<216x256xf32, #tpu.memory_space<vmem>>, vector<1x256xf32>
    %c0_236 = arith.constant 0 : index
    %c2_237 = arith.constant 2 : index
    %264 = memref.load %arg0[%c0_236, %c2_237] : memref<2x16xi32, #tpu.memory_space<smem>>
    %c56_i32_238 = arith.constant 56 : i32
    %265 = arith.addi %c56_i32_238, %264 : i32
    %266 = arith.index_cast %265 : i32 to index
    %c0_239 = arith.constant 0 : index
    %267 = vector.load %arg1[%266, %c0_239] : memref<216x256xf32, #tpu.memory_space<vmem>>, vector<1x256xf32>
    %268 = arith.addf %263, %267 : vector<1x256xf32>
    %c26 = arith.constant 26 : index
    %c0_240 = arith.constant 0 : index
    %269 = vector.load %arg3[%c26, %c0_240] : memref<32x256xf32, #tpu.memory_space<vmem>>, vector<1x256xf32>
    tpu.vector_store %arg3[%c26, %c0_240], %268 {strides = array<i32>} : memref<32x256xf32, #tpu.memory_space<vmem>>, vector<1x256xf32>,
    %c1_241 = arith.constant 1 : index
    %c13_242 = arith.constant 13 : index
    %270 = memref.load %arg0[%c1_241, %c13_242] : memref<2x16xi32, #tpu.memory_space<smem>>
    %c0_i32_243 = arith.constant 0 : i32
    %271 = arith.addi %c0_i32_243, %270 : i32
    %272 = arith.index_cast %271 : i32 to index
    %c0_244 = arith.constant 0 : index
    %273 = vector.load %arg1[%272, %c0_244] : memref<216x256xf32, #tpu.memory_space<vmem>>, vector<1x256xf32>
    %c1_245 = arith.constant 1 : index
    %c2_246 = arith.constant 2 : index
    %274 = memref.load %arg0[%c1_245, %c2_246] : memref<2x16xi32, #tpu.memory_space<smem>>
    %c56_i32_247 = arith.constant 56 : i32
    %275 = arith.addi %c56_i32_247, %274 : i32
    %276 = arith.index_cast %275 : i32 to index
    %c0_248 = arith.constant 0 : index
    %277 = vector.load %arg1[%276, %c0_248] : memref<216x256xf32, #tpu.memory_space<vmem>>, vector<1x256xf32>
    %278 = arith.addf %273, %277 : vector<1x256xf32>
    %c27 = arith.constant 27 : index
    %c0_249 = arith.constant 0 : index
    %279 = vector.load %arg3[%c27, %c0_249] : memref<32x256xf32, #tpu.memory_space<vmem>>, vector<1x256xf32>
    tpu.vector_store %arg3[%c27, %c0_249], %278 {strides = array<i32>} : memref<32x256xf32, #tpu.memory_space<vmem>>, vector<1x256xf32>,
    %c0_250 = arith.constant 0 : index
    %c14_251 = arith.constant 14 : index
    %280 = memref.load %arg0[%c0_250, %c14_251] : memref<2x16xi32, #tpu.memory_space<smem>>
    %c0_i32_252 = arith.constant 0 : i32
    %281 = arith.addi %c0_i32_252, %280 : i32
    %282 = arith.index_cast %281 : i32 to index
    %c0_253 = arith.constant 0 : index
    %283 = vector.load %arg1[%282, %c0_253] : memref<216x256xf32, #tpu.memory_space<vmem>>, vector<1x256xf32>
    %c0_254 = arith.constant 0 : index
    %c1_255 = arith.constant 1 : index
    %284 = memref.load %arg0[%c0_254, %c1_255] : memref<2x16xi32, #tpu.memory_space<smem>>
    %c56_i32_256 = arith.constant 56 : i32
    %285 = arith.addi %c56_i32_256, %284 : i32
    %286 = arith.index_cast %285 : i32 to index
    %c0_257 = arith.constant 0 : index
    %287 = vector.load %arg1[%286, %c0_257] : memref<216x256xf32, #tpu.memory_space<vmem>>, vector<1x256xf32>
    %288 = arith.addf %283, %287 : vector<1x256xf32>
    %c28 = arith.constant 28 : index
    %c0_258 = arith.constant 0 : index
    %289 = vector.load %arg3[%c28, %c0_258] : memref<32x256xf32, #tpu.memory_space<vmem>>, vector<1x256xf32>
    tpu.vector_store %arg3[%c28, %c0_258], %288 {strides = array<i32>} : memref<32x256xf32, #tpu.memory_space<vmem>>, vector<1x256xf32>,
    %c1_259 = arith.constant 1 : index
    %c14_260 = arith.constant 14 : index
    %290 = memref.load %arg0[%c1_259, %c14_260] : memref<2x16xi32, #tpu.memory_space<smem>>
    %c0_i32_261 = arith.constant 0 : i32
    %291 = arith.addi %c0_i32_261, %290 : i32
    %292 = arith.index_cast %291 : i32 to index
    %c0_262 = arith.constant 0 : index
    %293 = vector.load %arg1[%292, %c0_262] : memref<216x256xf32, #tpu.memory_space<vmem>>, vector<1x256xf32>
    %c1_263 = arith.constant 1 : index
    %c1_264 = arith.constant 1 : index
    %294 = memref.load %arg0[%c1_263, %c1_264] : memref<2x16xi32, #tpu.memory_space<smem>>
    %c56_i32_265 = arith.constant 56 : i32
    %295 = arith.addi %c56_i32_265, %294 : i32
    %296 = arith.index_cast %295 : i32 to index
    %c0_266 = arith.constant 0 : index
    %297 = vector.load %arg1[%296, %c0_266] : memref<216x256xf32, #tpu.memory_space<vmem>>, vector<1x256xf32>
    %298 = arith.addf %293, %297 : vector<1x256xf32>
    %c29 = arith.constant 29 : index
    %c0_267 = arith.constant 0 : index
    %299 = vector.load %arg3[%c29, %c0_267] : memref<32x256xf32, #tpu.memory_space<vmem>>, vector<1x256xf32>
    tpu.vector_store %arg3[%c29, %c0_267], %298 {strides = array<i32>} : memref<32x256xf32, #tpu.memory_space<vmem>>, vector<1x256xf32>,
    %c0_268 = arith.constant 0 : index
    %c15_269 = arith.constant 15 : index
    %300 = memref.load %arg0[%c0_268, %c15_269] : memref<2x16xi32, #tpu.memory_space<smem>>
    %c0_i32_270 = arith.constant 0 : i32
    %301 = arith.addi %c0_i32_270, %300 : i32
    %302 = arith.index_cast %301 : i32 to index
    %c0_271 = arith.constant 0 : index
    %303 = vector.load %arg1[%302, %c0_271] : memref<216x256xf32, #tpu.memory_space<vmem>>, vector<1x256xf32>
    %c0_272 = arith.constant 0 : index
    %c0_273 = arith.constant 0 : index
    %304 = memref.load %arg0[%c0_272, %c0_273] : memref<2x16xi32, #tpu.memory_space<smem>>
    %c56_i32_274 = arith.constant 56 : i32
    %305 = arith.addi %c56_i32_274, %304 : i32
    %306 = arith.index_cast %305 : i32 to index
    %c0_275 = arith.constant 0 : index
    %307 = vector.load %arg1[%306, %c0_275] : memref<216x256xf32, #tpu.memory_space<vmem>>, vector<1x256xf32>
    %308 = arith.addf %303, %307 : vector<1x256xf32>
    %c30 = arith.constant 30 : index
    %c0_276 = arith.constant 0 : index
    %309 = vector.load %arg3[%c30, %c0_276] : memref<32x256xf32, #tpu.memory_space<vmem>>, vector<1x256xf32>
    tpu.vector_store %arg3[%c30, %c0_276], %308 {strides = array<i32>} : memref<32x256xf32, #tpu.memory_space<vmem>>, vector<1x256xf32>,
    %c1_277 = arith.constant 1 : index
    %c15_278 = arith.constant 15 : index
    %310 = memref.load %arg0[%c1_277, %c15_278] : memref<2x16xi32, #tpu.memory_space<smem>>
    %c0_i32_279 = arith.constant 0 : i32
    %311 = arith.addi %c0_i32_279, %310 : i32
    %312 = arith.index_cast %311 : i32 to index
    %c0_280 = arith.constant 0 : index
    %313 = vector.load %arg1[%312, %c0_280] : memref<216x256xf32, #tpu.memory_space<vmem>>, vector<1x256xf32>
    %c1_281 = arith.constant 1 : index
    %c0_282 = arith.constant 0 : index
    %314 = memref.load %arg0[%c1_281, %c0_282] : memref<2x16xi32, #tpu.memory_space<smem>>
    %c56_i32_283 = arith.constant 56 : i32
    %315 = arith.addi %c56_i32_283, %314 : i32
    %316 = arith.index_cast %315 : i32 to index
    %c0_284 = arith.constant 0 : index
    %317 = vector.load %arg1[%316, %c0_284] : memref<216x256xf32, #tpu.memory_space<vmem>>, vector<1x256xf32>
    %318 = arith.addf %313, %317 : vector<1x256xf32>
    %c31 = arith.constant 31 : index
    %c0_285 = arith.constant 0 : index
    %319 = vector.load %arg3[%c31, %c0_285] : memref<32x256xf32, #tpu.memory_space<vmem>>, vector<1x256xf32>
    tpu.vector_store %arg3[%c31, %c0_285], %318 {strides = array<i32>} : memref<32x256xf32, #tpu.memory_space<vmem>>, vector<1x256xf32>,
    %c112 = arith.constant 112 : index
    %c0_286 = arith.constant 0 : index
    %320 = vector.load %arg1[%c112, %c0_286] : memref<216x256xf32, #tpu.memory_space<vmem>>, vector<64x256xf32>
    %cst = arith.constant 0.000000e+00 : f32
    %321 = vector.broadcast %cst : f32 to vector<2x64xf32>
    %cst_287 = arith.constant 0.000000e+00 : f32
    %322 = vector.broadcast %cst_287 : f32 to vector<2x64xf32>
    %c0_288 = arith.constant 0 : index
    %c0_289 = arith.constant 0 : index
    %323 = vector.load %arg3[%c0_288, %c0_289] : memref<32x256xf32, #tpu.memory_space<vmem>>, vector<2x256xf32>
    %cst_290 = arith.constant dense<0.000000e+00> : vector<2x256xf32>
    %324 = tpu.matmul %321, %320, %cst_290 {dimension_numbers = #tpu.dot_dimension_numbers<[1], [0], [0], [1], [0, 0, 1, 1], [], []>} : vector<2x64xf32>, vector<64x256xf32>, vector<2x256xf32> -> vector<2x256xf32>
    %325 = arith.addf %323, %324 : vector<2x256xf32>
    %326 = vector.extract_strided_slice %325 {offsets = [0, 0], sizes = [2, 64], strides = [1, 1]} : vector<2x256xf32> to vector<2x64xf32>
    %327 = arith.negf %326 : vector<2x64xf32>
    %328 = math.exp %327 : vector<2x64xf32>
    %cst_291 = arith.constant 1.000000e+00 : f32
    %329 = vector.broadcast %cst_291 : f32 to vector<2x64xf32>
    %330 = arith.addf %329, %328 : vector<2x64xf32>
    %331 = arith.divf %329, %330 : vector<2x64xf32>
    %332 = vector.extract_strided_slice %325 {offsets = [0, 64], sizes = [2, 64], strides = [1, 1]} : vector<2x256xf32> to vector<2x64xf32>
    %333 = arith.negf %332 : vector<2x64xf32>
    %334 = math.exp %333 : vector<2x64xf32>
    %cst_292 = arith.constant 1.000000e+00 : f32
    %335 = vector.broadcast %cst_292 : f32 to vector<2x64xf32>
    %336 = arith.addf %335, %334 : vector<2x64xf32>
    %337 = arith.divf %335, %336 : vector<2x64xf32>
    %338 = vector.extract_strided_slice %325 {offsets = [0, 128], sizes = [2, 64], strides = [1, 1]} : vector<2x256xf32> to vector<2x64xf32>
    %339 = math.tanh %338 : vector<2x64xf32>
    %340 = vector.extract_strided_slice %325 {offsets = [0, 192], sizes = [2, 64], strides = [1, 1]} : vector<2x256xf32> to vector<2x64xf32>
    %341 = arith.negf %340 : vector<2x64xf32>
    %342 = math.exp %341 : vector<2x64xf32>
    %cst_293 = arith.constant 1.000000e+00 : f32
    %343 = vector.broadcast %cst_293 : f32 to vector<2x64xf32>
    %344 = arith.addf %343, %342 : vector<2x64xf32>
    %345 = arith.divf %343, %344 : vector<2x64xf32>
    %346 = arith.mulf %337, %322 : vector<2x64xf32>
    %347 = arith.mulf %331, %339 : vector<2x64xf32>
    %348 = arith.addf %346, %347 : vector<2x64xf32>
    %349 = math.tanh %348 : vector<2x64xf32>
    %350 = arith.mulf %345, %349 : vector<2x64xf32>
    %351 = vector.extract_strided_slice %350 {offsets = [0, 0], sizes = [2, 32], strides = [1, 1]} : vector<2x64xf32> to vector<2x32xf32>
    %c0_294 = arith.constant 0 : index
    %c0_295 = arith.constant 0 : index
    %352 = vector.load %arg4[%c0_294, %c0_295] : memref<32x32xf32, #tpu.memory_space<vmem>>, vector<2x32xf32>
    tpu.vector_store %arg4[%c0_294, %c0_295], %351 {strides = array<i32>} : memref<32x32xf32, #tpu.memory_space<vmem>>, vector<2x32xf32>,
    %353 = vector.extract_strided_slice %350 {offsets = [0, 32], sizes = [2, 32], strides = [1, 1]} : vector<2x64xf32> to vector<2x32xf32>
    %c30_296 = arith.constant 30 : index
    %c0_297 = arith.constant 0 : index
    %354 = vector.load %arg5[%c30_296, %c0_297] : memref<32x32xf32, #tpu.memory_space<vmem>>, vector<2x32xf32>
    tpu.vector_store %arg5[%c30_296, %c0_297], %353 {strides = array<i32>} : memref<32x32xf32, #tpu.memory_space<vmem>>, vector<2x32xf32>,
    %c2_298 = arith.constant 2 : index
    %c0_299 = arith.constant 0 : index
    %355 = vector.load %arg3[%c2_298, %c0_299] : memref<32x256xf32, #tpu.memory_space<vmem>>, vector<2x256xf32>
    %cst_300 = arith.constant dense<0.000000e+00> : vector<2x256xf32>
    %356 = tpu.matmul %350, %320, %cst_300 {dimension_numbers = #tpu.dot_dimension_numbers<[1], [0], [0], [1], [0, 0, 1, 1], [], []>} : vector<2x64xf32>, vector<64x256xf32>, vector<2x256xf32> -> vector<2x256xf32>
    %357 = arith.addf %355, %356 : vector<2x256xf32>
    %358 = vector.extract_strided_slice %357 {offsets = [0, 0], sizes = [2, 64], strides = [1, 1]} : vector<2x256xf32> to vector<2x64xf32>
    %359 = arith.negf %358 : vector<2x64xf32>
    %360 = math.exp %359 : vector<2x64xf32>
    %cst_301 = arith.constant 1.000000e+00 : f32
    %361 = vector.broadcast %cst_301 : f32 to vector<2x64xf32>
    %362 = arith.addf %361, %360 : vector<2x64xf32>
    %363 = arith.divf %361, %362 : vector<2x64xf32>
    %364 = vector.extract_strided_slice %357 {offsets = [0, 64], sizes = [2, 64], strides = [1, 1]} : vector<2x256xf32> to vector<2x64xf32>
    %365 = arith.negf %364 : vector<2x64xf32>
    %366 = math.exp %365 : vector<2x64xf32>
    %cst_302 = arith.constant 1.000000e+00 : f32
    %367 = vector.broadcast %cst_302 : f32 to vector<2x64xf32>
    %368 = arith.addf %367, %366 : vector<2x64xf32>
    %369 = arith.divf %367, %368 : vector<2x64xf32>
    %370 = vector.extract_strided_slice %357 {offsets = [0, 128], sizes = [2, 64], strides = [1, 1]} : vector<2x256xf32> to vector<2x64xf32>
    %371 = math.tanh %370 : vector<2x64xf32>
    %372 = vector.extract_strided_slice %357 {offsets = [0, 192], sizes = [2, 64], strides = [1, 1]} : vector<2x256xf32> to vector<2x64xf32>
    %373 = arith.negf %372 : vector<2x64xf32>
    %374 = math.exp %373 : vector<2x64xf32>
    %cst_303 = arith.constant 1.000000e+00 : f32
    %375 = vector.broadcast %cst_303 : f32 to vector<2x64xf32>
    %376 = arith.addf %375, %374 : vector<2x64xf32>
    %377 = arith.divf %375, %376 : vector<2x64xf32>
    %378 = arith.mulf %369, %348 : vector<2x64xf32>
    %379 = arith.mulf %363, %371 : vector<2x64xf32>
    %380 = arith.addf %378, %379 : vector<2x64xf32>
    %381 = math.tanh %380 : vector<2x64xf32>
    %382 = arith.mulf %377, %381 : vector<2x64xf32>
    %383 = vector.extract_strided_slice %382 {offsets = [0, 0], sizes = [2, 32], strides = [1, 1]} : vector<2x64xf32> to vector<2x32xf32>
    %c2_304 = arith.constant 2 : index
    %c0_305 = arith.constant 0 : index
    %384 = vector.load %arg4[%c2_304, %c0_305] : memref<32x32xf32, #tpu.memory_space<vmem>>, vector<2x32xf32>
    tpu.vector_store %arg4[%c2_304, %c0_305], %383 {strides = array<i32>} : memref<32x32xf32, #tpu.memory_space<vmem>>, vector<2x32xf32>,
    %385 = vector.extract_strided_slice %382 {offsets = [0, 32], sizes = [2, 32], strides = [1, 1]} : vector<2x64xf32> to vector<2x32xf32>
    %c28_306 = arith.constant 28 : index
    %c0_307 = arith.constant 0 : index
    %386 = vector.load %arg5[%c28_306, %c0_307] : memref<32x32xf32, #tpu.memory_space<vmem>>, vector<2x32xf32>
    tpu.vector_store %arg5[%c28_306, %c0_307], %385 {strides = array<i32>} : memref<32x32xf32, #tpu.memory_space<vmem>>, vector<2x32xf32>,
    %c4_308 = arith.constant 4 : index
    %c0_309 = arith.constant 0 : index
    %387 = vector.load %arg3[%c4_308, %c0_309] : memref<32x256xf32, #tpu.memory_space<vmem>>, vector<2x256xf32>
    %cst_310 = arith.constant dense<0.000000e+00> : vector<2x256xf32>
    %388 = tpu.matmul %382, %320, %cst_310 {dimension_numbers = #tpu.dot_dimension_numbers<[1], [0], [0], [1], [0, 0, 1, 1], [], []>} : vector<2x64xf32>, vector<64x256xf32>, vector<2x256xf32> -> vector<2x256xf32>
    %389 = arith.addf %387, %388 : vector<2x256xf32>
    %390 = vector.extract_strided_slice %389 {offsets = [0, 0], sizes = [2, 64], strides = [1, 1]} : vector<2x256xf32> to vector<2x64xf32>
    %391 = arith.negf %390 : vector<2x64xf32>
    %392 = math.exp %391 : vector<2x64xf32>
    %cst_311 = arith.constant 1.000000e+00 : f32
    %393 = vector.broadcast %cst_311 : f32 to vector<2x64xf32>
    %394 = arith.addf %393, %392 : vector<2x64xf32>
    %395 = arith.divf %393, %394 : vector<2x64xf32>
    %396 = vector.extract_strided_slice %389 {offsets = [0, 64], sizes = [2, 64], strides = [1, 1]} : vector<2x256xf32> to vector<2x64xf32>
    %397 = arith.negf %396 : vector<2x64xf32>
    %398 = math.exp %397 : vector<2x64xf32>
    %cst_312 = arith.constant 1.000000e+00 : f32
    %399 = vector.broadcast %cst_312 : f32 to vector<2x64xf32>
    %400 = arith.addf %399, %398 : vector<2x64xf32>
    %401 = arith.divf %399, %400 : vector<2x64xf32>
    %402 = vector.extract_strided_slice %389 {offsets = [0, 128], sizes = [2, 64], strides = [1, 1]} : vector<2x256xf32> to vector<2x64xf32>
    %403 = math.tanh %402 : vector<2x64xf32>
    %404 = vector.extract_strided_slice %389 {offsets = [0, 192], sizes = [2, 64], strides = [1, 1]} : vector<2x256xf32> to vector<2x64xf32>
    %405 = arith.negf %404 : vector<2x64xf32>
    %406 = math.exp %405 : vector<2x64xf32>
    %cst_313 = arith.constant 1.000000e+00 : f32
    %407 = vector.broadcast %cst_313 : f32 to vector<2x64xf32>
    %408 = arith.addf %407, %406 : vector<2x64xf32>
    %409 = arith.divf %407, %408 : vector<2x64xf32>
    %410 = arith.mulf %401, %380 : vector<2x64xf32>
    %411 = arith.mulf %395, %403 : vector<2x64xf32>
    %412 = arith.addf %410, %411 : vector<2x64xf32>
    %413 = math.tanh %412 : vector<2x64xf32>
    %414 = arith.mulf %409, %413 : vector<2x64xf32>
    %415 = vector.extract_strided_slice %414 {offsets = [0, 0], sizes = [2, 32], strides = [1, 1]} : vector<2x64xf32> to vector<2x32xf32>
    %c4_314 = arith.constant 4 : index
    %c0_315 = arith.constant 0 : index
    %416 = vector.load %arg4[%c4_314, %c0_315] : memref<32x32xf32, #tpu.memory_space<vmem>>, vector<2x32xf32>
    tpu.vector_store %arg4[%c4_314, %c0_315], %415 {strides = array<i32>} : memref<32x32xf32, #tpu.memory_space<vmem>>, vector<2x32xf32>,
    %417 = vector.extract_strided_slice %414 {offsets = [0, 32], sizes = [2, 32], strides = [1, 1]} : vector<2x64xf32> to vector<2x32xf32>
    %c26_316 = arith.constant 26 : index
    %c0_317 = arith.constant 0 : index
    %418 = vector.load %arg5[%c26_316, %c0_317] : memref<32x32xf32, #tpu.memory_space<vmem>>, vector<2x32xf32>
    tpu.vector_store %arg5[%c26_316, %c0_317], %417 {strides = array<i32>} : memref<32x32xf32, #tpu.memory_space<vmem>>, vector<2x32xf32>,
    %c6_318 = arith.constant 6 : index
    %c0_319 = arith.constant 0 : index
    %419 = vector.load %arg3[%c6_318, %c0_319] : memref<32x256xf32, #tpu.memory_space<vmem>>, vector<2x256xf32>
    %cst_320 = arith.constant dense<0.000000e+00> : vector<2x256xf32>
    %420 = tpu.matmul %414, %320, %cst_320 {dimension_numbers = #tpu.dot_dimension_numbers<[1], [0], [0], [1], [0, 0, 1, 1], [], []>} : vector<2x64xf32>, vector<64x256xf32>, vector<2x256xf32> -> vector<2x256xf32>
    %421 = arith.addf %419, %420 : vector<2x256xf32>
    %422 = vector.extract_strided_slice %421 {offsets = [0, 0], sizes = [2, 64], strides = [1, 1]} : vector<2x256xf32> to vector<2x64xf32>
    %423 = arith.negf %422 : vector<2x64xf32>
    %424 = math.exp %423 : vector<2x64xf32>
    %cst_321 = arith.constant 1.000000e+00 : f32
    %425 = vector.broadcast %cst_321 : f32 to vector<2x64xf32>
    %426 = arith.addf %425, %424 : vector<2x64xf32>
    %427 = arith.divf %425, %426 : vector<2x64xf32>
    %428 = vector.extract_strided_slice %421 {offsets = [0, 64], sizes = [2, 64], strides = [1, 1]} : vector<2x256xf32> to vector<2x64xf32>
    %429 = arith.negf %428 : vector<2x64xf32>
    %430 = math.exp %429 : vector<2x64xf32>
    %cst_322 = arith.constant 1.000000e+00 : f32
    %431 = vector.broadcast %cst_322 : f32 to vector<2x64xf32>
    %432 = arith.addf %431, %430 : vector<2x64xf32>
    %433 = arith.divf %431, %432 : vector<2x64xf32>
    %434 = vector.extract_strided_slice %421 {offsets = [0, 128], sizes = [2, 64], strides = [1, 1]} : vector<2x256xf32> to vector<2x64xf32>
    %435 = math.tanh %434 : vector<2x64xf32>
    %436 = vector.extract_strided_slice %421 {offsets = [0, 192], sizes = [2, 64], strides = [1, 1]} : vector<2x256xf32> to vector<2x64xf32>
    %437 = arith.negf %436 : vector<2x64xf32>
    %438 = math.exp %437 : vector<2x64xf32>
    %cst_323 = arith.constant 1.000000e+00 : f32
    %439 = vector.broadcast %cst_323 : f32 to vector<2x64xf32>
    %440 = arith.addf %439, %438 : vector<2x64xf32>
    %441 = arith.divf %439, %440 : vector<2x64xf32>
    %442 = arith.mulf %433, %412 : vector<2x64xf32>
    %443 = arith.mulf %427, %435 : vector<2x64xf32>
    %444 = arith.addf %442, %443 : vector<2x64xf32>
    %445 = math.tanh %444 : vector<2x64xf32>
    %446 = arith.mulf %441, %445 : vector<2x64xf32>
    %447 = vector.extract_strided_slice %446 {offsets = [0, 0], sizes = [2, 32], strides = [1, 1]} : vector<2x64xf32> to vector<2x32xf32>
    %c6_324 = arith.constant 6 : index
    %c0_325 = arith.constant 0 : index
    %448 = vector.load %arg4[%c6_324, %c0_325] : memref<32x32xf32, #tpu.memory_space<vmem>>, vector<2x32xf32>
    tpu.vector_store %arg4[%c6_324, %c0_325], %447 {strides = array<i32>} : memref<32x32xf32, #tpu.memory_space<vmem>>, vector<2x32xf32>,
    %449 = vector.extract_strided_slice %446 {offsets = [0, 32], sizes = [2, 32], strides = [1, 1]} : vector<2x64xf32> to vector<2x32xf32>
    %c24_326 = arith.constant 24 : index
    %c0_327 = arith.constant 0 : index
    %450 = vector.load %arg5[%c24_326, %c0_327] : memref<32x32xf32, #tpu.memory_space<vmem>>, vector<2x32xf32>
    tpu.vector_store %arg5[%c24_326, %c0_327], %449 {strides = array<i32>} : memref<32x32xf32, #tpu.memory_space<vmem>>, vector<2x32xf32>,
    %c8_328 = arith.constant 8 : index
    %c0_329 = arith.constant 0 : index
    %451 = vector.load %arg3[%c8_328, %c0_329] : memref<32x256xf32, #tpu.memory_space<vmem>>, vector<2x256xf32>
    %cst_330 = arith.constant dense<0.000000e+00> : vector<2x256xf32>
    %452 = tpu.matmul %446, %320, %cst_330 {dimension_numbers = #tpu.dot_dimension_numbers<[1], [0], [0], [1], [0, 0, 1, 1], [], []>} : vector<2x64xf32>, vector<64x256xf32>, vector<2x256xf32> -> vector<2x256xf32>
    %453 = arith.addf %451, %452 : vector<2x256xf32>
    %454 = vector.extract_strided_slice %453 {offsets = [0, 0], sizes = [2, 64], strides = [1, 1]} : vector<2x256xf32> to vector<2x64xf32>
    %455 = arith.negf %454 : vector<2x64xf32>
    %456 = math.exp %455 : vector<2x64xf32>
    %cst_331 = arith.constant 1.000000e+00 : f32
    %457 = vector.broadcast %cst_331 : f32 to vector<2x64xf32>
    %458 = arith.addf %457, %456 : vector<2x64xf32>
    %459 = arith.divf %457, %458 : vector<2x64xf32>
    %460 = vector.extract_strided_slice %453 {offsets = [0, 64], sizes = [2, 64], strides = [1, 1]} : vector<2x256xf32> to vector<2x64xf32>
    %461 = arith.negf %460 : vector<2x64xf32>
    %462 = math.exp %461 : vector<2x64xf32>
    %cst_332 = arith.constant 1.000000e+00 : f32
    %463 = vector.broadcast %cst_332 : f32 to vector<2x64xf32>
    %464 = arith.addf %463, %462 : vector<2x64xf32>
    %465 = arith.divf %463, %464 : vector<2x64xf32>
    %466 = vector.extract_strided_slice %453 {offsets = [0, 128], sizes = [2, 64], strides = [1, 1]} : vector<2x256xf32> to vector<2x64xf32>
    %467 = math.tanh %466 : vector<2x64xf32>
    %468 = vector.extract_strided_slice %453 {offsets = [0, 192], sizes = [2, 64], strides = [1, 1]} : vector<2x256xf32> to vector<2x64xf32>
    %469 = arith.negf %468 : vector<2x64xf32>
    %470 = math.exp %469 : vector<2x64xf32>
    %cst_333 = arith.constant 1.000000e+00 : f32
    %471 = vector.broadcast %cst_333 : f32 to vector<2x64xf32>
    %472 = arith.addf %471, %470 : vector<2x64xf32>
    %473 = arith.divf %471, %472 : vector<2x64xf32>
    %474 = arith.mulf %465, %444 : vector<2x64xf32>
    %475 = arith.mulf %459, %467 : vector<2x64xf32>
    %476 = arith.addf %474, %475 : vector<2x64xf32>
    %477 = math.tanh %476 : vector<2x64xf32>
    %478 = arith.mulf %473, %477 : vector<2x64xf32>
    %479 = vector.extract_strided_slice %478 {offsets = [0, 0], sizes = [2, 32], strides = [1, 1]} : vector<2x64xf32> to vector<2x32xf32>
    %c8_334 = arith.constant 8 : index
    %c0_335 = arith.constant 0 : index
    %480 = vector.load %arg4[%c8_334, %c0_335] : memref<32x32xf32, #tpu.memory_space<vmem>>, vector<2x32xf32>
    tpu.vector_store %arg4[%c8_334, %c0_335], %479 {strides = array<i32>} : memref<32x32xf32, #tpu.memory_space<vmem>>, vector<2x32xf32>,
    %481 = vector.extract_strided_slice %478 {offsets = [0, 32], sizes = [2, 32], strides = [1, 1]} : vector<2x64xf32> to vector<2x32xf32>
    %c22_336 = arith.constant 22 : index
    %c0_337 = arith.constant 0 : index
    %482 = vector.load %arg5[%c22_336, %c0_337] : memref<32x32xf32, #tpu.memory_space<vmem>>, vector<2x32xf32>
    tpu.vector_store %arg5[%c22_336, %c0_337], %481 {strides = array<i32>} : memref<32x32xf32, #tpu.memory_space<vmem>>, vector<2x32xf32>,
    %c10_338 = arith.constant 10 : index
    %c0_339 = arith.constant 0 : index
    %483 = vector.load %arg3[%c10_338, %c0_339] : memref<32x256xf32, #tpu.memory_space<vmem>>, vector<2x256xf32>
    %cst_340 = arith.constant dense<0.000000e+00> : vector<2x256xf32>
    %484 = tpu.matmul %478, %320, %cst_340 {dimension_numbers = #tpu.dot_dimension_numbers<[1], [0], [0], [1], [0, 0, 1, 1], [], []>} : vector<2x64xf32>, vector<64x256xf32>, vector<2x256xf32> -> vector<2x256xf32>
    %485 = arith.addf %483, %484 : vector<2x256xf32>
    %486 = vector.extract_strided_slice %485 {offsets = [0, 0], sizes = [2, 64], strides = [1, 1]} : vector<2x256xf32> to vector<2x64xf32>
    %487 = arith.negf %486 : vector<2x64xf32>
    %488 = math.exp %487 : vector<2x64xf32>
    %cst_341 = arith.constant 1.000000e+00 : f32
    %489 = vector.broadcast %cst_341 : f32 to vector<2x64xf32>
    %490 = arith.addf %489, %488 : vector<2x64xf32>
    %491 = arith.divf %489, %490 : vector<2x64xf32>
    %492 = vector.extract_strided_slice %485 {offsets = [0, 64], sizes = [2, 64], strides = [1, 1]} : vector<2x256xf32> to vector<2x64xf32>
    %493 = arith.negf %492 : vector<2x64xf32>
    %494 = math.exp %493 : vector<2x64xf32>
    %cst_342 = arith.constant 1.000000e+00 : f32
    %495 = vector.broadcast %cst_342 : f32 to vector<2x64xf32>
    %496 = arith.addf %495, %494 : vector<2x64xf32>
    %497 = arith.divf %495, %496 : vector<2x64xf32>
    %498 = vector.extract_strided_slice %485 {offsets = [0, 128], sizes = [2, 64], strides = [1, 1]} : vector<2x256xf32> to vector<2x64xf32>
    %499 = math.tanh %498 : vector<2x64xf32>
    %500 = vector.extract_strided_slice %485 {offsets = [0, 192], sizes = [2, 64], strides = [1, 1]} : vector<2x256xf32> to vector<2x64xf32>
    %501 = arith.negf %500 : vector<2x64xf32>
    %502 = math.exp %501 : vector<2x64xf32>
    %cst_343 = arith.constant 1.000000e+00 : f32
    %503 = vector.broadcast %cst_343 : f32 to vector<2x64xf32>
    %504 = arith.addf %503, %502 : vector<2x64xf32>
    %505 = arith.divf %503, %504 : vector<2x64xf32>
    %506 = arith.mulf %497, %476 : vector<2x64xf32>
    %507 = arith.mulf %491, %499 : vector<2x64xf32>
    %508 = arith.addf %506, %507 : vector<2x64xf32>
    %509 = math.tanh %508 : vector<2x64xf32>
    %510 = arith.mulf %505, %509 : vector<2x64xf32>
    %511 = vector.extract_strided_slice %510 {offsets = [0, 0], sizes = [2, 32], strides = [1, 1]} : vector<2x64xf32> to vector<2x32xf32>
    %c10_344 = arith.constant 10 : index
    %c0_345 = arith.constant 0 : index
    %512 = vector.load %arg4[%c10_344, %c0_345] : memref<32x32xf32, #tpu.memory_space<vmem>>, vector<2x32xf32>
    tpu.vector_store %arg4[%c10_344, %c0_345], %511 {strides = array<i32>} : memref<32x32xf32, #tpu.memory_space<vmem>>, vector<2x32xf32>,
    %513 = vector.extract_strided_slice %510 {offsets = [0, 32], sizes = [2, 32], strides = [1, 1]} : vector<2x64xf32> to vector<2x32xf32>
    %c20_346 = arith.constant 20 : index
    %c0_347 = arith.constant 0 : index
    %514 = vector.load %arg5[%c20_346, %c0_347] : memref<32x32xf32, #tpu.memory_space<vmem>>, vector<2x32xf32>
    tpu.vector_store %arg5[%c20_346, %c0_347], %513 {strides = array<i32>} : memref<32x32xf32, #tpu.memory_space<vmem>>, vector<2x32xf32>,
    %c12_348 = arith.constant 12 : index
    %c0_349 = arith.constant 0 : index
    %515 = vector.load %arg3[%c12_348, %c0_349] : memref<32x256xf32, #tpu.memory_space<vmem>>, vector<2x256xf32>
    %cst_350 = arith.constant dense<0.000000e+00> : vector<2x256xf32>
    %516 = tpu.matmul %510, %320, %cst_350 {dimension_numbers = #tpu.dot_dimension_numbers<[1], [0], [0], [1], [0, 0, 1, 1], [], []>} : vector<2x64xf32>, vector<64x256xf32>, vector<2x256xf32> -> vector<2x256xf32>
    %517 = arith.addf %515, %516 : vector<2x256xf32>
    %518 = vector.extract_strided_slice %517 {offsets = [0, 0], sizes = [2, 64], strides = [1, 1]} : vector<2x256xf32> to vector<2x64xf32>
    %519 = arith.negf %518 : vector<2x64xf32>
    %520 = math.exp %519 : vector<2x64xf32>
    %cst_351 = arith.constant 1.000000e+00 : f32
    %521 = vector.broadcast %cst_351 : f32 to vector<2x64xf32>
    %522 = arith.addf %521, %520 : vector<2x64xf32>
    %523 = arith.divf %521, %522 : vector<2x64xf32>
    %524 = vector.extract_strided_slice %517 {offsets = [0, 64], sizes = [2, 64], strides = [1, 1]} : vector<2x256xf32> to vector<2x64xf32>
    %525 = arith.negf %524 : vector<2x64xf32>
    %526 = math.exp %525 : vector<2x64xf32>
    %cst_352 = arith.constant 1.000000e+00 : f32
    %527 = vector.broadcast %cst_352 : f32 to vector<2x64xf32>
    %528 = arith.addf %527, %526 : vector<2x64xf32>
    %529 = arith.divf %527, %528 : vector<2x64xf32>
    %530 = vector.extract_strided_slice %517 {offsets = [0, 128], sizes = [2, 64], strides = [1, 1]} : vector<2x256xf32> to vector<2x64xf32>
    %531 = math.tanh %530 : vector<2x64xf32>
    %532 = vector.extract_strided_slice %517 {offsets = [0, 192], sizes = [2, 64], strides = [1, 1]} : vector<2x256xf32> to vector<2x64xf32>
    %533 = arith.negf %532 : vector<2x64xf32>
    %534 = math.exp %533 : vector<2x64xf32>
    %cst_353 = arith.constant 1.000000e+00 : f32
    %535 = vector.broadcast %cst_353 : f32 to vector<2x64xf32>
    %536 = arith.addf %535, %534 : vector<2x64xf32>
    %537 = arith.divf %535, %536 : vector<2x64xf32>
    %538 = arith.mulf %529, %508 : vector<2x64xf32>
    %539 = arith.mulf %523, %531 : vector<2x64xf32>
    %540 = arith.addf %538, %539 : vector<2x64xf32>
    %541 = math.tanh %540 : vector<2x64xf32>
    %542 = arith.mulf %537, %541 : vector<2x64xf32>
    %543 = vector.extract_strided_slice %542 {offsets = [0, 0], sizes = [2, 32], strides = [1, 1]} : vector<2x64xf32> to vector<2x32xf32>
    %c12_354 = arith.constant 12 : index
    %c0_355 = arith.constant 0 : index
    %544 = vector.load %arg4[%c12_354, %c0_355] : memref<32x32xf32, #tpu.memory_space<vmem>>, vector<2x32xf32>
    tpu.vector_store %arg4[%c12_354, %c0_355], %543 {strides = array<i32>} : memref<32x32xf32, #tpu.memory_space<vmem>>, vector<2x32xf32>,
    %545 = vector.extract_strided_slice %542 {offsets = [0, 32], sizes = [2, 32], strides = [1, 1]} : vector<2x64xf32> to vector<2x32xf32>
    %c18_356 = arith.constant 18 : index
    %c0_357 = arith.constant 0 : index
    %546 = vector.load %arg5[%c18_356, %c0_357] : memref<32x32xf32, #tpu.memory_space<vmem>>, vector<2x32xf32>
    tpu.vector_store %arg5[%c18_356, %c0_357], %545 {strides = array<i32>} : memref<32x32xf32, #tpu.memory_space<vmem>>, vector<2x32xf32>,
    %c14_358 = arith.constant 14 : index
    %c0_359 = arith.constant 0 : index
    %547 = vector.load %arg3[%c14_358, %c0_359] : memref<32x256xf32, #tpu.memory_space<vmem>>, vector<2x256xf32>
    %cst_360 = arith.constant dense<0.000000e+00> : vector<2x256xf32>
    %548 = tpu.matmul %542, %320, %cst_360 {dimension_numbers = #tpu.dot_dimension_numbers<[1], [0], [0], [1], [0, 0, 1, 1], [], []>} : vector<2x64xf32>, vector<64x256xf32>, vector<2x256xf32> -> vector<2x256xf32>
    %549 = arith.addf %547, %548 : vector<2x256xf32>
    %550 = vector.extract_strided_slice %549 {offsets = [0, 0], sizes = [2, 64], strides = [1, 1]} : vector<2x256xf32> to vector<2x64xf32>
    %551 = arith.negf %550 : vector<2x64xf32>
    %552 = math.exp %551 : vector<2x64xf32>
    %cst_361 = arith.constant 1.000000e+00 : f32
    %553 = vector.broadcast %cst_361 : f32 to vector<2x64xf32>
    %554 = arith.addf %553, %552 : vector<2x64xf32>
    %555 = arith.divf %553, %554 : vector<2x64xf32>
    %556 = vector.extract_strided_slice %549 {offsets = [0, 64], sizes = [2, 64], strides = [1, 1]} : vector<2x256xf32> to vector<2x64xf32>
    %557 = arith.negf %556 : vector<2x64xf32>
    %558 = math.exp %557 : vector<2x64xf32>
    %cst_362 = arith.constant 1.000000e+00 : f32
    %559 = vector.broadcast %cst_362 : f32 to vector<2x64xf32>
    %560 = arith.addf %559, %558 : vector<2x64xf32>
    %561 = arith.divf %559, %560 : vector<2x64xf32>
    %562 = vector.extract_strided_slice %549 {offsets = [0, 128], sizes = [2, 64], strides = [1, 1]} : vector<2x256xf32> to vector<2x64xf32>
    %563 = math.tanh %562 : vector<2x64xf32>
    %564 = vector.extract_strided_slice %549 {offsets = [0, 192], sizes = [2, 64], strides = [1, 1]} : vector<2x256xf32> to vector<2x64xf32>
    %565 = arith.negf %564 : vector<2x64xf32>
    %566 = math.exp %565 : vector<2x64xf32>
    %cst_363 = arith.constant 1.000000e+00 : f32
    %567 = vector.broadcast %cst_363 : f32 to vector<2x64xf32>
    %568 = arith.addf %567, %566 : vector<2x64xf32>
    %569 = arith.divf %567, %568 : vector<2x64xf32>
    %570 = arith.mulf %561, %540 : vector<2x64xf32>
    %571 = arith.mulf %555, %563 : vector<2x64xf32>
    %572 = arith.addf %570, %571 : vector<2x64xf32>
    %573 = math.tanh %572 : vector<2x64xf32>
    %574 = arith.mulf %569, %573 : vector<2x64xf32>
    %575 = vector.extract_strided_slice %574 {offsets = [0, 0], sizes = [2, 32], strides = [1, 1]} : vector<2x64xf32> to vector<2x32xf32>
    %c14_364 = arith.constant 14 : index
    %c0_365 = arith.constant 0 : index
    %576 = vector.load %arg4[%c14_364, %c0_365] : memref<32x32xf32, #tpu.memory_space<vmem>>, vector<2x32xf32>
    tpu.vector_store %arg4[%c14_364, %c0_365], %575 {strides = array<i32>} : memref<32x32xf32, #tpu.memory_space<vmem>>, vector<2x32xf32>,
    %577 = vector.extract_strided_slice %574 {offsets = [0, 32], sizes = [2, 32], strides = [1, 1]} : vector<2x64xf32> to vector<2x32xf32>
    %c16_366 = arith.constant 16 : index
    %c0_367 = arith.constant 0 : index
    %578 = vector.load %arg5[%c16_366, %c0_367] : memref<32x32xf32, #tpu.memory_space<vmem>>, vector<2x32xf32>
    tpu.vector_store %arg5[%c16_366, %c0_367], %577 {strides = array<i32>} : memref<32x32xf32, #tpu.memory_space<vmem>>, vector<2x32xf32>,
    %c16_368 = arith.constant 16 : index
    %c0_369 = arith.constant 0 : index
    %579 = vector.load %arg3[%c16_368, %c0_369] : memref<32x256xf32, #tpu.memory_space<vmem>>, vector<2x256xf32>
    %cst_370 = arith.constant dense<0.000000e+00> : vector<2x256xf32>
    %580 = tpu.matmul %574, %320, %cst_370 {dimension_numbers = #tpu.dot_dimension_numbers<[1], [0], [0], [1], [0, 0, 1, 1], [], []>} : vector<2x64xf32>, vector<64x256xf32>, vector<2x256xf32> -> vector<2x256xf32>
    %581 = arith.addf %579, %580 : vector<2x256xf32>
    %582 = vector.extract_strided_slice %581 {offsets = [0, 0], sizes = [2, 64], strides = [1, 1]} : vector<2x256xf32> to vector<2x64xf32>
    %583 = arith.negf %582 : vector<2x64xf32>
    %584 = math.exp %583 : vector<2x64xf32>
    %cst_371 = arith.constant 1.000000e+00 : f32
    %585 = vector.broadcast %cst_371 : f32 to vector<2x64xf32>
    %586 = arith.addf %585, %584 : vector<2x64xf32>
    %587 = arith.divf %585, %586 : vector<2x64xf32>
    %588 = vector.extract_strided_slice %581 {offsets = [0, 64], sizes = [2, 64], strides = [1, 1]} : vector<2x256xf32> to vector<2x64xf32>
    %589 = arith.negf %588 : vector<2x64xf32>
    %590 = math.exp %589 : vector<2x64xf32>
    %cst_372 = arith.constant 1.000000e+00 : f32
    %591 = vector.broadcast %cst_372 : f32 to vector<2x64xf32>
    %592 = arith.addf %591, %590 : vector<2x64xf32>
    %593 = arith.divf %591, %592 : vector<2x64xf32>
    %594 = vector.extract_strided_slice %581 {offsets = [0, 128], sizes = [2, 64], strides = [1, 1]} : vector<2x256xf32> to vector<2x64xf32>
    %595 = math.tanh %594 : vector<2x64xf32>
    %596 = vector.extract_strided_slice %581 {offsets = [0, 192], sizes = [2, 64], strides = [1, 1]} : vector<2x256xf32> to vector<2x64xf32>
    %597 = arith.negf %596 : vector<2x64xf32>
    %598 = math.exp %597 : vector<2x64xf32>
    %cst_373 = arith.constant 1.000000e+00 : f32
    %599 = vector.broadcast %cst_373 : f32 to vector<2x64xf32>
    %600 = arith.addf %599, %598 : vector<2x64xf32>
    %601 = arith.divf %599, %600 : vector<2x64xf32>
    %602 = arith.mulf %593, %572 : vector<2x64xf32>
    %603 = arith.mulf %587, %595 : vector<2x64xf32>
    %604 = arith.addf %602, %603 : vector<2x64xf32>
    %605 = math.tanh %604 : vector<2x64xf32>
    %606 = arith.mulf %601, %605 : vector<2x64xf32>
    %607 = vector.extract_strided_slice %606 {offsets = [0, 0], sizes = [2, 32], strides = [1, 1]} : vector<2x64xf32> to vector<2x32xf32>
    %c16_374 = arith.constant 16 : index
    %c0_375 = arith.constant 0 : index
    %608 = vector.load %arg4[%c16_374, %c0_375] : memref<32x32xf32, #tpu.memory_space<vmem>>, vector<2x32xf32>
    tpu.vector_store %arg4[%c16_374, %c0_375], %607 {strides = array<i32>} : memref<32x32xf32, #tpu.memory_space<vmem>>, vector<2x32xf32>,
    %609 = vector.extract_strided_slice %606 {offsets = [0, 32], sizes = [2, 32], strides = [1, 1]} : vector<2x64xf32> to vector<2x32xf32>
    %c14_376 = arith.constant 14 : index
    %c0_377 = arith.constant 0 : index
    %610 = vector.load %arg5[%c14_376, %c0_377] : memref<32x32xf32, #tpu.memory_space<vmem>>, vector<2x32xf32>
    tpu.vector_store %arg5[%c14_376, %c0_377], %609 {strides = array<i32>} : memref<32x32xf32, #tpu.memory_space<vmem>>, vector<2x32xf32>,
    %c18_378 = arith.constant 18 : index
    %c0_379 = arith.constant 0 : index
    %611 = vector.load %arg3[%c18_378, %c0_379] : memref<32x256xf32, #tpu.memory_space<vmem>>, vector<2x256xf32>
    %cst_380 = arith.constant dense<0.000000e+00> : vector<2x256xf32>
    %612 = tpu.matmul %606, %320, %cst_380 {dimension_numbers = #tpu.dot_dimension_numbers<[1], [0], [0], [1], [0, 0, 1, 1], [], []>} : vector<2x64xf32>, vector<64x256xf32>, vector<2x256xf32> -> vector<2x256xf32>
    %613 = arith.addf %611, %612 : vector<2x256xf32>
    %614 = vector.extract_strided_slice %613 {offsets = [0, 0], sizes = [2, 64], strides = [1, 1]} : vector<2x256xf32> to vector<2x64xf32>
    %615 = arith.negf %614 : vector<2x64xf32>
    %616 = math.exp %615 : vector<2x64xf32>
    %cst_381 = arith.constant 1.000000e+00 : f32
    %617 = vector.broadcast %cst_381 : f32 to vector<2x64xf32>
    %618 = arith.addf %617, %616 : vector<2x64xf32>
    %619 = arith.divf %617, %618 : vector<2x64xf32>
    %620 = vector.extract_strided_slice %613 {offsets = [0, 64], sizes = [2, 64], strides = [1, 1]} : vector<2x256xf32> to vector<2x64xf32>
    %621 = arith.negf %620 : vector<2x64xf32>
    %622 = math.exp %621 : vector<2x64xf32>
    %cst_382 = arith.constant 1.000000e+00 : f32
    %623 = vector.broadcast %cst_382 : f32 to vector<2x64xf32>
    %624 = arith.addf %623, %622 : vector<2x64xf32>
    %625 = arith.divf %623, %624 : vector<2x64xf32>
    %626 = vector.extract_strided_slice %613 {offsets = [0, 128], sizes = [2, 64], strides = [1, 1]} : vector<2x256xf32> to vector<2x64xf32>
    %627 = math.tanh %626 : vector<2x64xf32>
    %628 = vector.extract_strided_slice %613 {offsets = [0, 192], sizes = [2, 64], strides = [1, 1]} : vector<2x256xf32> to vector<2x64xf32>
    %629 = arith.negf %628 : vector<2x64xf32>
    %630 = math.exp %629 : vector<2x64xf32>
    %cst_383 = arith.constant 1.000000e+00 : f32
    %631 = vector.broadcast %cst_383 : f32 to vector<2x64xf32>
    %632 = arith.addf %631, %630 : vector<2x64xf32>
    %633 = arith.divf %631, %632 : vector<2x64xf32>
    %634 = arith.mulf %625, %604 : vector<2x64xf32>
    %635 = arith.mulf %619, %627 : vector<2x64xf32>
    %636 = arith.addf %634, %635 : vector<2x64xf32>
    %637 = math.tanh %636 : vector<2x64xf32>
    %638 = arith.mulf %633, %637 : vector<2x64xf32>
    %639 = vector.extract_strided_slice %638 {offsets = [0, 0], sizes = [2, 32], strides = [1, 1]} : vector<2x64xf32> to vector<2x32xf32>
    %c18_384 = arith.constant 18 : index
    %c0_385 = arith.constant 0 : index
    %640 = vector.load %arg4[%c18_384, %c0_385] : memref<32x32xf32, #tpu.memory_space<vmem>>, vector<2x32xf32>
    tpu.vector_store %arg4[%c18_384, %c0_385], %639 {strides = array<i32>} : memref<32x32xf32, #tpu.memory_space<vmem>>, vector<2x32xf32>,
    %641 = vector.extract_strided_slice %638 {offsets = [0, 32], sizes = [2, 32], strides = [1, 1]} : vector<2x64xf32> to vector<2x32xf32>
    %c12_386 = arith.constant 12 : index
    %c0_387 = arith.constant 0 : index
    %642 = vector.load %arg5[%c12_386, %c0_387] : memref<32x32xf32, #tpu.memory_space<vmem>>, vector<2x32xf32>
    tpu.vector_store %arg5[%c12_386, %c0_387], %641 {strides = array<i32>} : memref<32x32xf32, #tpu.memory_space<vmem>>, vector<2x32xf32>,
    %c20_388 = arith.constant 20 : index
    %c0_389 = arith.constant 0 : index
    %643 = vector.load %arg3[%c20_388, %c0_389] : memref<32x256xf32, #tpu.memory_space<vmem>>, vector<2x256xf32>
    %cst_390 = arith.constant dense<0.000000e+00> : vector<2x256xf32>
    %644 = tpu.matmul %638, %320, %cst_390 {dimension_numbers = #tpu.dot_dimension_numbers<[1], [0], [0], [1], [0, 0, 1, 1], [], []>} : vector<2x64xf32>, vector<64x256xf32>, vector<2x256xf32> -> vector<2x256xf32>
    %645 = arith.addf %643, %644 : vector<2x256xf32>
    %646 = vector.extract_strided_slice %645 {offsets = [0, 0], sizes = [2, 64], strides = [1, 1]} : vector<2x256xf32> to vector<2x64xf32>
    %647 = arith.negf %646 : vector<2x64xf32>
    %648 = math.exp %647 : vector<2x64xf32>
    %cst_391 = arith.constant 1.000000e+00 : f32
    %649 = vector.broadcast %cst_391 : f32 to vector<2x64xf32>
    %650 = arith.addf %649, %648 : vector<2x64xf32>
    %651 = arith.divf %649, %650 : vector<2x64xf32>
    %652 = vector.extract_strided_slice %645 {offsets = [0, 64], sizes = [2, 64], strides = [1, 1]} : vector<2x256xf32> to vector<2x64xf32>
    %653 = arith.negf %652 : vector<2x64xf32>
    %654 = math.exp %653 : vector<2x64xf32>
    %cst_392 = arith.constant 1.000000e+00 : f32
    %655 = vector.broadcast %cst_392 : f32 to vector<2x64xf32>
    %656 = arith.addf %655, %654 : vector<2x64xf32>
    %657 = arith.divf %655, %656 : vector<2x64xf32>
    %658 = vector.extract_strided_slice %645 {offsets = [0, 128], sizes = [2, 64], strides = [1, 1]} : vector<2x256xf32> to vector<2x64xf32>
    %659 = math.tanh %658 : vector<2x64xf32>
    %660 = vector.extract_strided_slice %645 {offsets = [0, 192], sizes = [2, 64], strides = [1, 1]} : vector<2x256xf32> to vector<2x64xf32>
    %661 = arith.negf %660 : vector<2x64xf32>
    %662 = math.exp %661 : vector<2x64xf32>
    %cst_393 = arith.constant 1.000000e+00 : f32
    %663 = vector.broadcast %cst_393 : f32 to vector<2x64xf32>
    %664 = arith.addf %663, %662 : vector<2x64xf32>
    %665 = arith.divf %663, %664 : vector<2x64xf32>
    %666 = arith.mulf %657, %636 : vector<2x64xf32>
    %667 = arith.mulf %651, %659 : vector<2x64xf32>
    %668 = arith.addf %666, %667 : vector<2x64xf32>
    %669 = math.tanh %668 : vector<2x64xf32>
    %670 = arith.mulf %665, %669 : vector<2x64xf32>
    %671 = vector.extract_strided_slice %670 {offsets = [0, 0], sizes = [2, 32], strides = [1, 1]} : vector<2x64xf32> to vector<2x32xf32>
    %c20_394 = arith.constant 20 : index
    %c0_395 = arith.constant 0 : index
    %672 = vector.load %arg4[%c20_394, %c0_395] : memref<32x32xf32, #tpu.memory_space<vmem>>, vector<2x32xf32>
    tpu.vector_store %arg4[%c20_394, %c0_395], %671 {strides = array<i32>} : memref<32x32xf32, #tpu.memory_space<vmem>>, vector<2x32xf32>,
    %673 = vector.extract_strided_slice %670 {offsets = [0, 32], sizes = [2, 32], strides = [1, 1]} : vector<2x64xf32> to vector<2x32xf32>
    %c10_396 = arith.constant 10 : index
    %c0_397 = arith.constant 0 : index
    %674 = vector.load %arg5[%c10_396, %c0_397] : memref<32x32xf32, #tpu.memory_space<vmem>>, vector<2x32xf32>
    tpu.vector_store %arg5[%c10_396, %c0_397], %673 {strides = array<i32>} : memref<32x32xf32, #tpu.memory_space<vmem>>, vector<2x32xf32>,
    %c22_398 = arith.constant 22 : index
    %c0_399 = arith.constant 0 : index
    %675 = vector.load %arg3[%c22_398, %c0_399] : memref<32x256xf32, #tpu.memory_space<vmem>>, vector<2x256xf32>
    %cst_400 = arith.constant dense<0.000000e+00> : vector<2x256xf32>
    %676 = tpu.matmul %670, %320, %cst_400 {dimension_numbers = #tpu.dot_dimension_numbers<[1], [0], [0], [1], [0, 0, 1, 1], [], []>} : vector<2x64xf32>, vector<64x256xf32>, vector<2x256xf32> -> vector<2x256xf32>
    %677 = arith.addf %675, %676 : vector<2x256xf32>
    %678 = vector.extract_strided_slice %677 {offsets = [0, 0], sizes = [2, 64], strides = [1, 1]} : vector<2x256xf32> to vector<2x64xf32>
    %679 = arith.negf %678 : vector<2x64xf32>
    %680 = math.exp %679 : vector<2x64xf32>
    %cst_401 = arith.constant 1.000000e+00 : f32
    %681 = vector.broadcast %cst_401 : f32 to vector<2x64xf32>
    %682 = arith.addf %681, %680 : vector<2x64xf32>
    %683 = arith.divf %681, %682 : vector<2x64xf32>
    %684 = vector.extract_strided_slice %677 {offsets = [0, 64], sizes = [2, 64], strides = [1, 1]} : vector<2x256xf32> to vector<2x64xf32>
    %685 = arith.negf %684 : vector<2x64xf32>
    %686 = math.exp %685 : vector<2x64xf32>
    %cst_402 = arith.constant 1.000000e+00 : f32
    %687 = vector.broadcast %cst_402 : f32 to vector<2x64xf32>
    %688 = arith.addf %687, %686 : vector<2x64xf32>
    %689 = arith.divf %687, %688 : vector<2x64xf32>
    %690 = vector.extract_strided_slice %677 {offsets = [0, 128], sizes = [2, 64], strides = [1, 1]} : vector<2x256xf32> to vector<2x64xf32>
    %691 = math.tanh %690 : vector<2x64xf32>
    %692 = vector.extract_strided_slice %677 {offsets = [0, 192], sizes = [2, 64], strides = [1, 1]} : vector<2x256xf32> to vector<2x64xf32>
    %693 = arith.negf %692 : vector<2x64xf32>
    %694 = math.exp %693 : vector<2x64xf32>
    %cst_403 = arith.constant 1.000000e+00 : f32
    %695 = vector.broadcast %cst_403 : f32 to vector<2x64xf32>
    %696 = arith.addf %695, %694 : vector<2x64xf32>
    %697 = arith.divf %695, %696 : vector<2x64xf32>
    %698 = arith.mulf %689, %668 : vector<2x64xf32>
    %699 = arith.mulf %683, %691 : vector<2x64xf32>
    %700 = arith.addf %698, %699 : vector<2x64xf32>
    %701 = math.tanh %700 : vector<2x64xf32>
    %702 = arith.mulf %697, %701 : vector<2x64xf32>
    %703 = vector.extract_strided_slice %702 {offsets = [0, 0], sizes = [2, 32], strides = [1, 1]} : vector<2x64xf32> to vector<2x32xf32>
    %c22_404 = arith.constant 22 : index
    %c0_405 = arith.constant 0 : index
    %704 = vector.load %arg4[%c22_404, %c0_405] : memref<32x32xf32, #tpu.memory_space<vmem>>, vector<2x32xf32>
    tpu.vector_store %arg4[%c22_404, %c0_405], %703 {strides = array<i32>} : memref<32x32xf32, #tpu.memory_space<vmem>>, vector<2x32xf32>,
    %705 = vector.extract_strided_slice %702 {offsets = [0, 32], sizes = [2, 32], strides = [1, 1]} : vector<2x64xf32> to vector<2x32xf32>
    %c8_406 = arith.constant 8 : index
    %c0_407 = arith.constant 0 : index
    %706 = vector.load %arg5[%c8_406, %c0_407] : memref<32x32xf32, #tpu.memory_space<vmem>>, vector<2x32xf32>
    tpu.vector_store %arg5[%c8_406, %c0_407], %705 {strides = array<i32>} : memref<32x32xf32, #tpu.memory_space<vmem>>, vector<2x32xf32>,
    %c24_408 = arith.constant 24 : index
    %c0_409 = arith.constant 0 : index
    %707 = vector.load %arg3[%c24_408, %c0_409] : memref<32x256xf32, #tpu.memory_space<vmem>>, vector<2x256xf32>
    %cst_410 = arith.constant dense<0.000000e+00> : vector<2x256xf32>
    %708 = tpu.matmul %702, %320, %cst_410 {dimension_numbers = #tpu.dot_dimension_numbers<[1], [0], [0], [1], [0, 0, 1, 1], [], []>} : vector<2x64xf32>, vector<64x256xf32>, vector<2x256xf32> -> vector<2x256xf32>
    %709 = arith.addf %707, %708 : vector<2x256xf32>
    %710 = vector.extract_strided_slice %709 {offsets = [0, 0], sizes = [2, 64], strides = [1, 1]} : vector<2x256xf32> to vector<2x64xf32>
    %711 = arith.negf %710 : vector<2x64xf32>
    %712 = math.exp %711 : vector<2x64xf32>
    %cst_411 = arith.constant 1.000000e+00 : f32
    %713 = vector.broadcast %cst_411 : f32 to vector<2x64xf32>
    %714 = arith.addf %713, %712 : vector<2x64xf32>
    %715 = arith.divf %713, %714 : vector<2x64xf32>
    %716 = vector.extract_strided_slice %709 {offsets = [0, 64], sizes = [2, 64], strides = [1, 1]} : vector<2x256xf32> to vector<2x64xf32>
    %717 = arith.negf %716 : vector<2x64xf32>
    %718 = math.exp %717 : vector<2x64xf32>
    %cst_412 = arith.constant 1.000000e+00 : f32
    %719 = vector.broadcast %cst_412 : f32 to vector<2x64xf32>
    %720 = arith.addf %719, %718 : vector<2x64xf32>
    %721 = arith.divf %719, %720 : vector<2x64xf32>
    %722 = vector.extract_strided_slice %709 {offsets = [0, 128], sizes = [2, 64], strides = [1, 1]} : vector<2x256xf32> to vector<2x64xf32>
    %723 = math.tanh %722 : vector<2x64xf32>
    %724 = vector.extract_strided_slice %709 {offsets = [0, 192], sizes = [2, 64], strides = [1, 1]} : vector<2x256xf32> to vector<2x64xf32>
    %725 = arith.negf %724 : vector<2x64xf32>
    %726 = math.exp %725 : vector<2x64xf32>
    %cst_413 = arith.constant 1.000000e+00 : f32
    %727 = vector.broadcast %cst_413 : f32 to vector<2x64xf32>
    %728 = arith.addf %727, %726 : vector<2x64xf32>
    %729 = arith.divf %727, %728 : vector<2x64xf32>
    %730 = arith.mulf %721, %700 : vector<2x64xf32>
    %731 = arith.mulf %715, %723 : vector<2x64xf32>
    %732 = arith.addf %730, %731 : vector<2x64xf32>
    %733 = math.tanh %732 : vector<2x64xf32>
    %734 = arith.mulf %729, %733 : vector<2x64xf32>
    %735 = vector.extract_strided_slice %734 {offsets = [0, 0], sizes = [2, 32], strides = [1, 1]} : vector<2x64xf32> to vector<2x32xf32>
    %c24_414 = arith.constant 24 : index
    %c0_415 = arith.constant 0 : index
    %736 = vector.load %arg4[%c24_414, %c0_415] : memref<32x32xf32, #tpu.memory_space<vmem>>, vector<2x32xf32>
    tpu.vector_store %arg4[%c24_414, %c0_415], %735 {strides = array<i32>} : memref<32x32xf32, #tpu.memory_space<vmem>>, vector<2x32xf32>,
    %737 = vector.extract_strided_slice %734 {offsets = [0, 32], sizes = [2, 32], strides = [1, 1]} : vector<2x64xf32> to vector<2x32xf32>
    %c6_416 = arith.constant 6 : index
    %c0_417 = arith.constant 0 : index
    %738 = vector.load %arg5[%c6_416, %c0_417] : memref<32x32xf32, #tpu.memory_space<vmem>>, vector<2x32xf32>
    tpu.vector_store %arg5[%c6_416, %c0_417], %737 {strides = array<i32>} : memref<32x32xf32, #tpu.memory_space<vmem>>, vector<2x32xf32>,
    %c26_418 = arith.constant 26 : index
    %c0_419 = arith.constant 0 : index
    %739 = vector.load %arg3[%c26_418, %c0_419] : memref<32x256xf32, #tpu.memory_space<vmem>>, vector<2x256xf32>
    %cst_420 = arith.constant dense<0.000000e+00> : vector<2x256xf32>
    %740 = tpu.matmul %734, %320, %cst_420 {dimension_numbers = #tpu.dot_dimension_numbers<[1], [0], [0], [1], [0, 0, 1, 1], [], []>} : vector<2x64xf32>, vector<64x256xf32>, vector<2x256xf32> -> vector<2x256xf32>
    %741 = arith.addf %739, %740 : vector<2x256xf32>
    %742 = vector.extract_strided_slice %741 {offsets = [0, 0], sizes = [2, 64], strides = [1, 1]} : vector<2x256xf32> to vector<2x64xf32>
    %743 = arith.negf %742 : vector<2x64xf32>
    %744 = math.exp %743 : vector<2x64xf32>
    %cst_421 = arith.constant 1.000000e+00 : f32
    %745 = vector.broadcast %cst_421 : f32 to vector<2x64xf32>
    %746 = arith.addf %745, %744 : vector<2x64xf32>
    %747 = arith.divf %745, %746 : vector<2x64xf32>
    %748 = vector.extract_strided_slice %741 {offsets = [0, 64], sizes = [2, 64], strides = [1, 1]} : vector<2x256xf32> to vector<2x64xf32>
    %749 = arith.negf %748 : vector<2x64xf32>
    %750 = math.exp %749 : vector<2x64xf32>
    %cst_422 = arith.constant 1.000000e+00 : f32
    %751 = vector.broadcast %cst_422 : f32 to vector<2x64xf32>
    %752 = arith.addf %751, %750 : vector<2x64xf32>
    %753 = arith.divf %751, %752 : vector<2x64xf32>
    %754 = vector.extract_strided_slice %741 {offsets = [0, 128], sizes = [2, 64], strides = [1, 1]} : vector<2x256xf32> to vector<2x64xf32>
    %755 = math.tanh %754 : vector<2x64xf32>
    %756 = vector.extract_strided_slice %741 {offsets = [0, 192], sizes = [2, 64], strides = [1, 1]} : vector<2x256xf32> to vector<2x64xf32>
    %757 = arith.negf %756 : vector<2x64xf32>
    %758 = math.exp %757 : vector<2x64xf32>
    %cst_423 = arith.constant 1.000000e+00 : f32
    %759 = vector.broadcast %cst_423 : f32 to vector<2x64xf32>
    %760 = arith.addf %759, %758 : vector<2x64xf32>
    %761 = arith.divf %759, %760 : vector<2x64xf32>
    %762 = arith.mulf %753, %732 : vector<2x64xf32>
    %763 = arith.mulf %747, %755 : vector<2x64xf32>
    %764 = arith.addf %762, %763 : vector<2x64xf32>
    %765 = math.tanh %764 : vector<2x64xf32>
    %766 = arith.mulf %761, %765 : vector<2x64xf32>
    %767 = vector.extract_strided_slice %766 {offsets = [0, 0], sizes = [2, 32], strides = [1, 1]} : vector<2x64xf32> to vector<2x32xf32>
    %c26_424 = arith.constant 26 : index
    %c0_425 = arith.constant 0 : index
    %768 = vector.load %arg4[%c26_424, %c0_425] : memref<32x32xf32, #tpu.memory_space<vmem>>, vector<2x32xf32>
    tpu.vector_store %arg4[%c26_424, %c0_425], %767 {strides = array<i32>} : memref<32x32xf32, #tpu.memory_space<vmem>>, vector<2x32xf32>,
    %769 = vector.extract_strided_slice %766 {offsets = [0, 32], sizes = [2, 32], strides = [1, 1]} : vector<2x64xf32> to vector<2x32xf32>
    %c4_426 = arith.constant 4 : index
    %c0_427 = arith.constant 0 : index
    %770 = vector.load %arg5[%c4_426, %c0_427] : memref<32x32xf32, #tpu.memory_space<vmem>>, vector<2x32xf32>
    tpu.vector_store %arg5[%c4_426, %c0_427], %769 {strides = array<i32>} : memref<32x32xf32, #tpu.memory_space<vmem>>, vector<2x32xf32>,
    %c28_428 = arith.constant 28 : index
    %c0_429 = arith.constant 0 : index
    %771 = vector.load %arg3[%c28_428, %c0_429] : memref<32x256xf32, #tpu.memory_space<vmem>>, vector<2x256xf32>
    %cst_430 = arith.constant dense<0.000000e+00> : vector<2x256xf32>
    %772 = tpu.matmul %766, %320, %cst_430 {dimension_numbers = #tpu.dot_dimension_numbers<[1], [0], [0], [1], [0, 0, 1, 1], [], []>} : vector<2x64xf32>, vector<64x256xf32>, vector<2x256xf32> -> vector<2x256xf32>
    %773 = arith.addf %771, %772 : vector<2x256xf32>
    %774 = vector.extract_strided_slice %773 {offsets = [0, 0], sizes = [2, 64], strides = [1, 1]} : vector<2x256xf32> to vector<2x64xf32>
    %775 = arith.negf %774 : vector<2x64xf32>
    %776 = math.exp %775 : vector<2x64xf32>
    %cst_431 = arith.constant 1.000000e+00 : f32
    %777 = vector.broadcast %cst_431 : f32 to vector<2x64xf32>
    %778 = arith.addf %777, %776 : vector<2x64xf32>
    %779 = arith.divf %777, %778 : vector<2x64xf32>
    %780 = vector.extract_strided_slice %773 {offsets = [0, 64], sizes = [2, 64], strides = [1, 1]} : vector<2x256xf32> to vector<2x64xf32>
    %781 = arith.negf %780 : vector<2x64xf32>
    %782 = math.exp %781 : vector<2x64xf32>
    %cst_432 = arith.constant 1.000000e+00 : f32
    %783 = vector.broadcast %cst_432 : f32 to vector<2x64xf32>
    %784 = arith.addf %783, %782 : vector<2x64xf32>
    %785 = arith.divf %783, %784 : vector<2x64xf32>
    %786 = vector.extract_strided_slice %773 {offsets = [0, 128], sizes = [2, 64], strides = [1, 1]} : vector<2x256xf32> to vector<2x64xf32>
    %787 = math.tanh %786 : vector<2x64xf32>
    %788 = vector.extract_strided_slice %773 {offsets = [0, 192], sizes = [2, 64], strides = [1, 1]} : vector<2x256xf32> to vector<2x64xf32>
    %789 = arith.negf %788 : vector<2x64xf32>
    %790 = math.exp %789 : vector<2x64xf32>
    %cst_433 = arith.constant 1.000000e+00 : f32
    %791 = vector.broadcast %cst_433 : f32 to vector<2x64xf32>
    %792 = arith.addf %791, %790 : vector<2x64xf32>
    %793 = arith.divf %791, %792 : vector<2x64xf32>
    %794 = arith.mulf %785, %764 : vector<2x64xf32>
    %795 = arith.mulf %779, %787 : vector<2x64xf32>
    %796 = arith.addf %794, %795 : vector<2x64xf32>
    %797 = math.tanh %796 : vector<2x64xf32>
    %798 = arith.mulf %793, %797 : vector<2x64xf32>
    %799 = vector.extract_strided_slice %798 {offsets = [0, 0], sizes = [2, 32], strides = [1, 1]} : vector<2x64xf32> to vector<2x32xf32>
    %c28_434 = arith.constant 28 : index
    %c0_435 = arith.constant 0 : index
    %800 = vector.load %arg4[%c28_434, %c0_435] : memref<32x32xf32, #tpu.memory_space<vmem>>, vector<2x32xf32>
    tpu.vector_store %arg4[%c28_434, %c0_435], %799 {strides = array<i32>} : memref<32x32xf32, #tpu.memory_space<vmem>>, vector<2x32xf32>,
    %801 = vector.extract_strided_slice %798 {offsets = [0, 32], sizes = [2, 32], strides = [1, 1]} : vector<2x64xf32> to vector<2x32xf32>
    %c2_436 = arith.constant 2 : index
    %c0_437 = arith.constant 0 : index
    %802 = vector.load %arg5[%c2_436, %c0_437] : memref<32x32xf32, #tpu.memory_space<vmem>>, vector<2x32xf32>
    tpu.vector_store %arg5[%c2_436, %c0_437], %801 {strides = array<i32>} : memref<32x32xf32, #tpu.memory_space<vmem>>, vector<2x32xf32>,
    %c30_438 = arith.constant 30 : index
    %c0_439 = arith.constant 0 : index
    %803 = vector.load %arg3[%c30_438, %c0_439] : memref<32x256xf32, #tpu.memory_space<vmem>>, vector<2x256xf32>
    %cst_440 = arith.constant dense<0.000000e+00> : vector<2x256xf32>
    %804 = tpu.matmul %798, %320, %cst_440 {dimension_numbers = #tpu.dot_dimension_numbers<[1], [0], [0], [1], [0, 0, 1, 1], [], []>} : vector<2x64xf32>, vector<64x256xf32>, vector<2x256xf32> -> vector<2x256xf32>
    %805 = arith.addf %803, %804 : vector<2x256xf32>
    %806 = vector.extract_strided_slice %805 {offsets = [0, 0], sizes = [2, 64], strides = [1, 1]} : vector<2x256xf32> to vector<2x64xf32>
    %807 = arith.negf %806 : vector<2x64xf32>
    %808 = math.exp %807 : vector<2x64xf32>
    %cst_441 = arith.constant 1.000000e+00 : f32
    %809 = vector.broadcast %cst_441 : f32 to vector<2x64xf32>
    %810 = arith.addf %809, %808 : vector<2x64xf32>
    %811 = arith.divf %809, %810 : vector<2x64xf32>
    %812 = vector.extract_strided_slice %805 {offsets = [0, 64], sizes = [2, 64], strides = [1, 1]} : vector<2x256xf32> to vector<2x64xf32>
    %813 = arith.negf %812 : vector<2x64xf32>
    %814 = math.exp %813 : vector<2x64xf32>
    %cst_442 = arith.constant 1.000000e+00 : f32
    %815 = vector.broadcast %cst_442 : f32 to vector<2x64xf32>
    %816 = arith.addf %815, %814 : vector<2x64xf32>
    %817 = arith.divf %815, %816 : vector<2x64xf32>
    %818 = vector.extract_strided_slice %805 {offsets = [0, 128], sizes = [2, 64], strides = [1, 1]} : vector<2x256xf32> to vector<2x64xf32>
    %819 = math.tanh %818 : vector<2x64xf32>
    %820 = vector.extract_strided_slice %805 {offsets = [0, 192], sizes = [2, 64], strides = [1, 1]} : vector<2x256xf32> to vector<2x64xf32>
    %821 = arith.negf %820 : vector<2x64xf32>
    %822 = math.exp %821 : vector<2x64xf32>
    %cst_443 = arith.constant 1.000000e+00 : f32
    %823 = vector.broadcast %cst_443 : f32 to vector<2x64xf32>
    %824 = arith.addf %823, %822 : vector<2x64xf32>
    %825 = arith.divf %823, %824 : vector<2x64xf32>
    %826 = arith.mulf %817, %796 : vector<2x64xf32>
    %827 = arith.mulf %811, %819 : vector<2x64xf32>
    %828 = arith.addf %826, %827 : vector<2x64xf32>
    %829 = math.tanh %828 : vector<2x64xf32>
    %830 = arith.mulf %825, %829 : vector<2x64xf32>
    %831 = vector.extract_strided_slice %830 {offsets = [0, 0], sizes = [2, 32], strides = [1, 1]} : vector<2x64xf32> to vector<2x32xf32>
    %c30_444 = arith.constant 30 : index
    %c0_445 = arith.constant 0 : index
    %832 = vector.load %arg4[%c30_444, %c0_445] : memref<32x32xf32, #tpu.memory_space<vmem>>, vector<2x32xf32>
    tpu.vector_store %arg4[%c30_444, %c0_445], %831 {strides = array<i32>} : memref<32x32xf32, #tpu.memory_space<vmem>>, vector<2x32xf32>,
    %833 = vector.extract_strided_slice %830 {offsets = [0, 32], sizes = [2, 32], strides = [1, 1]} : vector<2x64xf32> to vector<2x32xf32>
    %c0_446 = arith.constant 0 : index
    %c0_447 = arith.constant 0 : index
    %834 = vector.load %arg5[%c0_446, %c0_447] : memref<32x32xf32, #tpu.memory_space<vmem>>, vector<2x32xf32>
    tpu.vector_store %arg5[%c0_446, %c0_447], %833 {strides = array<i32>} : memref<32x32xf32, #tpu.memory_space<vmem>>, vector<2x32xf32>,
    %c176 = arith.constant 176 : index
    %c0_448 = arith.constant 0 : index
    %835 = vector.load %arg1[%c176, %c0_448] : memref<216x256xf32, #tpu.memory_space<vmem>>, vector<32x32xf32>
    %c176_449 = arith.constant 176 : index
    %c32 = arith.constant 32 : index
    %836 = vector.load %arg1[%c176_449, %c32] : memref<216x256xf32, #tpu.memory_space<vmem>>, vector<32x32xf32>
    %c176_450 = arith.constant 176 : index
    %c64 = arith.constant 64 : index
    %837 = vector.load %arg1[%c176_450, %c64] : memref<216x256xf32, #tpu.memory_space<vmem>>, vector<32x4xf32>
    %c208 = arith.constant 208 : index
    %c0_451 = arith.constant 0 : index
    %838 = vector.load %arg1[%c208, %c0_451] : memref<216x256xf32, #tpu.memory_space<vmem>>, vector<1x32xf32>
    %c209 = arith.constant 209 : index
    %c0_452 = arith.constant 0 : index
    %839 = vector.load %arg1[%c209, %c0_452] : memref<216x256xf32, #tpu.memory_space<vmem>>, vector<1x32xf32>
    %c210 = arith.constant 210 : index
    %c0_453 = arith.constant 0 : index
    %840 = vector.load %arg1[%c210, %c0_453] : memref<216x256xf32, #tpu.memory_space<vmem>>, vector<1x16xf32>
    %c211 = arith.constant 211 : index
    %c0_454 = arith.constant 0 : index
    %841 = vector.load %arg1[%c211, %c0_454] : memref<216x256xf32, #tpu.memory_space<vmem>>, vector<1x1xf32>
    %c211_455 = arith.constant 211 : index
    %c1_456 = arith.constant 1 : index
    %842 = vector.load %arg1[%c211_455, %c1_456] : memref<216x256xf32, #tpu.memory_space<vmem>>, vector<1x1xf32>
    %c0_457 = arith.constant 0 : index
    %c0_458 = arith.constant 0 : index
    %843 = vector.load %arg4[%c0_457, %c0_458] : memref<32x32xf32, #tpu.memory_space<vmem>>, vector<32x32xf32>
    %cst_459 = arith.constant dense<0.000000e+00> : vector<32x32xf32>
    %844 = tpu.matmul %843, %835, %cst_459 {dimension_numbers = #tpu.dot_dimension_numbers<[1], [0], [0], [1], [0, 0, 1, 1], [], []>} : vector<32x32xf32>, vector<32x32xf32>, vector<32x32xf32> -> vector<32x32xf32>
    %c0_460 = arith.constant 0 : index
    %c0_461 = arith.constant 0 : index
    %845 = vector.load %arg5[%c0_460, %c0_461] : memref<32x32xf32, #tpu.memory_space<vmem>>, vector<32x32xf32>
    %cst_462 = arith.constant dense<0.000000e+00> : vector<32x32xf32>
    %846 = tpu.matmul %845, %836, %cst_462 {dimension_numbers = #tpu.dot_dimension_numbers<[1], [0], [0], [1], [0, 0, 1, 1], [], []>} : vector<32x32xf32>, vector<32x32xf32>, vector<32x32xf32> -> vector<32x32xf32>
    %847 = arith.addf %844, %846 : vector<32x32xf32>
    %848 = vector.broadcast %838 : vector<1x32xf32> to vector<32x32xf32>
    %849 = arith.addf %847, %848 : vector<32x32xf32>
    %cst_463 = arith.constant 0.000000e+00 : f32
    %850 = vector.broadcast %cst_463 : f32 to vector<32x32xf32>
    %851 = arith.maximumf %849, %850 : vector<32x32xf32>
    %852 = vector.shape_cast %851 : vector<32x32xf32> to vector<16x2x32xf32>
    %853 = tpu.transpose %852, [1, 0, 2] : vector<16x2x32xf32> -> vector<2x16x32xf32>
    %854 = vector.shape_cast %853 : vector<2x16x32xf32> to vector<32x32xf32>
    %855 = vector.shape_cast %854 : vector<32x32xf32> to vector<8x4x32xf32>
    %cst_464 = arith.constant dense<0xFF800000> : vector<8x32xf32>
    %856 = vector.multi_reduction <maximumf>, %855, %cst_464 [1] : vector<8x4x32xf32> to vector<8x32xf32>
    %cst_465 = arith.constant dense<0.000000e+00> : vector<8x4xf32>
    %857 = tpu.matmul %856, %837, %cst_465 {dimension_numbers = #tpu.dot_dimension_numbers<[1], [0], [0], [1], [0, 0, 1, 1], [], []>} : vector<8x32xf32>, vector<32x4xf32>, vector<8x4xf32> -> vector<8x4xf32>
    %858 = vector.shape_cast %856 : vector<8x32xf32> to vector<2x4x32xf32>
    %859 = vector.shape_cast %839 : vector<1x32xf32> to vector<1x1x32xf32>
    %860 = vector.broadcast %859 : vector<1x1x32xf32> to vector<2x4x32xf32>
    %861 = arith.mulf %858, %860 : vector<2x4x32xf32>
    %cst_466 = arith.constant dense<0.000000e+00> : vector<2x4xf32>
    %862 = vector.multi_reduction <add>, %861, %cst_466 [2] : vector<2x4x32xf32> to vector<2x4xf32>
    %863 = vector.broadcast %841 : vector<1x1xf32> to vector<2x4xf32>
    %864 = arith.addf %862, %863 : vector<2x4xf32>
    %865 = math.tanh %864 : vector<2x4xf32>
    %cst_467 = arith.constant dense<0xFF800000> : vector<2xf32>
    %866 = vector.multi_reduction <maximumf>, %865, %cst_467 [1] : vector<2x4xf32> to vector<2xf32>
    %867 = vector.shape_cast %866 : vector<2xf32> to vector<2x1xf32>
    %868 = vector.broadcast %867 : vector<2x1xf32> to vector<2x4xf32>
    %869 = arith.subf %865, %868 : vector<2x4xf32>
    %870 = math.exp %869 : vector<2x4xf32>
    %cst_468 = arith.constant dense<0.000000e+00> : vector<2xf32>
    %871 = vector.multi_reduction <add>, %870, %cst_468 [1] : vector<2x4xf32> to vector<2xf32>
    %872 = vector.shape_cast %871 : vector<2xf32> to vector<2x1xf32>
    %873 = vector.broadcast %872 : vector<2x1xf32> to vector<2x4xf32>
    %874 = arith.divf %870, %873 : vector<2x4xf32>
    %875 = vector.shape_cast %854 : vector<32x32xf32> to vector<2x16x32xf32>
    %876 = vector.shape_cast %840 : vector<1x16xf32> to vector<1x16x1xf32>
    %877 = vector.broadcast %876 : vector<1x16x1xf32> to vector<2x16x32xf32>
    %878 = arith.mulf %875, %877 : vector<2x16x32xf32>
    %cst_469 = arith.constant dense<0.000000e+00> : vector<2x32xf32>
    %879 = vector.multi_reduction <add>, %878, %cst_469 [1] : vector<2x16x32xf32> to vector<2x32xf32>
    %880 = vector.broadcast %842 : vector<1x1xf32> to vector<2x32xf32>
    %881 = arith.addf %879, %880 : vector<2x32xf32>
    %cst_470 = arith.constant dense<0.000000e+00> : vector<2x4xf32>
    %882 = tpu.matmul %881, %837, %cst_470 {dimension_numbers = #tpu.dot_dimension_numbers<[1], [0], [0], [1], [0, 0, 1, 1], [], []>} : vector<2x32xf32>, vector<32x4xf32>, vector<2x4xf32> -> vector<2x4xf32>
    %cst_471 = arith.constant 0.000000e+00 : f32
    %883 = vector.broadcast %cst_471 : f32 to vector<16x128xf32>
    %c0_472 = arith.constant 0 : index
    %c0_473 = arith.constant 0 : index
    %884 = vector.load %arg2[%c0_472, %c0_473] : memref<16x128xf32, #tpu.memory_space<vmem>>, vector<16x128xf32>
    tpu.vector_store %arg2[%c0_472, %c0_473], %883 {strides = array<i32>} : memref<16x128xf32, #tpu.memory_space<vmem>>, vector<16x128xf32>,
    %c0_474 = arith.constant 0 : index
    %c0_475 = arith.constant 0 : index
    %885 = vector.load %arg2[%c0_474, %c0_475] : memref<16x128xf32, #tpu.memory_space<vmem>>, vector<8x4xf32>
    tpu.vector_store %arg2[%c0_474, %c0_475], %857 {strides = array<i32>} : memref<16x128xf32, #tpu.memory_space<vmem>>, vector<8x4xf32>,
    %c8_476 = arith.constant 8 : index
    %c0_477 = arith.constant 0 : index
    %886 = vector.load %arg2[%c8_476, %c0_477] : memref<16x128xf32, #tpu.memory_space<vmem>>, vector<2x4xf32>
    tpu.vector_store %arg2[%c8_476, %c0_477], %882 {strides = array<i32>} : memref<16x128xf32, #tpu.memory_space<vmem>>, vector<2x4xf32>,
    %c10_478 = arith.constant 10 : index
    %c0_479 = arith.constant 0 : index
    %887 = vector.load %arg2[%c10_478, %c0_479] : memref<16x128xf32, #tpu.memory_space<vmem>>, vector<2x4xf32>
    tpu.vector_store %arg2[%c10_478, %c0_479], %874 {strides = array<i32>} : memref<16x128xf32, #tpu.memory_space<vmem>>, vector<2x4xf32>,
    return
  }
}

</mosaic_0001>

<bundles_post_ra>
// kernel: lstm_model_forward.1
= control target key start
LH: loop header
LB: loop body
LE: loop exit
PB: predicated region body
PF: predicated region fallthrough
CT: control target
= control target key end

     0   :  { %7 = vsyncpa [#allocation7], 0  ;;  %s5179_s0 = inlined_call_operand.hbm [shape: s32[2,16], index: 0, kind: input, shape index: {}]   ;;  %s5180_s1 = inlined_call_operand.hbm [shape: f32[216,256], index: 1, kind: input, shape index: {}]   ;;  %s5181_s2 = inlined_call_operand.vmem [shape: f32[16,128], index: 2, kind: output, shape index: {}]  }
   0x1   :  { %s14_s11 = sshll.u32 %s5179_s0, 4  ;;  %s15_s11 = int_to_ptr.hbm [resolvable:$true] %s14_s11 }
   0x2   :  { %8 = vsyncpa [#allocation6], 0  ;;  %s22_s14 = sshll.u32 %s5180_s1, 4  ;;  %s4194_s15 = smov [#allocation5]   ;;  %s23_s14 = int_to_ptr.hbm [resolvable:$true] %s22_s14 }
   0x3   :  { %17 = dma.hbm_to_smem %s15_s11, 32, %s4194_s15, [#allocation7]  }
   0x4   :  { %s4195_s16 = smov [#allocation8]   ;;  %s4196_s18 = smov 256  }
   0x5   :  { %s24_s17 = sshll.u32 %s4195_s16, 4  ;;  %s4197_s19 = smov 16   ;;  %s25_s17 = int_to_ptr.vmem [resolvable:$true] %s24_s17 }
   0x6   :  { %30 = dma.hbm_to_vmem [thread:$0]  %s23_s14, 6912, %s25_s17, [#allocation6], %s4196_s18, %s4196_s18, %s4197_s19  }
   0x7   :  { %4190 = dma.done.wait [#allocation7], 32  }
   0x8   :  { %4191 = vsyncadd [#allocation7], 4294967264 }
   0x9   :  { %4192 = dma.done.wait [#allocation6], 6912  }
   0xa   :  { %4193 = vsyncadd [#allocation6], 4294960384 }
   0xb   :  { %39 = sfence }
   0xc   :  { %v4230_v0 = vld [vmem:[#allocation8 + $0x150] sm:$0xff]  ;;  %v4232_v1 = vld [vmem:[#allocation8 + $0x140] sm:$0xff]  ;;  %s4234_s0 = sld [smem:[#allocation5]]  ;;  %v4237_v2 = vld [vmem:[#allocation8 + $0x158] sm:$0xff]  ;;  %v4198_v3 = vmov 0.0   ;;  %v62_v13 = vlaneseq  ;;  %vm959_vm9 = vcmask 254976  }
   0xd   :  { %873 = vmatpush.msra.mxu2 %v4230_v0  ;;  %3327 = vst [vmem:[%s5181_s2] sm:$0xff] %v4198_v3  ;;  %s4243_s21 = sld [smem:[#allocation5 + $0xf]]  ;;  %1093 = vmatpush.msra.mxu0 %v4230_v0  ;;  %v4246_v4 = vld [vmem:[#allocation8 + $0x130] sm:$0xff]  ;;  %v4249_v5 = vld [vmem:[#allocation8 + $0x148] sm:$0xff]  ;;  %v4257_v6 = vld [vmem:[#allocation8 + $0x138] sm:$0xff]  ;;  %vm861_vm10 = vcmask 523264  }
   0xe   :  { %893 = vmatpush.msra.mxu3 %v4237_v2  ;;  %3328 = vst [vmem:[%s5181_s2 + $0x8] sm:$0xff] %v4198_v3  ;;  %1113 = vmatpush.msra.mxu1 %v4237_v2  ;;  %s4259_s24 = sld [smem:[#allocation5 + $0x80]]  ;;  %v4262_v7 = vld [vmem:[#allocation8 + $0x120] sm:$0xff]  ;;  %v4267_v8 = vld [vmem:[#allocation8 + $0x128] sm:$0xff]  ;;  %v4272_v9 = vld [vmem:[#allocation8 + $0x110] sm:$0xff]  ;;  %vm4309_vm0 = vcmp.lt.s32.totalorder %v62_v13, 256 }
   0xf   :  { %874 = vmatpush.msra.mxu2 %v4232_v1  ;;  %1094 = vmatpush.msra.mxu0 %v4232_v1  ;;  %s4269_s25 = sld [smem:[#allocation5 + $0x8f]]  ;;  %v4279_v10 = vld [vmem:[#allocation8 + $0x118] sm:$0xff]  ;;  %v4283_v11 = vld [vmem:[#allocation8 + $0x100] sm:$0xff]  ;;  %v4288_v12 = vld [vmem:[#allocation8 + $0x108] sm:$0xff] }
  0x10   :  { %894 = vmatpush.msra.mxu3 %v4249_v5  ;;  %1114 = vmatpush.msra.mxu1 %v4249_v5  ;;  %v4291_v14 = vld [vmem:[#allocation8 + $0xf0] sm:$0xff]  ;;  %v4297_v15 = vld [vmem:[#allocation8 + $0xf8] sm:$0xff]  ;;  %v4301_v17 = vld [vmem:[#allocation8 + $0xe0] sm:$0xff]  ;;  %s3557_s1 = sld [smem:[#allocation5 + $0xe]] }
  0x11   :  { %875 = vmatpush.msra.mxu2 %v4246_v4  ;;  %1095 = vmatpush.msra.mxu0 %v4246_v4  ;;  %v4306_v18 = vld [vmem:[#allocation8 + $0xe8] sm:$0xff]  ;;  %s3554_s20 = sld [smem:[#allocation5 + $0x1]] }
  0x12   :  { %895 = vmatpush.msra.mxu3 %v4257_v6  ;;  %s41_s26 = sshra.s32 %s4234_s0, 3  ;;  %s44_s27 = sand.u32 7, %s4234_s0  ;;  %1115 = vmatpush.msra.mxu1 %v4257_v6 }
  0x13   :  { %876 = vmatpush.msra.mxu2 %v4262_v7  ;;  %s3813_s28 = sshll.u32 %s41_s26, 4  ;;  %s51_s29 = sadd.s32 56, %s4243_s21  ;;  %1096 = vmatpush.msra.mxu0 %v4262_v7 }
  0x14   :  { %896 = vmatpush.msra.mxu3 %v4267_v8  ;;  %s47_s30 = sadd.s32 %s3813_s28, %s44_s27  ;;  %s52_s3 = sshra.s32 %s51_s29, 3  ;;  %1116 = vmatpush.msra.mxu1 %v4267_v8 }
  0x15   :  { %877 = vmatpush.msra.mxu2 %v4272_v9  ;;  %s55_s4 = sand.u32 7, %s51_s29  ;;  %1097 = vmatpush.msra.mxu0 %v4272_v9  ;;  %s3814_s5 = sshll.u32 %s52_s3, 4 }
  0x16   :  { %897 = vmatpush.msra.mxu3 %v4279_v10  ;;  %s69_s6 = sshra.s32 %s4259_s24, 3  ;;  %1117 = vmatpush.msra.mxu1 %v4279_v10  ;;  %s48_s7 = scalar_lea.vmem [#allocation8], %s47_s30 }
  0x17   :  { %878 = vmatpush.msra.mxu2 %v4283_v11  ;;  %v49_v16 = vld [vmem:[%s48_s7] ss:$8 sm:$0x3]  ;;  %s58_s8 = sadd.s32 %s3814_s5, %s55_s4  ;;  %s72_s9 = sand.u32 7, %s4259_s24  ;;  %1098 = vmatpush.msra.mxu0 %v4283_v11 }
  0x18   :  { %898 = vmatpush.msra.mxu3 %v4288_v12  ;;  %s3815_s10 = sshll.u32 %s69_s6, 4  ;;  %1118 = vmatpush.msra.mxu1 %v4288_v12  ;;  %s59_s11 = scalar_lea.vmem [#allocation8], %s58_s8 }
  0x19   :  { %879 = vmatpush.msra.mxu2 %v4291_v14  ;;  %v60_v19 = vld [vmem:[%s59_s11] ss:$8 sm:$0x3]  ;;  %s75_s12 = sadd.s32 %s3815_s10, %s72_s9  ;;  %s79_s13 = sadd.s32 56, %s4269_s25  ;;  %1099 = vmatpush.msra.mxu0 %v4291_v14 }
  0x1a   :  { %899 = vmatpush.msra.mxu3 %v4297_v15  ;;  %v61_v21 = vadd.f32 %v60_v19, %v49_v16  ;;  %s80_s14 = sshra.s32 %s79_s13, 3  ;;  %1119 = vmatpush.msra.mxu1 %v4297_v15  ;;  %s83_s15 = sand.u32 7, %s79_s13 }
  0x1b   :  { %880 = vmatpush.msra.mxu2 %v4301_v17  ;;  %s3816_s16 = sshll.u32 %s80_s14, 4  ;;  %1100 = vmatpush.msra.mxu0 %v4301_v17  ;;  %s76_s17 = scalar_lea.vmem [#allocation8], %s75_s12 }
  0x1c   :  { %881 = vmatmul.f32.vlgmr.msra.gmra.mxu2 %v4198_v3  ;;  %900 = vmatpush.msra.mxu3 %v4306_v18  ;;  %66 = vst.msk [vmem:[#allocation2] ss:$8 sm:$0x3] %vm4309_vm0, %v61_v21  ;;  %v77_v22 = vld [vmem:[%s76_s17] ss:$8 sm:$0x3]  ;;  %s86_s18 = sadd.s32 %s3816_s16, %s83_s15 }
  0x1d   :  { %901 = vmatmul.f32.vlgmr.msra.gmra.mxu3 %v4198_v3  ;;  %977 = vmatpush.msrb.mxu2 %v4230_v0  ;;  %s87_s19 = scalar_lea.vmem [#allocation8], %s86_s18  ;;  %s5182_s0 = smov 64  }
  0x1e   :  { %v88_v23 = vld [vmem:[%s87_s19] ss:$8 sm:$0x3]  ;;  %997 = vmatpush.msrb.mxu3 %v4237_v2  ;;  %1120 = vmatpush.msra.mxu1 %v4306_v18  ;;  %s3563_s21 = sld [smem:[#allocation5 + $0x8e]]  ;;  %s104_s23 = sadd.s32 56, %s3557_s1 }
  0x1f   :  { %v89_v24 = vadd.f32 %v88_v23, %v77_v22  ;;  %978 = vmatpush.msrb.mxu2 %v4232_v1  ;;  %1325 = vmatpush.msrb.mxu0 %v4230_v0  ;;  %s3560_s22 = sld [smem:[#allocation5 + $0x81]]  ;;  %s94_s24 = sshra.s32 %s3554_s20, 3 }
  0x20   :  { %998 = vmatpush.msrb.mxu3 %v4249_v5  ;;  %1345 = vmatpush.msrb.mxu1 %v4237_v2  ;;  %s105_s26 = sshra.s32 %s104_s23, 3  ;;  %s97_s27 = sand.u32 7, %s3554_s20 }
  0x21   :  { %91 = vst.msk [vmem:[#allocation2 + $0x1] ss:$8 sm:$0x3] %vm4309_vm0, %v89_v24  ;;  %979 = vmatpush.msrb.mxu2 %v4246_v4  ;;  %1326 = vmatpush.msrb.mxu0 %v4232_v1  ;;  %s3817_s29 = sshll.u32 %s94_s24, 4  ;;  %s108_s3 = sand.u32 7, %s104_s23 }
  0x22   :  { %999 = vmatpush.msrb.mxu3 %v4257_v6  ;;  %1346 = vmatpush.msrb.mxu1 %v4249_v5  ;;  %s3818_s4 = sshll.u32 %s105_s26, 4  ;;  %s100_s9 = sadd.s32 %s3817_s29, %s97_s27 }
  0x23   :  { %980 = vmatpush.msrb.mxu2 %v4262_v7  ;;  %1327 = vmatpush.msrb.mxu0 %v4246_v4  ;;  %s111_s10 = sadd.s32 %s3818_s4, %s108_s3  ;;  %s101_s13 = scalar_lea.vmem [#allocation8], %s100_s9 }
  0x24   :  { %1000 = vmatpush.msrb.mxu3 %v4267_v8  ;;  %1347 = vmatpush.msrb.mxu1 %v4257_v6  ;;  %s129_s25 = sadd.s32 56, %s3563_s21  ;;  %v102_v3 = vld [vmem:[%s101_s13] ss:$8 sm:$0x3]  ;;  %s112_s14 = scalar_lea.vmem [#allocation8], %s111_s10 }
  0x25   :  { %981 = vmatpush.msrb.mxu2 %v4272_v9  ;;  %1328 = vmatpush.msrb.mxu0 %v4262_v7  ;;  %s119_s28 = sshra.s32 %s3560_s22, 3  ;;  %s130_s30 = sshra.s32 %s129_s25, 3  ;;  %v113_v16 = vld [vmem:[%s112_s14] ss:$8 sm:$0x3] }
  0x26   :  { %1001 = vmatpush.msrb.mxu3 %v4279_v10  ;;  %1348 = vmatpush.msrb.mxu1 %v4267_v8  ;;  %s122_s5 = sand.u32 7, %s3560_s22  ;;  %s3819_s6 = sshll.u32 %s119_s28, 4  ;;  %v114_v19 = vadd.f32 %v113_v16, %v102_v3 }
  0x27   :  { %982 = vmatpush.msrb.mxu2 %v4283_v11  ;;  %1329 = vmatpush.msrb.mxu0 %v4272_v9  ;;  %s133_s7 = sand.u32 7, %s129_s25  ;;  %s3820_s8 = sshll.u32 %s130_s30, 4 }
  0x28   :  { %1002 = vmatpush.msrb.mxu3 %v4288_v12  ;;  %1349 = vmatpush.msrb.mxu1 %v4279_v10  ;;  %v859_v25 = vld [vmem:[#allocation2] sm:$0x3]  ;;  %v860_v31 = vld [vmem:[#allocation2 + $0x8] sm:$0x3]  ;;  %s125_s11 = sadd.s32 %s3819_s6, %s122_s5  ;;  %s136_s12 = sadd.s32 %s3820_s8, %s133_s7 }
  0x29   :  { %983 = vmatpush.msrb.mxu2 %v4291_v14  ;;  %1330 = vmatpush.msrb.mxu0 %v4283_v11  ;;  %s126_s15 = scalar_lea.vmem [#allocation8], %s125_s11  ;;  %s137_s16 = scalar_lea.vmem [#allocation8], %s136_s12  ;;  %116 = vst.msk [vmem:[#allocation2 + $0x2] ss:$8 sm:$0x3] %vm4309_vm0, %v114_v19 }
  0x2a   :  { %1003 = vmatpush.msrb.mxu3 %v4297_v15  ;;  %1350 = vmatpush.msrb.mxu1 %v4288_v12  ;;  %v127_v21 = vld [vmem:[%s126_s15] ss:$8 sm:$0x3]  ;;  %s3569_s17 = sld [smem:[#allocation5 + $0xd]] }
  0x2b   :  { %984 = vmatpush.msrb.mxu2 %v4301_v17  ;;  %1331 = vmatpush.msrb.mxu0 %v4291_v14  ;;  %v138_v22 = vld [vmem:[%s137_s16] ss:$8 sm:$0x3]  ;;  %s3566_s18 = sld [smem:[#allocation5 + $0x2]] }
  0x2c   :  { %1004 = vmatpush.msrb.mxu3 %v4306_v18  ;;  %1351 = vmatpush.msrb.mxu1 %v4297_v15  ;;  %v139_v23 = vadd.f32 %v138_v22, %v127_v21  ;;  %s3575_s19 = sld [smem:[#allocation5 + $0x8d]] }
  0x2d   :  { %1209 = vmatpush.msra.mxu2 %v4230_v0  ;;  %1332 = vmatpush.msrb.mxu0 %v4301_v17  ;;  %s3572_s1 = sld [smem:[#allocation5 + $0x82]] }
  0x2e   :  { %1229 = vmatpush.msra.mxu3 %v4237_v2  ;;  %1352 = vmatpush.msrb.mxu1 %v4306_v18  ;;  %141 = vst.msk [vmem:[#allocation2 + $0x3] ss:$8 sm:$0x3] %vm4309_vm0, %v139_v23  ;;  %s3581_s14 = sld [smem:[#allocation5 + $0xc]] }
  0x2f   :  { %1210 = vmatpush.msra.mxu2 %v4232_v1  ;;  %s3578_s15 = sld [smem:[#allocation5 + $0x3]] }
  0x30   :  { %1230 = vmatpush.msra.mxu3 %v4249_v5  ;;  %s154_s20 = sadd.s32 56, %s3569_s17  ;;  %s3587_s16 = sld [smem:[#allocation5 + $0x8c]] }
  0x31   :  { %1211 = vmatpush.msra.mxu2 %v4246_v4  ;;  %s144_s21 = sshra.s32 %s3566_s18, 3  ;;  %s155_s23 = sshra.s32 %s154_s20, 3 }
  0x32   :  { %1231 = vmatpush.msra.mxu3 %v4257_v6  ;;  %s179_s22 = sadd.s32 56, %s3575_s19  ;;  %s147_s24 = sand.u32 7, %s3566_s18 }
  0x33   :  { %1212 = vmatpush.msra.mxu2 %v4262_v7  ;;  %s169_s25 = sshra.s32 %s3572_s1, 3  ;;  %s3821_s26 = sshll.u32 %s144_s21, 4 }
  0x34   :  { %1232 = vmatpush.msra.mxu3 %v4267_v8  ;;  %s180_s27 = sshra.s32 %s179_s22, 3  ;;  %s158_s28 = sand.u32 7, %s154_s20 }
  0x35   :  { %1213 = vmatpush.msra.mxu2 %v4272_v9  ;;  %s3822_s29 = sshll.u32 %s155_s23, 4  ;;  %s172_s30 = sand.u32 7, %s3572_s1 }
  0x36   :  { %1233 = vmatpush.msra.mxu3 %v4279_v10  ;;  %s3823_s3 = sshll.u32 %s169_s25, 4  ;;  %s183_s4 = sand.u32 7, %s179_s22 }
  0x37   :  { %1214 = vmatpush.msra.mxu2 %v4283_v11  ;;  %s3824_s5 = sshll.u32 %s180_s27, 4  ;;  %s150_s6 = sadd.s32 %s3821_s26, %s147_s24 }
  0x38   :  { %1234 = vmatpush.msra.mxu3 %v4288_v12  ;;  %s161_s7 = sadd.s32 %s3822_s29, %s158_s28  ;;  %s175_s8 = sadd.s32 %s3823_s3, %s172_s30 }
  0x39   :  { %1215 = vmatpush.msra.mxu2 %v4291_v14  ;;  %s186_s9 = sadd.s32 %s3824_s5, %s183_s4  ;;  %s151_s10 = scalar_lea.vmem [#allocation8], %s150_s6 }
  0x3a   :  { %1235 = vmatpush.msra.mxu3 %v4297_v15  ;;  %v152_v23 = vld [vmem:[%s151_s10] ss:$8 sm:$0x3]  ;;  %s162_s11 = scalar_lea.vmem [#allocation8], %s161_s7  ;;  %s176_s12 = scalar_lea.vmem [#allocation8], %s175_s8 }
  0x3b   :  { %1216 = vmatpush.msra.mxu2 %v4301_v17  ;;  %s187_s13 = scalar_lea.vmem [#allocation8], %s186_s9  ;;  %s3584_s17 = sld [smem:[#allocation5 + $0x83]] }
  0x3c   :  { %1236 = vmatpush.msra.mxu3 %v4306_v18  ;;  %s204_s18 = sadd.s32 56, %s3581_s14  ;;  %s194_s19 = sshra.s32 %s3578_s15, 3 }
  0x3d   :  { %s229_s1 = sadd.s32 56, %s3587_s16  ;;  %s205_s20 = sshra.s32 %s204_s18, 3 }
  0x3e   :  { %s197_s21 = sand.u32 7, %s3578_s15  ;;  %s3825_s23 = sshll.u32 %s194_s19, 4 }
  0x3f   :  { %s230_s24 = sshra.s32 %s229_s1, 3  ;;  %s208_s25 = sand.u32 7, %s204_s18 }
  0x40   :  { %s3826_s26 = sshll.u32 %s205_s20, 4  ;;  %s233_s29 = sand.u32 7, %s229_s1 }
  0x41   :  { %s219_s22 = sshra.s32 %s3584_s17, 3  ;;  %s222_s27 = sand.u32 7, %s3584_s17 }
  0x42   :  { %s3827_s28 = sshll.u32 %s219_s22, 4  ;;  %s3828_s30 = sshll.u32 %s230_s24, 4 }
  0x43   :  { %s200_s3 = sadd.s32 %s3825_s23, %s197_s21  ;;  %s211_s4 = sadd.s32 %s3826_s26, %s208_s25 }
  0x44   :  { %s225_s5 = sadd.s32 %s3827_s28, %s222_s27  ;;  %s236_s6 = sadd.s32 %s3828_s30, %s233_s29 }
  0x45   :  { %s201_s7 = scalar_lea.vmem [#allocation8], %s200_s3  ;;  %s212_s8 = scalar_lea.vmem [#allocation8], %s211_s4 }
  0x46   :  { %s226_s9 = scalar_lea.vmem [#allocation8], %s225_s5  ;;  %s237_s10 = scalar_lea.vmem [#allocation8], %s236_s6 }
  0x47   :  { %s3596_s14 = sld [smem:[#allocation5 + $0x84]] }
  0x4d   :  { %s269_s1 = sshra.s32 %s3596_s14, 3  ;;  %s272_s24 = sand.u32 7, %s3596_s14 }
  0x4e   :  { %s3831_s25 = sshll.u32 %s269_s1, 4 }
  0x4f   :  { %s275_s30 = sadd.s32 %s3831_s25, %s272_s24 }
  0x50   :  { %s276_s6 = scalar_lea.vmem [#allocation8], %s275_s30 }
  0x9f   :  { %v882_v26 = vpop.f32.mrf.mxu2 }
  0xa0   :  { %v905_v27 = vadd.f32 %v882_v26, %v859_v25  ;;  %v902_v32 = vpop.f32.mrf.mxu3  ;;  %v965_v25 = vld [vmem:[#allocation2] sm:$0xc] }
  0xa1   :  { %v906_v34 = vadd.f32 %v902_v32, %v860_v31 }
  0xa2   :  { %v3733_v28 = vmul.f32 -1.442695, %v905_v27 }
  0xa3   :  { %v3734_v46 = vmul.f32 -1.442695, %v906_v34 }
  0xa4   :  { %3918 = vpow2.f32 %v3733_v28 }
  0xaa   :  { %v3919_v29 = vpop.eup %3918 }
  0xab   :  { %v910_v30 = vadd.f32 1.0, %v3919_v29 }
  0xad   :  { %3920 = vrcp.f32 %v910_v30  ;;  %v922_v37 = vand.u32 2147483648, %v910_v30  ;;  %v920_v39 = vand.u32 2147483647, %v910_v30  ;;  %vm916_vm2 = vweird.f32 %v910_v30 }
  0xae   :  { %3922 = vtanh.f32 %v906_v34  ;;  %v966_v34 = vld [vmem:[#allocation2 + $0x8] sm:$0xc] }
  0xaf   :  { %v923_v42 = vor.u32 1.1754944e-38, %v922_v37  ;;  %vm921_vm4 = vcmp.eq.f32.partialorder %v920_v39, 8.507059e+37  ;;  %3924 = vpow2.f32 %v3734_v46 }
  0xb3   :  { %v3921_v33 = vpop.eup %3920 }
  0xb4   :  { %v912_v35 = vmul.f32 %v3921_v33, %v910_v30  ;;  %vm917_vm1 = vweird.f32 %v3921_v33  ;;  %v3923_v41 = vpop.eup %3922 }
  0xb5   :  { %vm918_vm3 = vmor %vm916_vm2, %vm917_vm1  ;;  %v3925_v47 = vpop.eup %3924 }
  0xb6   :  { %v913_v36 = vsub.f32 1.0, %v912_v35  ;;  %v930_v48 = vadd.f32 1.0, %v3925_v47 }
  0xb8   :  { %v914_v38 = vmul.f32 %v3921_v33, %v913_v36  ;;  %3926 = vrcp.f32 %v930_v48  ;;  %vm936_vm5 = vweird.f32 %v930_v48  ;;  %v942_v56 = vand.u32 2147483648, %v930_v48 }
  0xb9   :  { %v940_v58 = vand.u32 2147483647, %v930_v48 }
  0xba   :  { %v915_v40 = vadd.f32 %v3921_v33, %v914_v38  ;;  %v943_v59 = vor.u32 1.1754944e-38, %v942_v56 }
  0xbb   :  { %vm941_vm8 = vcmp.eq.f32.partialorder %v940_v58, 8.507059e+37 }
  0xbc   :  { %v919_v43 = vsel %vm918_vm3, %v3921_v33, %v915_v40 }
  0xbd   :  { %v924_v44 = vsel %vm921_vm4, %v923_v42, %v919_v43 }
  0xbe   :  { %v947_v45 = vmul.f32 %v3923_v41, %v924_v44  ;;  %v3927_v49 = vpop.eup %3926  ;;  %v946_v53 = vmul.f32 0.0, %v924_v44 }
  0xbf   :  { %v932_v50 = vmul.f32 %v3927_v49, %v930_v48  ;;  %vm937_vm6 = vweird.f32 %v3927_v49 }
  0xc0   :  { %949 = vrot.lane.b32.xlu0 %v947_v45, %s5182_s0  ;;  %vm938_vm7 = vmor %vm936_vm5, %vm937_vm6 }
  0xc1   :  { %v933_v51 = vsub.f32 1.0, %v932_v50 }
  0xc3   :  { %v934_v52 = vmul.f32 %v3927_v49, %v933_v51 }
  0xc5   :  { %v935_v57 = vadd.f32 %v3927_v49, %v934_v52 }
  0xc7   :  { %v939_v60 = vsel %vm938_vm7, %v3927_v49, %v935_v57 }
  0xc8   :  { %v944_v62 = vsel %vm941_vm8, %v943_v59, %v939_v60 }
 0x132   :  { %v950_v54 = vpop.permute.xlu0 %949 }
 0x133   :  { %v4376_v55 = vadd.f32 %v950_v54, %v946_v53 }
 0x135   :  { %3928 = vtanh.f32 %v4376_v55  ;;  %v1057_v44 = vrot.slane %v4376_v55, 6 }
 0x13b   :  { %v3929_v61 = vpop.eup %3928 }
 0x13c   :  { %v4379_v63 = vmul.f32 %v3929_v61, %v944_v62 }
 0x13e   :  { %956 = vrot.lane.b32.xlu0 %v4379_v63, %s5182_s0 }
 0x1b0   :  { %v957_v24 = vpop.permute.xlu0 %956 }
 0x1b1   :  { %960 = vst.msk [vmem:[#allocation3] sm:$0x3] %vm959_vm9, %v957_v24  ;;  %3735 = vmatmul.msk.f32.vlgmr.msrb.gmra.mxu2 %vm861_vm10, %v957_v24  ;;  %3736 = vmatmul.msk.f32.vlgmr.msrb.gmra.mxu3 %vm861_vm10, %v957_v24  ;;  %v163_v24 = vld [vmem:[%s162_s11] ss:$8 sm:$0x3]  ;;  %s3593_s11 = sld [smem:[#allocation5 + $0xb]] }
 0x1b2   :  { %1431 = vmatpush.msrb.mxu2 %v4230_v0  ;;  %1451 = vmatpush.msrb.mxu3 %v4237_v2 }
 0x1b4   :  { %1432 = vmatpush.msrb.mxu2 %v4232_v1  ;;  %1452 = vmatpush.msrb.mxu3 %v4249_v5 }
 0x1b6   :  { %1433 = vmatpush.msrb.mxu2 %v4246_v4  ;;  %1453 = vmatpush.msrb.mxu3 %v4257_v6 }
 0x1b7   :  { %s254_s15 = sadd.s32 56, %s3593_s11  ;;  %s3608_s11 = sld [smem:[#allocation5 + $0x85]] }
 0x1b8   :  { %1434 = vmatpush.msrb.mxu2 %v4262_v7  ;;  %1454 = vmatpush.msrb.mxu3 %v4267_v8  ;;  %s255_s18 = sshra.s32 %s254_s15, 3  ;;  %s258_s22 = sand.u32 7, %s254_s15 }
 0x1b9   :  { %s3830_s23 = sshll.u32 %s255_s18, 4 }
 0x1ba   :  { %1435 = vmatpush.msrb.mxu2 %v4272_v9  ;;  %1455 = vmatpush.msrb.mxu3 %v4279_v10  ;;  %s261_s29 = sadd.s32 %s3830_s23, %s258_s22 }
 0x1bb   :  { %s262_s5 = scalar_lea.vmem [#allocation8], %s261_s29 }
 0x1bc   :  { %1436 = vmatpush.msrb.mxu2 %v4283_v11  ;;  %1456 = vmatpush.msrb.mxu3 %v4288_v12 }
 0x1be   :  { %1437 = vmatpush.msrb.mxu2 %v4291_v14  ;;  %1457 = vmatpush.msrb.mxu3 %v4297_v15 }
 0x1c0   :  { %1438 = vmatpush.msrb.mxu2 %v4301_v17  ;;  %1458 = vmatpush.msrb.mxu3 %v4306_v18 }
 0x234   :  { %v986_v26 = vpop.f32.mrf.mxu2  ;;  %v1006_v32 = vpop.f32.mrf.mxu3 }
 0x235   :  { %v1011_v27 = vrot.slane %v986_v26, 6  ;;  %v1012_v33 = vrot.slane %v1006_v32, 6  ;;  %v177_v26 = vld [vmem:[%s176_s12] ss:$8 sm:$0x3]  ;;  %s3590_s12 = sld [smem:[#allocation5 + $0x4]] }
 0x237   :  { %v1015_v28 = vadd.f32 %v1011_v27, %v965_v25  ;;  %v1016_v36 = vadd.f32 %v1012_v33, %v966_v34  ;;  %v164_v25 = vadd.f32 %v163_v24, %v152_v23  ;;  %v188_v27 = vld [vmem:[%s187_s13] ss:$8 sm:$0x3]  ;;  %s3599_s13 = sld [smem:[#allocation5 + $0x8b]] }
 0x239   :  { %v3737_v29 = vmul.f32 -1.442695, %v1015_v28  ;;  %v3738_v50 = vmul.f32 -1.442695, %v1016_v36  ;;  %v189_v28 = vadd.f32 %v188_v27, %v177_v26 }
 0x23a   :  { %166 = vst.msk [vmem:[#allocation2 + $0x4] ss:$8 sm:$0x3] %vm4309_vm0, %v164_v25 }
 0x23b   :  { %3930 = vpow2.f32 %v3737_v29  ;;  %191 = vst.msk [vmem:[#allocation2 + $0x5] ss:$8 sm:$0x3] %vm4309_vm0, %v189_v28  ;;  %s244_s16 = sshra.s32 %s3590_s12, 3  ;;  %s247_s19 = sand.u32 7, %s3590_s12 }
 0x23c   :  { %s3829_s20 = sshll.u32 %s244_s16, 4 }
 0x23d   :  { %s279_s17 = sadd.s32 56, %s3599_s13  ;;  %s250_s28 = sadd.s32 %s3829_s20, %s247_s19 }
 0x23e   :  { %s280_s21 = sshra.s32 %s279_s17, 3  ;;  %s283_s26 = sand.u32 7, %s279_s17 }
 0x23f   :  { %s3832_s27 = sshll.u32 %s280_s21, 4  ;;  %s251_s4 = scalar_lea.vmem [#allocation8], %s250_s28 }
 0x240   :  { %s286_s3 = sadd.s32 %s3832_s27, %s283_s26  ;;  %s319_s17 = sshra.s32 %s3608_s11, 3 }
 0x241   :  { %v3931_v30 = vpop.eup %3930  ;;  %s322_s21 = sand.u32 7, %s3608_s11  ;;  %s3835_s22 = sshll.u32 %s319_s17, 4 }
 0x242   :  { %v1020_v31 = vadd.f32 1.0, %v3931_v30  ;;  %v1078_v30 = vld [vmem:[#allocation2] sm:$0x30]  ;;  %s325_s27 = sadd.s32 %s3835_s22, %s322_s21 }
 0x244   :  { %3932 = vrcp.f32 %v1020_v31  ;;  %v1032_v39 = vand.u32 2147483648, %v1020_v31  ;;  %v1030_v41 = vand.u32 2147483647, %v1020_v31  ;;  %vm1026_vm12 = vweird.f32 %v1020_v31 }
 0x245   :  { %3934 = vtanh.f32 %v1016_v36 }
 0x246   :  { %v1033_v43 = vor.u32 1.1754944e-38, %v1032_v39  ;;  %vm1031_vm14 = vcmp.eq.f32.partialorder %v1030_v41, 8.507059e+37  ;;  %3936 = vpow2.f32 %v3738_v50  ;;  %v1079_v39 = vld [vmem:[#allocation2 + $0x8] sm:$0x30] }
 0x24a   :  { %v3933_v35 = vpop.eup %3932 }
 0x24b   :  { %v1022_v37 = vmul.f32 %v3933_v35, %v1020_v31  ;;  %vm1027_vm11 = vweird.f32 %v3933_v35  ;;  %v3935_v46 = vpop.eup %3934 }
 0x24c   :  { %vm1028_vm13 = vmor %vm1026_vm12, %vm1027_vm11  ;;  %v3937_v51 = vpop.eup %3936 }
 0x24d   :  { %v1023_v38 = vsub.f32 1.0, %v1022_v37  ;;  %v1040_v52 = vadd.f32 1.0, %v3937_v51 }
 0x24f   :  { %v1024_v40 = vmul.f32 %v3933_v35, %v1023_v38  ;;  %3938 = vrcp.f32 %v1040_v52  ;;  %v1052_v60 = vand.u32 2147483648, %v1040_v52  ;;  %vm1046_vm1 = vweird.f32 %v1040_v52 }
 0x250   :  { %v1050_v61 = vand.u32 2147483647, %v1040_v52 }
 0x251   :  { %v1025_v42 = vadd.f32 %v3933_v35, %v1024_v40  ;;  %v1053_v3 = vor.u32 1.1754944e-38, %v1052_v60 }
 0x252   :  { %vm1051_vm3 = vcmp.eq.f32.partialorder %v1050_v61, 8.507059e+37 }
 0x253   :  { %v1029_v45 = vsel %vm1028_vm13, %v3933_v35, %v1025_v42 }
 0x254   :  { %v1034_v47 = vsel %vm1031_vm14, %v1033_v43, %v1029_v45 }
 0x255   :  { %v1060_v48 = vmul.f32 %v3935_v46, %v1034_v47  ;;  %v1059_v49 = vmul.f32 %v1057_v44, %v1034_v47  ;;  %v3939_v53 = vpop.eup %3938 }
 0x256   :  { %v1042_v54 = vmul.f32 %v3939_v53, %v1040_v52  ;;  %vm1047_vm15 = vweird.f32 %v3939_v53 }
 0x257   :  { %1062 = vrot.lane.b32.xlu1 %v1060_v48, %s5182_s0  ;;  %vm1048_vm2 = vmor %vm1046_vm1, %vm1047_vm15 }
 0x258   :  { %v1043_v56 = vsub.f32 1.0, %v1042_v54 }
 0x25a   :  { %v1044_v57 = vmul.f32 %v3939_v53, %v1043_v56 }
 0x25c   :  { %v1045_v55 = vadd.f32 %v3939_v53, %v1044_v57 }
 0x25e   :  { %v1049_v62 = vsel %vm1048_vm2, %v3939_v53, %v1045_v55 }
 0x25f   :  { %v1054_v19 = vsel %vm1051_vm3, %v1053_v3, %v1049_v62 }
 0x2c9   :  { %v1063_v58 = vpop.permute.xlu1 %1062 }
 0x2ca   :  { %v4408_v59 = vadd.f32 %v1063_v58, %v1059_v49 }
 0x2cc   :  { %3940 = vtanh.f32 %v4408_v59  ;;  %v1173_v49 = vrot.slane %v4408_v59, 6 }
 0x2d2   :  { %v3941_v16 = vpop.eup %3940 }
 0x2d3   :  { %v4411_v21 = vmul.f32 %v3941_v16, %v1054_v19 }
 0x2d5   :  { %v1080_v22 = vrot.slane %v4411_v21, 2 }
 0x2d7   :  { %1081 = vrot.lane.b32.xlu1 %v1080_v22, %s5182_s0 }
 0x349   :  { %v1082_v29 = vpop.permute.xlu1 %1081 }
 0x34a   :  { %3739 = vmatmul.msk.f32.vlgmr.msra.gmra.mxu0 %vm861_vm10, %v1082_v29  ;;  %3740 = vmatmul.msk.f32.vlgmr.msra.gmra.mxu1 %vm861_vm10, %v1082_v29  ;;  %v202_v29 = vld [vmem:[%s201_s7] ss:$8 sm:$0x3]  ;;  %s287_s7 = scalar_lea.vmem [#allocation8], %s286_s3  ;;  %s326_s3 = scalar_lea.vmem [#allocation8], %s325_s27 }
 0x34b   :  { %1546 = vmatpush.msra.mxu0 %v4230_v0  ;;  %1566 = vmatpush.msra.mxu1 %v4237_v2 }
 0x34d   :  { %1547 = vmatpush.msra.mxu0 %v4232_v1  ;;  %1567 = vmatpush.msra.mxu1 %v4249_v5 }
 0x34f   :  { %1548 = vmatpush.msra.mxu0 %v4246_v4  ;;  %1568 = vmatpush.msra.mxu1 %v4257_v6 }
 0x351   :  { %1549 = vmatpush.msra.mxu0 %v4262_v7  ;;  %1569 = vmatpush.msra.mxu1 %v4267_v8 }
 0x353   :  { %1550 = vmatpush.msra.mxu0 %v4272_v9  ;;  %1570 = vmatpush.msra.mxu1 %v4279_v10 }
 0x355   :  { %1551 = vmatpush.msra.mxu0 %v4283_v11  ;;  %1571 = vmatpush.msra.mxu1 %v4288_v12 }
 0x357   :  { %1552 = vmatpush.msra.mxu0 %v4291_v14  ;;  %1572 = vmatpush.msra.mxu1 %v4297_v15 }
 0x359   :  { %1553 = vmatpush.msra.mxu0 %v4301_v17  ;;  %1573 = vmatpush.msra.mxu1 %v4306_v18 }
 0x3c7   :  { %v1102_v31 = vpop.f32.mrf.mxu0  ;;  %v1122_v37 = vpop.f32.mrf.mxu1 }
 0x3c8   :  { %v1127_v32 = vrot.slane %v1102_v31, 4  ;;  %v1128_v38 = vrot.slane %v1122_v37, 4 }
 0x3ca   :  { %v1131_v33 = vadd.f32 %v1127_v32, %v1078_v30  ;;  %v1132_v41 = vadd.f32 %v1128_v38, %v1079_v39  ;;  %v213_v30 = vld [vmem:[%s212_s8] ss:$8 sm:$0x3]  ;;  %s3605_s8 = sld [smem:[#allocation5 + $0xa]] }
 0x3cb   :  { %v214_v31 = vadd.f32 %v213_v30, %v202_v29  ;;  %v227_v32 = vld [vmem:[%s226_s9] ss:$8 sm:$0x3]  ;;  %v4492_v30 = vld [vmem:[#allocation8 + $0x148] sm:$0xff]  ;;  %s3602_s9 = sld [smem:[#allocation5 + $0x5]] }
 0x3cc   :  { %v3741_v34 = vmul.f32 -1.442695, %v1131_v33  ;;  %v3742_v56 = vmul.f32 -1.442695, %v1132_v41  ;;  %v4489_v29 = vld [vmem:[#allocation8 + $0x140] sm:$0xff] }
 0x3cd   :  { %v238_v33 = vld [vmem:[%s237_s10] ss:$8 sm:$0x3]  ;;  %216 = vst.msk [vmem:[#allocation2 + $0x6] ss:$8 sm:$0x3] %vm4309_vm0, %v214_v31 }
 0x3ce   :  { %3942 = vpow2.f32 %v3741_v34  ;;  %v239_v34 = vadd.f32 %v238_v33, %v227_v32  ;;  %v4495_v31 = vld [vmem:[#allocation8 + $0x130] sm:$0xff]  ;;  %v4498_v32 = vld [vmem:[#allocation8 + $0x138] sm:$0xff]  ;;  %v4501_v33 = vld [vmem:[#allocation8 + $0x120] sm:$0xff]  ;;  %s3611_s10 = sld [smem:[#allocation5 + $0x8a]] }
 0x3d0   :  { %241 = vst.msk [vmem:[#allocation2 + $0x7] ss:$8 sm:$0x3] %vm4309_vm0, %v239_v34  ;;  %v4504_v34 = vld [vmem:[#allocation8 + $0x128] sm:$0xff]  ;;  %s304_s12 = sadd.s32 56, %s3605_s8  ;;  %s4578_s8 = sld [smem:[#allocation5 + $0x86]] }
 0x3d1   :  { %s294_s13 = sshra.s32 %s3602_s9, 3  ;;  %s305_s15 = sshra.s32 %s304_s12, 3 }
 0x3d2   :  { %s297_s16 = sand.u32 7, %s3602_s9  ;;  %s3833_s18 = sshll.u32 %s294_s13, 4 }
 0x3d3   :  { %s308_s1 = sand.u32 7, %s304_s12  ;;  %s3834_s20 = sshll.u32 %s305_s15, 4 }
 0x3d4   :  { %v3943_v35 = vpop.eup %3942  ;;  %s329_s14 = sadd.s32 56, %s3611_s10  ;;  %s300_s25 = sadd.s32 %s3833_s18, %s297_s16 }
 0x3d5   :  { %v1136_v36 = vadd.f32 1.0, %v3943_v35  ;;  %s330_s19 = sshra.s32 %s329_s14, 3  ;;  %s333_s23 = sand.u32 7, %s329_s14 }
 0x3d6   :  { %s3836_s24 = sshll.u32 %s330_s19, 4  ;;  %s311_s26 = sadd.s32 %s3834_s20, %s308_s1 }
 0x3d7   :  { %3944 = vrcp.f32 %v1136_v36  ;;  %v1148_v44 = vand.u32 2147483648, %v1136_v36  ;;  %v1146_v46 = vand.u32 2147483647, %v1136_v36  ;;  %vm1142_vm5 = vweird.f32 %v1136_v36  ;;  %s336_s28 = sadd.s32 %s3836_s24, %s333_s23  ;;  %s301_s29 = scalar_lea.vmem [#allocation8], %s300_s25 }
 0x3d8   :  { %3946 = vtanh.f32 %v1132_v41  ;;  %s312_s30 = scalar_lea.vmem [#allocation8], %s311_s26  ;;  %s369_s14 = sshra.s32 %s4578_s8, 3 }
 0x3d9   :  { %v1149_v48 = vor.u32 1.1754944e-38, %v1148_v44  ;;  %vm1147_vm7 = vcmp.eq.f32.partialorder %v1146_v46, 8.507059e+37  ;;  %3948 = vpow2.f32 %v3742_v56  ;;  %s372_s19 = sand.u32 7, %s4578_s8  ;;  %s3839_s1 = sshll.u32 %s369_s14, 4 }
 0x3da   :  { %s375_s24 = sadd.s32 %s3839_s1, %s372_s19 }
 0x3dd   :  { %v3945_v40 = vpop.eup %3944 }
 0x3de   :  { %v1138_v42 = vmul.f32 %v3945_v40, %v1136_v36  ;;  %vm1143_vm4 = vweird.f32 %v3945_v40  ;;  %v3947_v51 = vpop.eup %3946 }
 0x3df   :  { %vm1144_vm6 = vmor %vm1142_vm5, %vm1143_vm4  ;;  %v3949_v57 = vpop.eup %3948 }
 0x3e0   :  { %v1139_v43 = vsub.f32 1.0, %v1138_v42  ;;  %v1156_v58 = vadd.f32 1.0, %v3949_v57 }
 0x3e2   :  { %v1140_v45 = vmul.f32 %v3945_v40, %v1139_v43  ;;  %3950 = vrcp.f32 %v1156_v58  ;;  %v1168_v19 = vand.u32 2147483648, %v1156_v58  ;;  %vm1162_vm11 = vweird.f32 %v1156_v58 }
 0x3e3   :  { %v1166_v22 = vand.u32 2147483647, %v1156_v58 }
 0x3e4   :  { %v1141_v47 = vadd.f32 %v3945_v40, %v1140_v45  ;;  %v1169_v24 = vor.u32 1.1754944e-38, %v1168_v19 }
 0x3e5   :  { %vm1167_vm13 = vcmp.eq.f32.partialorder %v1166_v22, 8.507059e+37  ;;  %v277_v22 = vld [vmem:[%s276_s6] ss:$8 sm:$0x3]  ;;  %s4574_s6 = sld [smem:[#allocation5 + $0x6]] }
 0x3e6   :  { %v1145_v50 = vsel %vm1144_vm6, %v3945_v40, %v1141_v47 }
 0x3e7   :  { %v1150_v52 = vsel %vm1147_vm7, %v1149_v48, %v1145_v50 }
 0x3e8   :  { %v1176_v53 = vmul.f32 %v3947_v51, %v1150_v52  ;;  %v1175_v54 = vmul.f32 %v1173_v49, %v1150_v52  ;;  %v3951_v55 = vpop.eup %3950 }
 0x3e9   :  { %v1158_v60 = vmul.f32 %v3951_v55, %v1156_v58  ;;  %vm1163_vm8 = vweird.f32 %v3951_v55 }
 0x3ea   :  { %1178 = vrot.lane.b32.xlu2 %v1176_v53, %s5182_s0  ;;  %vm1164_vm12 = vmor %vm1162_vm11, %vm1163_vm8 }
 0x3eb   :  { %v1159_v61 = vsub.f32 1.0, %v1158_v60  ;;  %s344_s10 = sshra.s32 %s4574_s6, 3  ;;  %s347_s13 = sand.u32 7, %s4574_s6 }
 0x3ec   :  { %s3837_s15 = sshll.u32 %s344_s10, 4 }
 0x3ed   :  { %v1160_v62 = vmul.f32 %v3951_v55, %v1159_v61  ;;  %s350_s22 = sadd.s32 %s3837_s15, %s347_s13 }
 0x3ee   :  { %s351_s26 = scalar_lea.vmem [#allocation8], %s350_s22 }
 0x3ef   :  { %v1161_v59 = vadd.f32 %v3951_v55, %v1160_v62 }
 0x3f1   :  { %v1165_v23 = vsel %vm1164_vm12, %v3951_v55, %v1161_v59  ;;  %v263_v59 = vld [vmem:[%s262_s5] ss:$8 sm:$0x3]  ;;  %s4572_s5 = sld [smem:[#allocation5 + $0x9]] }
 0x3f2   :  { %v1170_v26 = vsel %vm1167_vm13, %v1169_v24, %v1165_v23  ;;  %v288_v23 = vld [vmem:[%s287_s7] ss:$8 sm:$0x3]  ;;  %s4576_s7 = sld [smem:[#allocation5 + $0x89]] }
 0x3f3   :  { %v289_v24 = vadd.f32 %v288_v23, %v277_v22 }
 0x3f5   :  { %291 = vst.msk [vmem:[#allocation2 + $0x11] ss:$8 sm:$0x3] %vm4309_vm0, %v289_v24  ;;  %v302_v24 = vld [vmem:[%s301_s29] ss:$8 sm:$0x3] }
 0x3f7   :  { %s354_s9 = sadd.s32 56, %s4572_s5 }
 0x3f8   :  { %s379_s11 = sadd.s32 56, %s4576_s7  ;;  %s355_s12 = sshra.s32 %s354_s9, 3 }
 0x3f9   :  { %s380_s16 = sshra.s32 %s379_s11, 3  ;;  %s358_s17 = sand.u32 7, %s354_s9 }
 0x3fa   :  { %s3838_s18 = sshll.u32 %s355_s12, 4  ;;  %s383_s20 = sand.u32 7, %s379_s11 }
 0x3fb   :  { %s3840_s21 = sshll.u32 %s380_s16, 4  ;;  %s361_s23 = sadd.s32 %s3838_s18, %s358_s17 }
 0x3fc   :  { %s386_s25 = sadd.s32 %s3840_s21, %s383_s20  ;;  %s362_s27 = scalar_lea.vmem [#allocation8], %s361_s23 }
 0x3fd   :  { %s387_s29 = scalar_lea.vmem [#allocation8], %s386_s25  ;;  %s4623_s9 = sld [smem:[#allocation5 + $0x87]] }
 0x403   :  { %s419_s15 = sshra.s32 %s4623_s9, 3  ;;  %s422_s1 = sand.u32 7, %s4623_s9 }
 0x404   :  { %s3843_s20 = sshll.u32 %s419_s15, 4 }
 0x405   :  { %s425_s25 = sadd.s32 %s3843_s20, %s422_s1 }
 0x444   :  { %v1179_v3 = vpop.permute.xlu2 %1178 }
 0x445   :  { %v4439_v16 = vadd.f32 %v1179_v3, %v1175_v54 }
 0x447   :  { %3952 = vtanh.f32 %v4439_v16  ;;  %v1289_v39 = vrot.slane %v4439_v16, 6  ;;  %v252_v16 = vld [vmem:[%s251_s4] ss:$8 sm:$0x3]  ;;  %s337_s4 = scalar_lea.vmem [#allocation8], %s336_s28  ;;  %s376_s28 = scalar_lea.vmem [#allocation8], %s375_s24 }
 0x448   :  { %v264_v19 = vadd.f32 %v263_v59, %v252_v16 }
 0x44a   :  { %266 = vst.msk [vmem:[#allocation2 + $0x10] ss:$8 sm:$0x3] %vm4309_vm0, %v264_v19 }
 0x44d   :  { %v3953_v25 = vpop.eup %3952 }
 0x44e   :  { %v4442_v27 = vmul.f32 %v3953_v25, %v1170_v26  ;;  %v4483_v26 = vld [vmem:[#allocation8 + $0x150] sm:$0xff] }
 0x450   :  { %v1196_v28 = vrot.slane %v4442_v27, 4 }
 0x452   :  { %1197 = vrot.lane.b32.xlu2 %v1196_v28, %s5182_s0  ;;  %v4486_v28 = vld [vmem:[#allocation8 + $0x158] sm:$0xff] }
 0x4ac   :  { %v1198_v35 = vpop.permute.xlu2 %1197 }
 0x4ad   :  { %3743 = vmatmul.msk.f32.vlgmr.msra.gmra.mxu2 %vm861_vm10, %v1198_v35  ;;  %3744 = vmatmul.msk.f32.vlgmr.msra.gmra.mxu3 %vm861_vm10, %v1198_v35  ;;  %v4507_v35 = vld [vmem:[#allocation8 + $0x110] sm:$0xff] }
 0x4ae   :  { %1661 = vmatpush.msra.mxu2 %v4230_v0  ;;  %1681 = vmatpush.msra.mxu3 %v4237_v2  ;;  %v1194_v0 = vld [vmem:[#allocation2] sm:$0xc0] }
 0x4b0   :  { %1662 = vmatpush.msra.mxu2 %v4232_v1  ;;  %1682 = vmatpush.msra.mxu3 %v4249_v5 }
 0x4b2   :  { %1663 = vmatpush.msra.mxu2 %v4246_v4  ;;  %1683 = vmatpush.msra.mxu3 %v4257_v6 }
 0x4b4   :  { %1664 = vmatpush.msra.mxu2 %v4262_v7  ;;  %1684 = vmatpush.msra.mxu3 %v4267_v8 }
 0x4b6   :  { %1665 = vmatpush.msra.mxu2 %v4272_v9  ;;  %1685 = vmatpush.msra.mxu3 %v4279_v10  ;;  %v1195_v10 = vld [vmem:[#allocation2 + $0x8] sm:$0xc0] }
 0x4b8   :  { %1666 = vmatpush.msra.mxu2 %v4283_v11  ;;  %1686 = vmatpush.msra.mxu3 %v4288_v12 }
 0x4ba   :  { %1667 = vmatpush.msra.mxu2 %v4291_v14  ;;  %1687 = vmatpush.msra.mxu3 %v4297_v15 }
 0x4bc   :  { %1668 = vmatpush.msra.mxu2 %v4301_v17  ;;  %1688 = vmatpush.msra.mxu3 %v4306_v18 }
 0x530   :  { %v1218_v1 = vpop.f32.mrf.mxu2  ;;  %v1238_v8 = vpop.f32.mrf.mxu3 }
 0x531   :  { %v1243_v2 = vrot.slane %v1218_v1, 2  ;;  %v1244_v9 = vrot.slane %v1238_v8, 2  ;;  %v4513_v1 = vld [vmem:[#allocation8 + $0x100] sm:$0xff]  ;;  %v1310_v8 = vld [vmem:[#allocation2 + $0x10] sm:$0x3] }
 0x533   :  { %v1247_v4 = vadd.f32 %v1243_v2, %v1194_v0  ;;  %v1248_v12 = vadd.f32 %v1244_v9, %v1195_v10  ;;  %v4510_v0 = vld [vmem:[#allocation8 + $0x118] sm:$0xff]  ;;  %v4516_v2 = vld [vmem:[#allocation8 + $0x108] sm:$0xff] }
 0x535   :  { %v3745_v5 = vmul.f32 -1.442695, %v1247_v4  ;;  %v3746_v45 = vmul.f32 -1.442695, %v1248_v12  ;;  %v4519_v4 = vld [vmem:[#allocation8 + $0xf0] sm:$0xff] }
 0x537   :  { %3954 = vpow2.f32 %v3745_v5  ;;  %v4522_v5 = vld [vmem:[#allocation8 + $0xf8] sm:$0xff] }
 0x53d   :  { %v3955_v6 = vpop.eup %3954 }
 0x53e   :  { %v1252_v7 = vadd.f32 1.0, %v3955_v6  ;;  %v4525_v6 = vld [vmem:[#allocation8 + $0xe0] sm:$0xff] }
 0x540   :  { %3956 = vrcp.f32 %v1252_v7  ;;  %v1264_v17 = vand.u32 2147483648, %v1252_v7  ;;  %v1262_v18 = vand.u32 2147483647, %v1252_v7  ;;  %vm1258_vm15 = vweird.f32 %v1252_v7 }
 0x541   :  { %3958 = vtanh.f32 %v1248_v12 }
 0x542   :  { %v1265_v38 = vor.u32 1.1754944e-38, %v1264_v17  ;;  %vm1263_vm2 = vcmp.eq.f32.partialorder %v1262_v18, 8.507059e+37  ;;  %3960 = vpow2.f32 %v3746_v45 }
 0x546   :  { %v3957_v11 = vpop.eup %3956 }
 0x547   :  { %v1254_v14 = vmul.f32 %v3957_v11, %v1252_v7  ;;  %vm1259_vm14 = vweird.f32 %v3957_v11  ;;  %v3959_v41 = vpop.eup %3958  ;;  %v4528_v7 = vld [vmem:[#allocation8 + $0xe8] sm:$0xff] }
 0x548   :  { %vm1260_vm1 = vmor %vm1258_vm15, %vm1259_vm14  ;;  %v3961_v46 = vpop.eup %3960 }
 0x549   :  { %v1255_v15 = vsub.f32 1.0, %v1254_v14  ;;  %v1272_v47 = vadd.f32 1.0, %v3961_v46 }
 0x54b   :  { %v1256_v36 = vmul.f32 %v3957_v11, %v1255_v15  ;;  %3962 = vrcp.f32 %v1272_v47  ;;  %v1284_v56 = vand.u32 2147483648, %v1272_v47  ;;  %vm1278_vm4 = vweird.f32 %v1272_v47  ;;  %v1311_v15 = vld [vmem:[#allocation2 + $0x18] sm:$0x3] }
 0x54c   :  { %v1282_v57 = vand.u32 2147483647, %v1272_v47 }
 0x54d   :  { %v1257_v37 = vadd.f32 %v3957_v11, %v1256_v36  ;;  %v1285_v55 = vor.u32 1.1754944e-38, %v1284_v56 }
 0x54e   :  { %vm1283_vm6 = vcmp.eq.f32.partialorder %v1282_v57, 8.507059e+37 }
 0x54f   :  { %v1261_v40 = vsel %vm1260_vm1, %v3957_v11, %v1257_v37 }
 0x550   :  { %v1266_v42 = vsel %vm1263_vm2, %v1265_v38, %v1261_v40 }
 0x551   :  { %v1292_v43 = vmul.f32 %v3959_v41, %v1266_v42  ;;  %v1291_v44 = vmul.f32 %v1289_v39, %v1266_v42  ;;  %v3963_v48 = vpop.eup %3962 }
 0x552   :  { %v1274_v49 = vmul.f32 %v3963_v48, %v1272_v47  ;;  %vm1279_vm3 = vweird.f32 %v3963_v48 }
 0x553   :  { %1294 = vrot.lane.b32.xlu0 %v1292_v43, %s5182_s0  ;;  %vm1280_vm5 = vmor %vm1278_vm4, %vm1279_vm3 }
 0x554   :  { %v1275_v50 = vsub.f32 1.0, %v1274_v49 }
 0x556   :  { %v1276_v51 = vmul.f32 %v3963_v48, %v1275_v50 }
 0x558   :  { %v1277_v54 = vadd.f32 %v3963_v48, %v1276_v51 }
 0x55a   :  { %v1281_v58 = vsel %vm1280_vm5, %v3963_v48, %v1277_v54 }
 0x55b   :  { %v1286_v61 = vsel %vm1283_vm6, %v1285_v55, %v1281_v58 }
 0x5c5   :  { %v1295_v52 = vpop.permute.xlu0 %1294 }
 0x5c6   :  { %v4470_v53 = vadd.f32 %v1295_v52, %v1291_v44 }
 0x5c8   :  { %3964 = vtanh.f32 %v4470_v53  ;;  %v1399_v44 = vrot.slane %v4470_v53, 6 }
 0x5ce   :  { %v3965_v60 = vpop.eup %3964 }
 0x5cf   :  { %v4473_v62 = vmul.f32 %v3965_v60, %v1286_v61 }
 0x5d1   :  { %v1312_v3 = vrot.slane %v4473_v62, 6 }
 0x5d3   :  { %1313 = vrot.lane.b32.xlu1 %v1312_v3, %s5182_s0 }
 0x645   :  { %v1314_v25 = vpop.permute.xlu1 %1313 }
 0x646   :  { %3747 = vmatmul.msk.f32.vlgmr.msrb.gmra.mxu0 %vm861_vm10, %v1314_v25  ;;  %3748 = vmatmul.msk.f32.vlgmr.msrb.gmra.mxu1 %vm861_vm10, %v1314_v25  ;;  %v313_v25 = vld [vmem:[%s312_s30] ss:$8 sm:$0x3]  ;;  %s4617_s30 = sld [smem:[#allocation5 + $0x8]] }
 0x647   :  { %1776 = vmatpush.msrb.mxu0 %v4483_v26  ;;  %1796 = vmatpush.msrb.mxu1 %v4486_v28 }
 0x649   :  { %1777 = vmatpush.msrb.mxu0 %v4489_v29  ;;  %1797 = vmatpush.msrb.mxu1 %v4492_v30 }
 0x64b   :  { %1778 = vmatpush.msrb.mxu0 %v4495_v31  ;;  %1798 = vmatpush.msrb.mxu1 %v4498_v32 }
 0x64c   :  { %s404_s10 = sadd.s32 56, %s4617_s30 }
 0x64d   :  { %1779 = vmatpush.msrb.mxu0 %v4501_v33  ;;  %1799 = vmatpush.msrb.mxu1 %v4504_v34  ;;  %s405_s13 = sshra.s32 %s404_s10, 3  ;;  %s408_s18 = sand.u32 7, %s404_s10 }
 0x64e   :  { %s3842_s19 = sshll.u32 %s405_s13, 4 }
 0x64f   :  { %1780 = vmatpush.msrb.mxu0 %v4507_v35  ;;  %1800 = vmatpush.msrb.mxu1 %v4510_v0  ;;  %s411_s24 = sadd.s32 %s3842_s19, %s408_s18 }
 0x651   :  { %1781 = vmatpush.msrb.mxu0 %v4513_v1  ;;  %1801 = vmatpush.msrb.mxu1 %v4516_v2 }
 0x653   :  { %1782 = vmatpush.msrb.mxu0 %v4519_v4  ;;  %1802 = vmatpush.msrb.mxu1 %v4522_v5 }
 0x655   :  { %1783 = vmatpush.msrb.mxu0 %v4525_v6  ;;  %1803 = vmatpush.msrb.mxu1 %v4528_v7 }
 0x6c3   :  { %v1334_v9 = vpop.f32.mrf.mxu0  ;;  %v1354_v17 = vpop.f32.mrf.mxu1 }
 0x6c4   :  { %v1357_v10 = vadd.f32 %v1334_v9, %v1310_v8  ;;  %v1358_v18 = vadd.f32 %v1354_v17, %v1311_v15  ;;  %v314_v8 = vadd.f32 %v313_v25, %v302_v24  ;;  %v327_v9 = vld [vmem:[%s326_s3] ss:$8 sm:$0x3]  ;;  %s4619_s3 = sld [smem:[#allocation5 + $0x7]] }
 0x6c6   :  { %v3749_v11 = vmul.f32 -1.442695, %v1357_v10  ;;  %v3750_v50 = vmul.f32 -1.442695, %v1358_v18 }
 0x6c7   :  { %v338_v10 = vld [vmem:[%s337_s4] ss:$8 sm:$0x3]  ;;  %316 = vst.msk [vmem:[#allocation2 + $0x12] ss:$8 sm:$0x3] %vm4309_vm0, %v314_v8 }
 0x6c8   :  { %3966 = vpow2.f32 %v3749_v11  ;;  %v339_v11 = vadd.f32 %v338_v10, %v327_v9  ;;  %s4621_s4 = sld [smem:[#allocation5 + $0x88]] }
 0x6ca   :  { %341 = vst.msk [vmem:[#allocation2 + $0x13] ss:$8 sm:$0x3] %vm4309_vm0, %v339_v11  ;;  %s394_s11 = sshra.s32 %s4619_s3, 3  ;;  %s397_s14 = sand.u32 7, %s4619_s3 }
 0x6cb   :  { %s3841_s16 = sshll.u32 %s394_s11, 4  ;;  %s454_s10 = sadd.s32 56, %s4619_s3 }
 0x6cc   :  { %s400_s23 = sadd.s32 %s3841_s16, %s397_s14  ;;  %s444_s11 = sshra.s32 %s4617_s30, 3 }
 0x6cd   :  { %s455_s13 = sshra.s32 %s454_s10, 3  ;;  %s447_s14 = sand.u32 7, %s4617_s30 }
 0x6ce   :  { %v3967_v12 = vpop.eup %3966  ;;  %s429_s12 = sadd.s32 56, %s4621_s4  ;;  %s469_s15 = sshra.s32 %s4621_s4, 3 }
 0x6cf   :  { %v1362_v14 = vadd.f32 1.0, %v3967_v12  ;;  %s430_s17 = sshra.s32 %s429_s12, 3  ;;  %s433_s21 = sand.u32 7, %s429_s12 }
 0x6d0   :  { %s3844_s22 = sshll.u32 %s430_s17, 4  ;;  %s479_s12 = sadd.s32 56, %s4623_s9 }
 0x6d1   :  { %3968 = vrcp.f32 %v1362_v14  ;;  %v1374_v39 = vand.u32 2147483648, %v1362_v14  ;;  %v1372_v41 = vand.u32 2147483647, %v1362_v14  ;;  %vm1368_vm8 = vweird.f32 %v1362_v14  ;;  %s3845_s16 = sshll.u32 %s444_s11, 4  ;;  %s480_s17 = sshra.s32 %s479_s12, 3 }
 0x6d2   :  { %3970 = vtanh.f32 %v1358_v18  ;;  %s458_s18 = sand.u32 7, %s454_s10  ;;  %s3846_s19 = sshll.u32 %s455_s13, 4 }
 0x6d3   :  { %v1375_v43 = vor.u32 1.1754944e-38, %v1374_v39  ;;  %vm1373_vm12 = vcmp.eq.f32.partialorder %v1372_v41, 8.507059e+37  ;;  %3972 = vpow2.f32 %v3750_v50  ;;  %v1420_v41 = vld [vmem:[#allocation2 + $0x18] sm:$0xc]  ;;  %s472_s1 = sand.u32 7, %s4621_s4  ;;  %s3847_s20 = sshll.u32 %s469_s15, 4 }
 0x6d4   :  { %s504_s4 = sadd.s32 56, %s4574_s6  ;;  %s497_s11 = sand.u32 7, %s4572_s5 }
 0x6d5   :  { %s505_s10 = sshra.s32 %s504_s4, 3  ;;  %s508_s15 = sand.u32 7, %s504_s4 }
 0x6d7   :  { %v3969_v36 = vpop.eup %3968 }
 0x6d8   :  { %v1364_v37 = vmul.f32 %v3969_v36, %v1362_v14  ;;  %vm1369_vm7 = vweird.f32 %v3969_v36  ;;  %v3971_v46 = vpop.eup %3970  ;;  %v1419_v14 = vld [vmem:[#allocation2 + $0x10] sm:$0xc] }
 0x6d9   :  { %vm1370_vm11 = vmor %vm1368_vm8, %vm1369_vm7  ;;  %v3973_v51 = vpop.eup %3972 }
 0x6da   :  { %v1365_v38 = vsub.f32 1.0, %v1364_v37  ;;  %v1382_v52 = vadd.f32 1.0, %v3973_v51 }
 0x6dc   :  { %v1366_v40 = vmul.f32 %v3969_v36, %v1365_v38  ;;  %3974 = vrcp.f32 %v1382_v52  ;;  %v1394_v61 = vand.u32 2147483648, %v1382_v52  ;;  %vm1388_vm14 = vweird.f32 %v1382_v52 }
 0x6dd   :  { %v1392_v3 = vand.u32 2147483647, %v1382_v52 }
 0x6de   :  { %v1367_v42 = vadd.f32 %v3969_v36, %v1366_v40  ;;  %v1395_v59 = vor.u32 1.1754944e-38, %v1394_v61 }
 0x6df   :  { %vm1393_vm1 = vcmp.eq.f32.partialorder %v1392_v3, 8.507059e+37 }
 0x6e0   :  { %v1371_v45 = vsel %vm1370_vm11, %v3969_v36, %v1367_v42 }
 0x6e1   :  { %v1376_v47 = vsel %vm1373_vm12, %v1375_v43, %v1371_v45 }
 0x6e2   :  { %v1402_v48 = vmul.f32 %v3971_v46, %v1376_v47  ;;  %v1401_v49 = vmul.f32 %v1399_v44, %v1376_v47  ;;  %v3975_v54 = vpop.eup %3974 }
 0x6e3   :  { %v1384_v56 = vmul.f32 %v3975_v54, %v1382_v52  ;;  %vm1389_vm13 = vweird.f32 %v3975_v54 }
 0x6e4   :  { %1404 = vrot.lane.b32.xlu2 %v1402_v48, %s5182_s0  ;;  %vm1390_vm15 = vmor %vm1388_vm14, %vm1389_vm13 }
 0x6e5   :  { %v1385_v57 = vsub.f32 1.0, %v1384_v56 }
 0x6e7   :  { %v1386_v58 = vmul.f32 %v3975_v54, %v1385_v57 }
 0x6e9   :  { %v1387_v53 = vadd.f32 %v3975_v54, %v1386_v58 }
 0x6eb   :  { %v1391_v16 = vsel %vm1390_vm15, %v3975_v54, %v1387_v53 }
 0x6ec   :  { %v1396_v22 = vsel %vm1393_vm1, %v1395_v59, %v1391_v16 }
 0x73e   :  { %v1405_v55 = vpop.permute.xlu2 %1404 }
 0x73f   :  { %v4533_v60 = vadd.f32 %v1405_v55, %v1401_v49 }
 0x741   :  { %3976 = vtanh.f32 %v4533_v60  ;;  %v1511_v51 = vrot.slane %v4533_v60, 6 }
 0x747   :  { %v3977_v19 = vpop.eup %3976 }
 0x748   :  { %v4536_v23 = vmul.f32 %v3977_v19, %v1396_v22 }
 0x74a   :  { %1411 = vrot.lane.b32.xlu0 %v4536_v23, %s5182_s0 }
 0x7bc   :  { %v1412_v12 = vpop.permute.xlu0 %1411 }
 0x7bd   :  { %1414 = vst.msk [vmem:[#allocation3 + $0x8] sm:$0x3] %vm959_vm9, %v1412_v12  ;;  %3751 = vmatmul.msk.f32.vlgmr.msrb.gmra.mxu2 %vm861_vm10, %v1412_v12  ;;  %3752 = vmatmul.msk.f32.vlgmr.msrb.gmra.mxu3 %vm861_vm10, %v1412_v12 }
 0x7be   :  { %1882 = vmatpush.msrb.mxu2 %v4483_v26  ;;  %1902 = vmatpush.msrb.mxu3 %v4486_v28 }
 0x7c0   :  { %1883 = vmatpush.msrb.mxu2 %v4489_v29  ;;  %1903 = vmatpush.msrb.mxu3 %v4492_v30 }
 0x7c2   :  { %1884 = vmatpush.msrb.mxu2 %v4495_v31  ;;  %1904 = vmatpush.msrb.mxu3 %v4498_v32 }
 0x7c4   :  { %1885 = vmatpush.msrb.mxu2 %v4501_v33  ;;  %1905 = vmatpush.msrb.mxu3 %v4504_v34 }
 0x7c6   :  { %1886 = vmatpush.msrb.mxu2 %v4507_v35  ;;  %1906 = vmatpush.msrb.mxu3 %v4510_v0 }
 0x7c8   :  { %1887 = vmatpush.msrb.mxu2 %v4513_v1  ;;  %1907 = vmatpush.msrb.mxu3 %v4516_v2 }
 0x7ca   :  { %1888 = vmatpush.msrb.mxu2 %v4519_v4  ;;  %1908 = vmatpush.msrb.mxu3 %v4522_v5 }
 0x7cc   :  { %1889 = vmatpush.msrb.mxu2 %v4525_v6  ;;  %1909 = vmatpush.msrb.mxu3 %v4528_v7 }
 0x840   :  { %v1440_v15 = vpop.f32.mrf.mxu2  ;;  %v1460_v39 = vpop.f32.mrf.mxu3 }
 0x841   :  { %v1465_v17 = vrot.slane %v1440_v15, 6  ;;  %v1466_v40 = vrot.slane %v1460_v39, 6 }
 0x843   :  { %v1469_v36 = vadd.f32 %v1465_v17, %v1419_v14  ;;  %v1470_v43 = vadd.f32 %v1466_v40, %v1420_v41  ;;  %v352_v17 = vld [vmem:[%s351_s26] ss:$8 sm:$0x3]  ;;  %s436_s26 = sadd.s32 %s3844_s22, %s433_s21  ;;  %s483_s21 = sand.u32 7, %s479_s12 }
 0x844   :  { %s3848_s22 = sshll.u32 %s480_s17, 4  ;;  %s519_s12 = sshra.s32 %s4576_s7, 3 }
 0x845   :  { %v3753_v18 = vmul.f32 -1.442695, %v1469_v36  ;;  %v3754_v55 = vmul.f32 -1.442695, %v1470_v43  ;;  %s522_s17 = sand.u32 7, %s4576_s7  ;;  %s3665_s7 = sld [smem:[#allocation5 + $0x5]] }
 0x846   :  { %v363_v36 = vld [vmem:[%s362_s27] ss:$8 sm:$0x3]  ;;  %s401_s27 = scalar_lea.vmem [#allocation8], %s400_s23  ;;  %s450_s23 = sadd.s32 %s3845_s16, %s447_s14 }
 0x847   :  { %3978 = vpow2.f32 %v3753_v18  ;;  %v364_v18 = vadd.f32 %v363_v36, %v352_v17  ;;  %s3850_s16 = sshll.u32 %s505_s10, 4 }
 0x849   :  { %366 = vst.msk [vmem:[#allocation2 + $0x14] ss:$8 sm:$0x3] %vm4309_vm0, %v364_v18 }
 0x84d   :  { %v3979_v37 = vpop.eup %3978 }
 0x84e   :  { %v1474_v38 = vadd.f32 1.0, %v3979_v37  ;;  %v377_v37 = vld [vmem:[%s376_s28] ss:$8 sm:$0x3]  ;;  %s412_s28 = scalar_lea.vmem [#allocation8], %s411_s24  ;;  %s461_s24 = sadd.s32 %s3846_s19, %s458_s18 }
 0x84f   :  { %s462_s3 = scalar_lea.vmem [#allocation8], %s461_s24  ;;  %s3851_s18 = sshll.u32 %s519_s12, 4 }
 0x850   :  { %3980 = vrcp.f32 %v1474_v38  ;;  %v1486_v46 = vand.u32 2147483648, %v1474_v38  ;;  %v1484_v48 = vand.u32 2147483647, %v1474_v38  ;;  %vm1480_vm3 = vweird.f32 %v1474_v38 }
 0x851   :  { %3982 = vtanh.f32 %v1470_v43 }
 0x852   :  { %v1487_v50 = vor.u32 1.1754944e-38, %v1486_v46  ;;  %vm1485_vm5 = vcmp.eq.f32.partialorder %v1484_v48, 8.507059e+37  ;;  %3984 = vpow2.f32 %v3754_v55 }
 0x856   :  { %v3981_v42 = vpop.eup %3980 }
 0x857   :  { %v1476_v44 = vmul.f32 %v3981_v42, %v1474_v38  ;;  %vm1481_vm2 = vweird.f32 %v3981_v42  ;;  %v3983_v54 = vpop.eup %3982  ;;  %v388_v38 = vld [vmem:[%s387_s29] ss:$8 sm:$0x3]  ;;  %s426_s29 = scalar_lea.vmem [#allocation8], %s425_s25  ;;  %s475_s25 = sadd.s32 %s3847_s20, %s472_s1 }
 0x858   :  { %vm1482_vm4 = vmor %vm1480_vm3, %vm1481_vm2  ;;  %v3985_v53 = vpop.eup %3984  ;;  %v389_v39 = vadd.f32 %v388_v38, %v377_v37  ;;  %s476_s9 = scalar_lea.vmem [#allocation8], %s475_s25  ;;  %s3662_s25 = sld [smem:[#allocation5 + $0xa]] }
 0x859   :  { %v1477_v45 = vsub.f32 1.0, %v1476_v44  ;;  %v1494_v61 = vadd.f32 1.0, %v3985_v53 }
 0x85a   :  { %391 = vst.msk [vmem:[#allocation2 + $0x15] ss:$8 sm:$0x3] %vm4309_vm0, %v389_v39 }
 0x85b   :  { %v1478_v47 = vmul.f32 %v3981_v42, %v1477_v45  ;;  %3986 = vrcp.f32 %v1494_v61  ;;  %v1506_v25 = vand.u32 2147483648, %v1494_v61  ;;  %vm1500_vm7 = vweird.f32 %v1494_v61 }
 0x85c   :  { %v1504_v8 = vand.u32 2147483647, %v1494_v61 }
 0x85d   :  { %v1479_v49 = vadd.f32 %v3981_v42, %v1478_v47  ;;  %v1507_v10 = vor.u32 1.1754944e-38, %v1506_v25 }
 0x85e   :  { %vm1505_vm11 = vcmp.eq.f32.partialorder %v1504_v8, 8.507059e+37 }
 0x85f   :  { %v1483_v52 = vsel %vm1482_vm4, %v3981_v42, %v1479_v49 }
 0x860   :  { %v1488_v56 = vsel %vm1485_vm5, %v1487_v50, %v1483_v52 }
 0x861   :  { %v1514_v57 = vmul.f32 %v3983_v54, %v1488_v56  ;;  %v1513_v58 = vmul.f32 %v1511_v51, %v1488_v56  ;;  %v3987_v3 = vpop.eup %3986  ;;  %v1531_v41 = vld [vmem:[#allocation2 + $0x10] sm:$0x30]  ;;  %v1532_v50 = vld [vmem:[#allocation2 + $0x18] sm:$0x30] }
 0x862   :  { %v1496_v16 = vmul.f32 %v3987_v3, %v1494_v61  ;;  %vm1501_vm6 = vweird.f32 %v3987_v3 }
 0x863   :  { %1516 = vrot.lane.b32.xlu1 %v1514_v57, %s5182_s0  ;;  %vm1502_vm8 = vmor %vm1500_vm7, %vm1501_vm6 }
 0x864   :  { %v1497_v59 = vsub.f32 1.0, %v1496_v16 }
 0x866   :  { %v1498_v19 = vmul.f32 %v3987_v3, %v1497_v59 }
 0x868   :  { %v1499_v60 = vadd.f32 %v3987_v3, %v1498_v19 }
 0x86a   :  { %v1503_v9 = vsel %vm1502_vm8, %v3987_v3, %v1499_v60 }
 0x86b   :  { %v1508_v12 = vsel %vm1505_vm11, %v1507_v10, %v1503_v9 }
 0x8d5   :  { %v1517_v22 = vpop.permute.xlu1 %1516 }
 0x8d6   :  { %v4565_v24 = vadd.f32 %v1517_v22, %v1513_v58 }
 0x8d8   :  { %3988 = vtanh.f32 %v4565_v24  ;;  %v1626_v3 = vrot.slane %v4565_v24, 6 }
 0x8de   :  { %v3989_v11 = vpop.eup %3988 }
 0x8df   :  { %v4568_v14 = vmul.f32 %v3989_v11, %v1508_v12 }
 0x8e1   :  { %v1533_v15 = vrot.slane %v4568_v14, 2 }
 0x8e3   :  { %1534 = vrot.lane.b32.xlu2 %v1533_v15, %s5182_s0 }
 0x93d   :  { %v1535_v40 = vpop.permute.xlu2 %1534 }
 0x93e   :  { %3755 = vmatmul.msk.f32.vlgmr.msra.gmra.mxu0 %vm861_vm10, %v1535_v40  ;;  %3756 = vmatmul.msk.f32.vlgmr.msra.gmra.mxu1 %vm861_vm10, %v1535_v40 }
 0x93f   :  { %1997 = vmatpush.msra.mxu0 %v4483_v26  ;;  %2017 = vmatpush.msra.mxu1 %v4486_v28 }
 0x941   :  { %1998 = vmatpush.msra.mxu0 %v4489_v29  ;;  %2018 = vmatpush.msra.mxu1 %v4492_v30 }
 0x943   :  { %1999 = vmatpush.msra.mxu0 %v4495_v31  ;;  %2019 = vmatpush.msra.mxu1 %v4498_v32 }
 0x945   :  { %2000 = vmatpush.msra.mxu0 %v4501_v33  ;;  %2020 = vmatpush.msra.mxu1 %v4504_v34 }
 0x947   :  { %2001 = vmatpush.msra.mxu0 %v4507_v35  ;;  %2021 = vmatpush.msra.mxu1 %v4510_v0 }
 0x949   :  { %2002 = vmatpush.msra.mxu0 %v4513_v1  ;;  %2022 = vmatpush.msra.mxu1 %v4516_v2 }
 0x94b   :  { %2003 = vmatpush.msra.mxu0 %v4519_v4  ;;  %2023 = vmatpush.msra.mxu1 %v4522_v5 }
 0x94d   :  { %2004 = vmatpush.msra.mxu0 %v4525_v6  ;;  %2024 = vmatpush.msra.mxu1 %v4528_v7 }
 0x9bb   :  { %v1555_v42 = vpop.f32.mrf.mxu0  ;;  %v1575_v48 = vpop.f32.mrf.mxu1 }
 0x9bc   :  { %v1580_v43 = vrot.slane %v1555_v42, 4  ;;  %v1581_v49 = vrot.slane %v1575_v48, 4 }
 0x9be   :  { %v1584_v44 = vadd.f32 %v1580_v43, %v1531_v41  ;;  %v1585_v52 = vadd.f32 %v1581_v49, %v1532_v50 }
 0x9c0   :  { %v3757_v45 = vmul.f32 -1.442695, %v1584_v44  ;;  %v3758_v25 = vmul.f32 -1.442695, %v1585_v52 }
 0x9c1   :  { %v402_v44 = vld [vmem:[%s401_s27] ss:$8 sm:$0x3]  ;;  %s451_s27 = scalar_lea.vmem [#allocation8], %s450_s23 }
 0x9c2   :  { %3990 = vpow2.f32 %v3757_v45  ;;  %v413_v45 = vld [vmem:[%s412_s28] ss:$8 sm:$0x3]  ;;  %s494_s28 = sshra.s32 %s4572_s5, 3 }
 0x9c3   :  { %s3849_s13 = sshll.u32 %s494_s28, 4  ;;  %s547_s28 = sand.u32 7, %s3662_s25 }
 0x9c4   :  { %s500_s20 = sadd.s32 %s3849_s13, %s497_s11 }
 0x9c5   :  { %s501_s24 = scalar_lea.vmem [#allocation8], %s500_s20 }
 0x9c8   :  { %v3991_v46 = vpop.eup %3990 }
 0x9c9   :  { %v1589_v47 = vadd.f32 1.0, %v3991_v46  ;;  %v414_v46 = vadd.f32 %v413_v45, %v402_v44 }
 0x9cb   :  { %3992 = vrcp.f32 %v1589_v47  ;;  %v1601_v57 = vand.u32 2147483648, %v1589_v47  ;;  %v1599_v55 = vand.u32 2147483647, %v1589_v47  ;;  %vm1595_vm13 = vweird.f32 %v1589_v47  ;;  %416 = vst.msk [vmem:[#allocation2 + $0x16] ss:$8 sm:$0x3] %vm4309_vm0, %v414_v46 }
 0x9cc   :  { %3994 = vtanh.f32 %v1585_v52 }
 0x9cd   :  { %v1602_v61 = vor.u32 1.1754944e-38, %v1601_v57  ;;  %vm1600_vm15 = vcmp.eq.f32.partialorder %v1599_v55, 8.507059e+37  ;;  %3996 = vpow2.f32 %v3758_v25 }
 0x9d1   :  { %v3993_v51 = vpop.eup %3992 }
 0x9d2   :  { %v1591_v54 = vmul.f32 %v3993_v51, %v1589_v47  ;;  %vm1596_vm12 = vweird.f32 %v3993_v51  ;;  %v3995_v59 = vpop.eup %3994  ;;  %v427_v47 = vld [vmem:[%s426_s29] ss:$8 sm:$0x3]  ;;  %s529_s29 = sadd.s32 56, %s4578_s8 }
 0x9d3   :  { %vm1597_vm14 = vmor %vm1595_vm13, %vm1596_vm12  ;;  %v3997_v8 = vpop.eup %3996  ;;  %s530_s14 = sshra.s32 %s529_s29, 3  ;;  %s533_s19 = sand.u32 7, %s529_s29 }
 0x9d4   :  { %v1592_v56 = vsub.f32 1.0, %v1591_v54  ;;  %v1609_v9 = vadd.f32 1.0, %v3997_v8  ;;  %s3852_s1 = sshll.u32 %s530_s14, 4 }
 0x9d5   :  { %s536_s23 = sadd.s32 %s3852_s1, %s533_s19 }
 0x9d6   :  { %v1593_v58 = vmul.f32 %v3993_v51, %v1592_v56  ;;  %3998 = vrcp.f32 %v1609_v9  ;;  %v1621_v18 = vand.u32 2147483648, %v1609_v9  ;;  %vm1615_vm2 = vweird.f32 %v1609_v9  ;;  %s537_s5 = scalar_lea.vmem [#allocation8], %s536_s23 }
 0x9d7   :  { %v1619_v37 = vand.u32 2147483647, %v1609_v9 }
 0x9d8   :  { %v1594_v53 = vadd.f32 %v3993_v51, %v1593_v58  ;;  %v1622_v39 = vor.u32 1.1754944e-38, %v1621_v18 }
 0x9d9   :  { %vm1620_vm4 = vcmp.eq.f32.partialorder %v1619_v37, 8.507059e+37 }
 0x9da   :  { %v1598_v16 = vsel %vm1597_vm14, %v3993_v51, %v1594_v53 }
 0x9db   :  { %v1603_v19 = vsel %vm1600_vm15, %v1602_v61, %v1598_v16 }
 0x9dc   :  { %v1629_v22 = vmul.f32 %v3995_v59, %v1603_v19  ;;  %v1628_v60 = vmul.f32 %v1626_v3, %v1603_v19  ;;  %v3999_v10 = vpop.eup %3998 }
 0x9dd   :  { %v1611_v11 = vmul.f32 %v3999_v10, %v1609_v9  ;;  %vm1616_vm1 = vweird.f32 %v3999_v10 }
 0x9de   :  { %1631 = vrot.lane.b32.xlu0 %v1629_v22, %s5182_s0  ;;  %vm1617_vm3 = vmor %vm1615_vm2, %vm1616_vm1 }
 0x9df   :  { %v1612_v12 = vsub.f32 1.0, %v1611_v11 }
 0x9e1   :  { %v1613_v15 = vmul.f32 %v3999_v10, %v1612_v12 }
 0x9e3   :  { %v1614_v24 = vadd.f32 %v3999_v10, %v1613_v15 }
 0x9e5   :  { %v1618_v38 = vsel %vm1617_vm3, %v3999_v10, %v1614_v24 }
 0x9e6   :  { %v1623_v41 = vsel %vm1620_vm4, %v1622_v39, %v1618_v38 }
 0xa50   :  { %v1632_v17 = vpop.permute.xlu0 %1631 }
 0xa51   :  { %v4610_v36 = vadd.f32 %v1632_v17, %v1628_v60 }
 0xa53   :  { %4000 = vtanh.f32 %v4610_v36  ;;  %v1741_v11 = vrot.slane %v4610_v36, 6 }
 0xa59   :  { %v4001_v40 = vpop.eup %4000 }
 0xa5a   :  { %v4613_v42 = vmul.f32 %v4001_v40, %v1623_v41 }
 0xa5c   :  { %v1648_v43 = vrot.slane %v4613_v42, 4 }
 0xa5e   :  { %1649 = vrot.lane.b32.xlu1 %v1648_v43, %s5182_s0  ;;  %s437_s0 = scalar_lea.vmem [#allocation8], %s436_s26  ;;  %s486_s26 = sadd.s32 %s3848_s22, %s483_s21 }
 0xa5f   :  { %v438_v48 = vld [vmem:[%s437_s0] ss:$8 sm:$0x3]  ;;  %s5186_s0 = smov 64   ;;  %s487_s30 = scalar_lea.vmem [#allocation8], %s486_s26 }
 0xa60   :  { %v439_v49 = vadd.f32 %v438_v48, %v427_v47  ;;  %s511_s21 = sadd.s32 %s3850_s16, %s508_s15  ;;  %s525_s22 = sadd.s32 %s3851_s18, %s522_s17 }
 0xa61   :  { %s512_s6 = scalar_lea.vmem [#allocation8], %s511_s21  ;;  %s526_s8 = scalar_lea.vmem [#allocation8], %s525_s22 }
 0xa62   :  { %441 = vst.msk [vmem:[#allocation2 + $0x17] ss:$8 sm:$0x3] %vm4309_vm0, %v439_v49  ;;  %s3671_s26 = sld [smem:[#allocation5 + $0x85]] }
 0xa69   :  { %v1646_v51 = vld [vmem:[#allocation2 + $0x10] sm:$0xc0]  ;;  %v1647_v3 = vld [vmem:[#allocation2 + $0x18] sm:$0xc0] }
 0xad0   :  { %v1650_v50 = vpop.permute.xlu1 %1649 }
 0xad1   :  { %3759 = vmatmul.msk.f32.vlgmr.msra.gmra.mxu2 %vm861_vm10, %v1650_v50  ;;  %3760 = vmatmul.msk.f32.vlgmr.msra.gmra.mxu3 %vm861_vm10, %v1650_v50 }
 0xad2   :  { %2112 = vmatpush.msra.mxu2 %v4483_v26  ;;  %2132 = vmatpush.msra.mxu3 %v4486_v28 }
 0xad4   :  { %2113 = vmatpush.msra.mxu2 %v4489_v29  ;;  %2133 = vmatpush.msra.mxu3 %v4492_v30 }
 0xad6   :  { %2114 = vmatpush.msra.mxu2 %v4495_v31  ;;  %2134 = vmatpush.msra.mxu3 %v4498_v32 }
 0xad8   :  { %2115 = vmatpush.msra.mxu2 %v4501_v33  ;;  %2135 = vmatpush.msra.mxu3 %v4504_v34 }
 0xada   :  { %2116 = vmatpush.msra.mxu2 %v4507_v35  ;;  %2136 = vmatpush.msra.mxu3 %v4510_v0 }
 0xadc   :  { %2117 = vmatpush.msra.mxu2 %v4513_v1  ;;  %2137 = vmatpush.msra.mxu3 %v4516_v2 }
 0xade   :  { %2118 = vmatpush.msra.mxu2 %v4519_v4  ;;  %2138 = vmatpush.msra.mxu3 %v4522_v5 }
 0xae0   :  { %2119 = vmatpush.msra.mxu2 %v4525_v6  ;;  %2139 = vmatpush.msra.mxu3 %v4528_v7 }
 0xb54   :  { %v1670_v52 = vpop.f32.mrf.mxu2  ;;  %v1690_v53 = vpop.f32.mrf.mxu3 }
 0xb55   :  { %v1695_v54 = vrot.slane %v1670_v52, 2  ;;  %v1696_v61 = vrot.slane %v1690_v53, 2  ;;  %v477_v53 = vld [vmem:[%s476_s9] ss:$8 sm:$0x3]  ;;  %s544_s9 = sshra.s32 %s3662_s25, 3 }
 0xb56   :  { %s3853_s10 = sshll.u32 %s544_s9, 4 }
 0xb57   :  { %v1699_v56 = vadd.f32 %v1695_v54, %v1646_v51  ;;  %v1700_v59 = vadd.f32 %v1696_v61, %v1647_v3  ;;  %v488_v61 = vld [vmem:[%s487_s30] ss:$8 sm:$0x3]  ;;  %s579_s30 = sadd.s32 56, %s3671_s26  ;;  %s550_s18 = sadd.s32 %s3853_s10, %s547_s28 }
 0xb58   :  { %v489_v3 = vadd.f32 %v488_v61, %v477_v53  ;;  %v4721_v53 = vld [vmem:[#allocation8 + $0x148] sm:$0xff]  ;;  %v4724_v61 = vld [vmem:[#allocation8 + $0x130] sm:$0xff]  ;;  %s580_s11 = sshra.s32 %s579_s30, 3  ;;  %s583_s16 = sand.u32 7, %s579_s30 }
 0xb59   :  { %v3761_v57 = vmul.f32 -1.442695, %v1699_v56  ;;  %v3762_v37 = vmul.f32 -1.442695, %v1700_v59  ;;  %s3856_s17 = sshll.u32 %s580_s11, 4  ;;  %s551_s21 = scalar_lea.vmem [#allocation8], %s550_s18 }
 0xb5a   :  { %491 = vst.msk [vmem:[#allocation2 + $0x21] ss:$8 sm:$0x3] %vm4309_vm0, %v489_v3  ;;  %v4727_v3 = vld [vmem:[#allocation8 + $0x138] sm:$0xff]  ;;  %s586_s20 = sadd.s32 %s3856_s17, %s583_s16 }
 0xb5b   :  { %4002 = vpow2.f32 %v3761_v57  ;;  %v452_v57 = vld [vmem:[%s451_s27] ss:$8 sm:$0x3]  ;;  %s3668_s27 = sld [smem:[#allocation5 + $0x8a]] }
 0xb61   :  { %v4003_v58 = vpop.eup %4002  ;;  %s569_s29 = sshra.s32 %s3668_s27, 3  ;;  %s572_s14 = sand.u32 7, %s3668_s27 }
 0xb62   :  { %v1704_v55 = vadd.f32 1.0, %v4003_v58  ;;  %v463_v58 = vld [vmem:[%s462_s3] ss:$8 sm:$0x3]  ;;  %s554_s3 = sadd.s32 56, %s3665_s7  ;;  %s3855_s15 = sshll.u32 %s569_s29, 4 }
 0xb63   :  { %s555_s4 = sshra.s32 %s554_s3, 3  ;;  %s558_s12 = sand.u32 7, %s554_s3 }
 0xb64   :  { %4004 = vrcp.f32 %v1704_v55  ;;  %v1716_v60 = vand.u32 2147483648, %v1704_v55  ;;  %v1714_v8 = vand.u32 2147483647, %v1704_v55  ;;  %vm1710_vm6 = vweird.f32 %v1704_v55  ;;  %s3854_s13 = sshll.u32 %s555_s4, 4  ;;  %s575_s1 = sadd.s32 %s3855_s15, %s572_s14 }
 0xb65   :  { %4006 = vtanh.f32 %v1700_v59  ;;  %s561_s19 = sadd.s32 %s3854_s13, %s558_s12  ;;  %s576_s23 = scalar_lea.vmem [#allocation8], %s575_s1 }
 0xb66   :  { %v1717_v10 = vor.u32 1.1754944e-38, %v1716_v60  ;;  %vm1715_vm8 = vcmp.eq.f32.partialorder %v1714_v8, 8.507059e+37  ;;  %4008 = vpow2.f32 %v3762_v37  ;;  %s562_s22 = scalar_lea.vmem [#allocation8], %s561_s19  ;;  %s3680_s7 = sld [smem:[#allocation5 + $0x8b]] }
 0xb6a   :  { %v4005_v16 = vpop.eup %4004 }
 0xb6b   :  { %v1706_v19 = vmul.f32 %v4005_v16, %v1704_v55  ;;  %vm1711_vm5 = vweird.f32 %v4005_v16  ;;  %v4007_v15 = vpop.eup %4006  ;;  %v464_v55 = vadd.f32 %v463_v58, %v452_v57  ;;  %v4712_v57 = vld [vmem:[#allocation8 + $0x150] sm:$0xff]  ;;  %v4715_v58 = vld [vmem:[#allocation8 + $0x158] sm:$0xff] }
 0xb6c   :  { %vm1712_vm7 = vmor %vm1710_vm6, %vm1711_vm5  ;;  %v4009_v38 = vpop.eup %4008  ;;  %s619_s30 = sshra.s32 %s3680_s7, 3  ;;  %s622_s11 = sand.u32 7, %s3680_s7 }
 0xb6d   :  { %v1707_v22 = vsub.f32 1.0, %v1706_v19  ;;  %v1724_v39 = vadd.f32 1.0, %v4009_v38  ;;  %466 = vst.msk [vmem:[#allocation2 + $0x20] ss:$8 sm:$0x3] %vm4309_vm0, %v464_v55  ;;  %v4718_v55 = vld [vmem:[#allocation8 + $0x140] sm:$0xff] }
 0xb6e   :  { %s3859_s12 = sshll.u32 %s619_s30, 4 }
 0xb6f   :  { %v1708_v25 = vmul.f32 %v4005_v16, %v1707_v22  ;;  %4010 = vrcp.f32 %v1724_v39  ;;  %v1736_v47 = vand.u32 2147483648, %v1724_v39  ;;  %vm1730_vm12 = vweird.f32 %v1724_v39  ;;  %s625_s17 = sadd.s32 %s3859_s12, %s622_s11 }
 0xb70   :  { %v1734_v48 = vand.u32 2147483647, %v1724_v39 }
 0xb71   :  { %v1709_v9 = vadd.f32 %v4005_v16, %v1708_v25  ;;  %v1737_v50 = vor.u32 1.1754944e-38, %v1736_v47  ;;  %v502_v47 = vld [vmem:[%s501_s24] ss:$8 sm:$0x3]  ;;  %s587_s24 = scalar_lea.vmem [#allocation8], %s586_s20  ;;  %s626_s20 = scalar_lea.vmem [#allocation8], %s625_s17 }
 0xb72   :  { %vm1735_vm14 = vcmp.eq.f32.partialorder %v1734_v48, 8.507059e+37  ;;  %v513_v48 = vld [vmem:[%s512_s6] ss:$8 sm:$0x3]  ;;  %s3677_s6 = sld [smem:[#allocation5 + $0x4]] }
 0xb73   :  { %v1713_v12 = vsel %vm1712_vm7, %v4005_v16, %v1709_v9 }
 0xb74   :  { %v1718_v17 = vsel %vm1715_vm8, %v1717_v10, %v1713_v12 }
 0xb75   :  { %v1744_v24 = vmul.f32 %v4007_v15, %v1718_v17  ;;  %v1743_v18 = vmul.f32 %v1741_v11, %v1718_v17  ;;  %v4011_v40 = vpop.eup %4010 }
 0xb76   :  { %v1726_v41 = vmul.f32 %v4011_v40, %v1724_v39  ;;  %vm1731_vm11 = vweird.f32 %v4011_v40 }
 0xb77   :  { %1746 = vrot.lane.b32.xlu2 %v1744_v24, %s5186_s0  ;;  %vm1732_vm13 = vmor %vm1730_vm12, %vm1731_vm11 }
 0xb78   :  { %v1727_v43 = vsub.f32 1.0, %v1726_v41  ;;  %s604_s25 = sadd.s32 56, %s3677_s6  ;;  %s3692_s6 = sld [smem:[#allocation5 + $0x8c]] }
 0xb79   :  { %s605_s3 = sshra.s32 %s604_s25, 3  ;;  %s608_s29 = sand.u32 7, %s604_s25 }
 0xb7a   :  { %v1728_v44 = vmul.f32 %v4011_v40, %v1727_v43  ;;  %s3858_s10 = sshll.u32 %s605_s3, 4 }
 0xb7b   :  { %s611_s16 = sadd.s32 %s3858_s10, %s608_s29 }
 0xb7c   :  { %v1729_v36 = vadd.f32 %v4011_v40, %v1728_v44  ;;  %s612_s1 = scalar_lea.vmem [#allocation8], %s611_s16 }
 0xb7e   :  { %v1733_v49 = vsel %vm1732_vm13, %v4011_v40, %v1729_v36 }
 0xb7f   :  { %v1738_v52 = vsel %vm1735_vm14, %v1737_v50, %v1733_v49  ;;  %v514_v49 = vadd.f32 %v513_v48, %v502_v47  ;;  %v527_v50 = vld [vmem:[%s526_s8] ss:$8 sm:$0x3]  ;;  %s3674_s8 = sld [smem:[#allocation5 + $0xb]] }
 0xb81   :  { %516 = vst.msk [vmem:[#allocation2 + $0x22] ss:$8 sm:$0x3] %vm4309_vm0, %v514_v49 }
 0xb85   :  { %s594_s26 = sshra.s32 %s3674_s8, 3  ;;  %s597_s9 = sand.u32 7, %s3674_s8 }
 0xb86   :  { %s3857_s4 = sshll.u32 %s594_s26, 4 }
 0xb87   :  { %s600_s15 = sadd.s32 %s3857_s4, %s597_s9 }
 0xb88   :  { %s601_s19 = scalar_lea.vmem [#allocation8], %s600_s15 }
 0xbd1   :  { %v1747_v45 = vpop.permute.xlu2 %1746 }
 0xbd2   :  { %v4655_v46 = vadd.f32 %v1747_v45, %v1743_v18 }
 0xbd4   :  { %4012 = vtanh.f32 %v4655_v46  ;;  %v1850_v19 = vrot.slane %v4655_v46, 6 }
 0xbda   :  { %v4013_v51 = vpop.eup %4012 }
 0xbdb   :  { %v4658_v54 = vmul.f32 %v4013_v51, %v1738_v52  ;;  %v538_v51 = vld [vmem:[%s537_s5] ss:$8 sm:$0x3]  ;;  %s3683_s5 = sld [smem:[#allocation5 + $0x84]] }
 0xbdc   :  { %v539_v52 = vadd.f32 %v538_v51, %v527_v50 }
 0xbdd   :  { %v1763_v56 = vrot.slane %v4658_v54, 6 }
 0xbde   :  { %541 = vst.msk [vmem:[#allocation2 + $0x23] ss:$8 sm:$0x3] %vm4309_vm0, %v539_v52 }
 0xbdf   :  { %1764 = vrot.lane.b32.xlu0 %v1763_v56, %s5186_s0 }
 0xbe1   :  { %s629_s27 = sadd.s32 56, %s3683_s5 }
 0xbe2   :  { %s630_s28 = sshra.s32 %s629_s27, 3  ;;  %s633_s13 = sand.u32 7, %s629_s27 }
 0xbe3   :  { %s3860_s14 = sshll.u32 %s630_s28, 4  ;;  %s669_s27 = sshra.s32 %s3692_s6, 3 }
 0xbe4   :  { %s636_s18 = sadd.s32 %s3860_s14, %s633_s13  ;;  %s672_s28 = sand.u32 7, %s3692_s6 }
 0xbe5   :  { %s3863_s29 = sshll.u32 %s669_s27, 4 }
 0xbe6   :  { %s675_s14 = sadd.s32 %s3863_s29, %s672_s28 }
 0xc51   :  { %v1765_v16 = vpop.permute.xlu0 %1764 }
 0xc52   :  { %3763 = vmatmul.msk.f32.vlgmr.msrb.gmra.mxu0 %vm861_vm10, %v1765_v16  ;;  %3764 = vmatmul.msk.f32.vlgmr.msrb.gmra.mxu1 %vm861_vm10, %v1765_v16  ;;  %v4730_v16 = vld [vmem:[#allocation8 + $0x120] sm:$0xff] }
 0xc53   :  { %2227 = vmatpush.msrb.mxu0 %v4483_v26  ;;  %2247 = vmatpush.msrb.mxu1 %v4486_v28  ;;  %v1761_v26 = vld [vmem:[#allocation2 + $0x20] sm:$0x3] }
 0xc55   :  { %2228 = vmatpush.msrb.mxu0 %v4489_v29  ;;  %2248 = vmatpush.msrb.mxu1 %v4492_v30 }
 0xc57   :  { %2229 = vmatpush.msrb.mxu0 %v4495_v31  ;;  %2249 = vmatpush.msrb.mxu1 %v4498_v32 }
 0xc59   :  { %2230 = vmatpush.msrb.mxu0 %v4501_v33  ;;  %2250 = vmatpush.msrb.mxu1 %v4504_v34  ;;  %v1762_v33 = vld [vmem:[#allocation2 + $0x28] sm:$0x3] }
 0xc5b   :  { %2231 = vmatpush.msrb.mxu0 %v4507_v35  ;;  %2251 = vmatpush.msrb.mxu1 %v4510_v0 }
 0xc5d   :  { %2232 = vmatpush.msrb.mxu0 %v4513_v1  ;;  %2252 = vmatpush.msrb.mxu1 %v4516_v2 }
 0xc5f   :  { %2233 = vmatpush.msrb.mxu0 %v4519_v4  ;;  %2253 = vmatpush.msrb.mxu1 %v4522_v5 }
 0xc61   :  { %2234 = vmatpush.msrb.mxu0 %v4525_v6  ;;  %2254 = vmatpush.msrb.mxu1 %v4528_v7 }
 0xccf   :  { %v1785_v28 = vpop.f32.mrf.mxu0  ;;  %v1805_v34 = vpop.f32.mrf.mxu1 }
 0xcd0   :  { %v1808_v29 = vadd.f32 %v1785_v28, %v1761_v26  ;;  %v1809_v0 = vadd.f32 %v1805_v34, %v1762_v33  ;;  %v4733_v26 = vld [vmem:[#allocation8 + $0x128] sm:$0xff]  ;;  %v4736_v28 = vld [vmem:[#allocation8 + $0x110] sm:$0xff]  ;;  %v4751_v33 = vld [vmem:[#allocation8 + $0xf8] sm:$0xff] }
 0xcd1   :  { %v4754_v34 = vld [vmem:[#allocation8 + $0xe0] sm:$0xff] }
 0xcd2   :  { %v3765_v30 = vmul.f32 -1.442695, %v1808_v29  ;;  %v3766_v10 = vmul.f32 -1.442695, %v1809_v0  ;;  %v4739_v29 = vld [vmem:[#allocation8 + $0x118] sm:$0xff] }
 0xcd4   :  { %4014 = vpow2.f32 %v3765_v30  ;;  %v4742_v30 = vld [vmem:[#allocation8 + $0x100] sm:$0xff] }
 0xcda   :  { %v4015_v31 = vpop.eup %4014 }
 0xcdb   :  { %v1813_v32 = vadd.f32 1.0, %v4015_v31  ;;  %v4745_v31 = vld [vmem:[#allocation8 + $0x108] sm:$0xff] }
 0xcdd   :  { %4016 = vrcp.f32 %v1813_v32  ;;  %v1825_v4 = vand.u32 2147483648, %v1813_v32  ;;  %v1823_v6 = vand.u32 2147483647, %v1813_v32  ;;  %vm1819_vm1 = vweird.f32 %v1813_v32 }
 0xcde   :  { %4018 = vtanh.f32 %v1809_v0  ;;  %v1870_v0 = vld [vmem:[#allocation2 + $0x20] sm:$0xc] }
 0xcdf   :  { %v1826_v59 = vor.u32 1.1754944e-38, %v1825_v4  ;;  %vm1824_vm3 = vcmp.eq.f32.partialorder %v1823_v6, 8.507059e+37  ;;  %4020 = vpow2.f32 %v3766_v10 }
 0xce3   :  { %v4017_v35 = vpop.eup %4016 }
 0xce4   :  { %v1815_v1 = vmul.f32 %v4017_v35, %v1813_v32  ;;  %vm1820_vm15 = vweird.f32 %v4017_v35  ;;  %v4019_v60 = vpop.eup %4018  ;;  %v4748_v32 = vld [vmem:[#allocation8 + $0xf0] sm:$0xff] }
 0xce5   :  { %vm1821_vm2 = vmor %vm1819_vm1, %vm1820_vm15  ;;  %v4021_v11 = vpop.eup %4020 }
 0xce6   :  { %v1816_v2 = vsub.f32 1.0, %v1815_v1  ;;  %v1833_v12 = vadd.f32 1.0, %v4021_v11 }
 0xce8   :  { %v1817_v5 = vmul.f32 %v4017_v35, %v1816_v2  ;;  %4022 = vrcp.f32 %v1833_v12  ;;  %v1845_v40 = vand.u32 2147483648, %v1833_v12  ;;  %vm1839_vm5 = vweird.f32 %v1833_v12 }
 0xce9   :  { %v1843_v41 = vand.u32 2147483647, %v1833_v12 }
 0xcea   :  { %v1818_v7 = vadd.f32 %v4017_v35, %v1817_v5  ;;  %v1846_v44 = vor.u32 1.1754944e-38, %v1845_v40 }
 0xceb   :  { %vm1844_vm7 = vcmp.eq.f32.partialorder %v1843_v41, 8.507059e+37 }
 0xcec   :  { %v1822_v22 = vsel %vm1821_vm2, %v4017_v35, %v1818_v7  ;;  %v4757_v35 = vld [vmem:[#allocation8 + $0xe8] sm:$0xff] }
 0xced   :  { %v1827_v25 = vsel %vm1824_vm3, %v1826_v59, %v1822_v22  ;;  %v1871_v22 = vld [vmem:[#allocation2 + $0x28] sm:$0xc] }
 0xcee   :  { %v1853_v8 = vmul.f32 %v4019_v60, %v1827_v25  ;;  %v1852_v9 = vmul.f32 %v1850_v19, %v1827_v25  ;;  %v4023_v15 = vpop.eup %4022 }
 0xcef   :  { %v1835_v17 = vmul.f32 %v4023_v15, %v1833_v12  ;;  %vm1840_vm4 = vweird.f32 %v4023_v15 }
 0xcf0   :  { %1855 = vrot.lane.b32.xlu1 %v1853_v8, %s5186_s0  ;;  %vm1841_vm6 = vmor %vm1839_vm5, %vm1840_vm4 }
 0xcf1   :  { %v1836_v24 = vsub.f32 1.0, %v1835_v17 }
 0xcf3   :  { %v1837_v18 = vmul.f32 %v4023_v15, %v1836_v24 }
 0xcf5   :  { %v1838_v39 = vadd.f32 %v4023_v15, %v1837_v18 }
 0xcf7   :  { %v1842_v43 = vsel %vm1841_vm6, %v4023_v15, %v1838_v39 }
 0xcf8   :  { %v1847_v46 = vsel %vm1844_vm7, %v1846_v44, %v1842_v43 }
 0xd62   :  { %v1856_v37 = vpop.permute.xlu1 %1855 }
 0xd63   :  { %v4692_v38 = vadd.f32 %v1856_v37, %v1852_v9 }
 0xd65   :  { %4024 = vtanh.f32 %v4692_v38  ;;  %v1962_v24 = vrot.slane %v4692_v38, 6 }
 0xd6b   :  { %v4025_v45 = vpop.eup %4024 }
 0xd6c   :  { %v4695_v36 = vmul.f32 %v4025_v45, %v1847_v46 }
 0xd6e   :  { %1862 = vrot.lane.b32.xlu2 %v4695_v36, %s5186_s0 }
 0xdc8   :  { %v1863_v56 = vpop.permute.xlu2 %1862 }
 0xdc9   :  { %1865 = vst.msk [vmem:[#allocation3 + $0x10] sm:$0x3] %vm959_vm9, %v1863_v56  ;;  %3767 = vmatmul.msk.f32.vlgmr.msrb.gmra.mxu2 %vm861_vm10, %v1863_v56  ;;  %3768 = vmatmul.msk.f32.vlgmr.msrb.gmra.mxu3 %vm861_vm10, %v1863_v56 }
 0xdca   :  { %2333 = vmatpush.msrb.mxu2 %v4712_v57  ;;  %2353 = vmatpush.msrb.mxu3 %v4715_v58 }
 0xdcc   :  { %2334 = vmatpush.msrb.mxu2 %v4718_v55  ;;  %2354 = vmatpush.msrb.mxu3 %v4721_v53 }
 0xdce   :  { %2335 = vmatpush.msrb.mxu2 %v4724_v61  ;;  %2355 = vmatpush.msrb.mxu3 %v4727_v3 }
 0xdd0   :  { %2336 = vmatpush.msrb.mxu2 %v4730_v16  ;;  %2356 = vmatpush.msrb.mxu3 %v4733_v26 }
 0xdd2   :  { %2337 = vmatpush.msrb.mxu2 %v4736_v28  ;;  %2357 = vmatpush.msrb.mxu3 %v4739_v29 }
 0xdd4   :  { %2338 = vmatpush.msrb.mxu2 %v4742_v30  ;;  %2358 = vmatpush.msrb.mxu3 %v4745_v31 }
 0xdd6   :  { %2339 = vmatpush.msrb.mxu2 %v4748_v32  ;;  %2359 = vmatpush.msrb.mxu3 %v4751_v33 }
 0xdd8   :  { %2340 = vmatpush.msrb.mxu2 %v4754_v34  ;;  %2360 = vmatpush.msrb.mxu3 %v4757_v35 }
 0xe4c   :  { %v1891_v1 = vpop.f32.mrf.mxu2  ;;  %v1911_v59 = vpop.f32.mrf.mxu3 }
 0xe4d   :  { %v1916_v2 = vrot.slane %v1891_v1, 6  ;;  %v1917_v19 = vrot.slane %v1911_v59, 6  ;;  %v563_v59 = vld [vmem:[%s562_s22] ss:$8 sm:$0x3]  ;;  %s3689_s22 = sld [smem:[#allocation5 + $0x3]] }
 0xe4f   :  { %v1920_v4 = vadd.f32 %v1916_v2, %v1870_v0  ;;  %v1921_v25 = vadd.f32 %v1917_v19, %v1871_v22  ;;  %v577_v22 = vld [vmem:[%s576_s23] ss:$8 sm:$0x3]  ;;  %s3686_s23 = sld [smem:[#allocation5 + $0xc]] }
 0xe51   :  { %v3769_v5 = vmul.f32 -1.442695, %v1920_v4  ;;  %v3770_v43 = vmul.f32 -1.442695, %v1921_v25 }
 0xe53   :  { %4026 = vpow2.f32 %v3769_v5  ;;  %s654_s8 = sadd.s32 56, %s3689_s22  ;;  %s3704_s22 = sld [smem:[#allocation5 + $0x8d]] }
 0xe54   :  { %s655_s25 = sshra.s32 %s654_s8, 3  ;;  %s658_s30 = sand.u32 7, %s654_s8 }
 0xe55   :  { %s644_s5 = sshra.s32 %s3686_s23, 3  ;;  %s647_s26 = sand.u32 7, %s3686_s23 }
 0xe56   :  { %s3861_s3 = sshll.u32 %s644_s5, 4  ;;  %s3862_s4 = sshll.u32 %s655_s25, 4 }
 0xe57   :  { %s650_s12 = sadd.s32 %s3861_s3, %s647_s26  ;;  %s661_s13 = sadd.s32 %s3862_s4, %s658_s30 }
 0xe58   :  { %s651_s16 = scalar_lea.vmem [#allocation8], %s650_s12  ;;  %s662_s17 = scalar_lea.vmem [#allocation8], %s661_s13 }
 0xe59   :  { %v4027_v6 = vpop.eup %4026 }
 0xe5a   :  { %v1925_v7 = vadd.f32 1.0, %v4027_v6 }
 0xe5c   :  { %4028 = vrcp.f32 %v1925_v7  ;;  %v1937_v10 = vand.u32 2147483648, %v1925_v7  ;;  %v1935_v12 = vand.u32 2147483647, %v1925_v7  ;;  %vm1931_vm11 = vweird.f32 %v1925_v7 }
 0xe5d   :  { %4030 = vtanh.f32 %v1921_v25 }
 0xe5e   :  { %v1938_v17 = vor.u32 1.1754944e-38, %v1937_v10  ;;  %vm1936_vm13 = vcmp.eq.f32.partialorder %v1935_v12, 8.507059e+37  ;;  %4032 = vpow2.f32 %v3770_v43 }
 0xe62   :  { %v4029_v60 = vpop.eup %4028 }
 0xe63   :  { %v1927_v8 = vmul.f32 %v4029_v60, %v1925_v7  ;;  %vm1932_vm8 = vweird.f32 %v4029_v60  ;;  %v4031_v37 = vpop.eup %4030  ;;  %v552_v7 = vld [vmem:[%s551_s21] ss:$8 sm:$0x3]  ;;  %s637_s21 = scalar_lea.vmem [#allocation8], %s636_s18  ;;  %s676_s18 = scalar_lea.vmem [#allocation8], %s675_s14 }
 0xe64   :  { %vm1933_vm12 = vmor %vm1931_vm11, %vm1932_vm8  ;;  %v4033_v44 = vpop.eup %4032  ;;  %v564_v19 = vadd.f32 %v563_v59, %v552_v7 }
 0xe65   :  { %v1928_v9 = vsub.f32 1.0, %v1927_v8  ;;  %v1945_v45 = vadd.f32 1.0, %v4033_v44 }
 0xe66   :  { %566 = vst.msk [vmem:[#allocation2 + $0x24] ss:$8 sm:$0x3] %vm4309_vm0, %v564_v19 }
 0xe67   :  { %v1929_v11 = vmul.f32 %v4029_v60, %v1928_v9  ;;  %4034 = vrcp.f32 %v1945_v45  ;;  %v1957_v52 = vand.u32 2147483648, %v1945_v45  ;;  %vm1951_vm15 = vweird.f32 %v1945_v45 }
 0xe68   :  { %v1955_v56 = vand.u32 2147483647, %v1945_v45 }
 0xe69   :  { %v1930_v15 = vadd.f32 %v4029_v60, %v1929_v11  ;;  %v1958_v1 = vor.u32 1.1754944e-38, %v1957_v52 }
 0xe6a   :  { %vm1956_vm2 = vcmp.eq.f32.partialorder %v1955_v56, 8.507059e+37 }
 0xe6b   :  { %v1934_v18 = vsel %vm1933_vm12, %v4029_v60, %v1930_v15  ;;  %v588_v60 = vld [vmem:[%s587_s24] ss:$8 sm:$0x3]  ;;  %s3695_s24 = sld [smem:[#allocation5 + $0x83]] }
 0xe6c   :  { %v1939_v39 = vsel %vm1936_vm13, %v1938_v17, %v1934_v18  ;;  %v589_v25 = vadd.f32 %v588_v60, %v577_v22 }
 0xe6d   :  { %v1965_v40 = vmul.f32 %v4031_v37, %v1939_v39  ;;  %v1964_v41 = vmul.f32 %v1962_v24, %v1939_v39  ;;  %v4035_v46 = vpop.eup %4034 }
 0xe6e   :  { %v1947_v47 = vmul.f32 %v4035_v46, %v1945_v45  ;;  %vm1952_vm14 = vweird.f32 %v4035_v46  ;;  %591 = vst.msk [vmem:[#allocation2 + $0x25] ss:$8 sm:$0x3] %vm4309_vm0, %v589_v25 }
 0xe6f   :  { %1967 = vrot.lane.b32.xlu0 %v1965_v40, %s5186_s0  ;;  %vm1953_vm1 = vmor %vm1951_vm15, %vm1952_vm14 }
 0xe70   :  { %v1948_v48 = vsub.f32 1.0, %v1947_v47 }
 0xe71   :  { %s679_s7 = sadd.s32 56, %s3695_s24 }
 0xe72   :  { %v1949_v49 = vmul.f32 %v4035_v46, %v1948_v48  ;;  %s680_s9 = sshra.s32 %s679_s7, 3  ;;  %s683_s10 = sand.u32 7, %s679_s7 }
 0xe73   :  { %s3864_s11 = sshll.u32 %s680_s9, 4  ;;  %s719_s7 = sshra.s32 %s3704_s22, 3 }
 0xe74   :  { %v1950_v38 = vadd.f32 %v4035_v46, %v1949_v49  ;;  %s686_s15 = sadd.s32 %s3864_s11, %s683_s10  ;;  %s722_s9 = sand.u32 7, %s3704_s22 }
 0xe75   :  { %v1982_v9 = vld [vmem:[#allocation2 + $0x20] sm:$0x30]  ;;  %v1983_v39 = vld [vmem:[#allocation2 + $0x28] sm:$0x30]  ;;  %s3867_s30 = sshll.u32 %s719_s7, 4 }
 0xe76   :  { %v1954_v0 = vsel %vm1953_vm1, %v4035_v46, %v1950_v38  ;;  %s725_s11 = sadd.s32 %s3867_s30, %s722_s9 }
 0xe77   :  { %v1959_v4 = vsel %vm1956_vm2, %v1958_v1, %v1954_v0 }
 0xee1   :  { %v1968_v50 = vpop.permute.xlu0 %1967 }
 0xee2   :  { %v4762_v51 = vadd.f32 %v1968_v50, %v1964_v41 }
 0xee4   :  { %4036 = vtanh.f32 %v4762_v51  ;;  %v2077_v50 = vrot.slane %v4762_v51, 6 }
 0xeea   :  { %v4037_v2 = vpop.eup %4036 }
 0xeeb   :  { %v4765_v5 = vmul.f32 %v4037_v2, %v1959_v4 }
 0xeed   :  { %v1984_v6 = vrot.slane %v4765_v5, 2 }
 0xeef   :  { %1985 = vrot.lane.b32.xlu1 %v1984_v6, %s5186_s0 }
 0xf61   :  { %v1986_v8 = vpop.permute.xlu1 %1985 }
 0xf62   :  { %3771 = vmatmul.msk.f32.vlgmr.msra.gmra.mxu0 %vm861_vm10, %v1986_v8  ;;  %3772 = vmatmul.msk.f32.vlgmr.msra.gmra.mxu1 %vm861_vm10, %v1986_v8 }
 0xf63   :  { %2448 = vmatpush.msra.mxu0 %v4712_v57  ;;  %2468 = vmatpush.msra.mxu1 %v4715_v58 }
 0xf65   :  { %2449 = vmatpush.msra.mxu0 %v4718_v55  ;;  %2469 = vmatpush.msra.mxu1 %v4721_v53 }
 0xf67   :  { %2450 = vmatpush.msra.mxu0 %v4724_v61  ;;  %2470 = vmatpush.msra.mxu1 %v4727_v3 }
 0xf69   :  { %2451 = vmatpush.msra.mxu0 %v4730_v16  ;;  %2471 = vmatpush.msra.mxu1 %v4733_v26 }
 0xf6b   :  { %2452 = vmatpush.msra.mxu0 %v4736_v28  ;;  %2472 = vmatpush.msra.mxu1 %v4739_v29 }
 0xf6d   :  { %2453 = vmatpush.msra.mxu0 %v4742_v30  ;;  %2473 = vmatpush.msra.mxu1 %v4745_v31 }
 0xf6f   :  { %2454 = vmatpush.msra.mxu0 %v4748_v32  ;;  %2474 = vmatpush.msra.mxu1 %v4751_v33 }
 0xf71   :  { %2455 = vmatpush.msra.mxu0 %v4754_v34  ;;  %2475 = vmatpush.msra.mxu1 %v4757_v35 }
 0xfdf   :  { %v2006_v10 = vpop.f32.mrf.mxu0  ;;  %v2026_v18 = vpop.f32.mrf.mxu1 }
 0xfe0   :  { %v2031_v11 = vrot.slane %v2006_v10, 4  ;;  %v2032_v37 = vrot.slane %v2026_v18, 4  ;;  %v602_v18 = vld [vmem:[%s601_s19] ss:$8 sm:$0x3]  ;;  %s687_s19 = scalar_lea.vmem [#allocation8], %s686_s15 }
 0xfe1   :  { %s726_s15 = scalar_lea.vmem [#allocation8], %s725_s11 }
 0xfe2   :  { %v2035_v12 = vadd.f32 %v2031_v11, %v1982_v9  ;;  %v2036_v41 = vadd.f32 %v2032_v37, %v1983_v39  ;;  %v613_v37 = vld [vmem:[%s612_s1] ss:$8 sm:$0x3]  ;;  %s3701_s1 = sld [smem:[#allocation5 + $0x2]] }
 0xfe3   :  { %v614_v39 = vadd.f32 %v613_v37, %v602_v18  ;;  %v663_v18 = vld [vmem:[%s662_s17] ss:$8 sm:$0x3]  ;;  %s3713_s17 = sld [smem:[#allocation5 + $0x1]] }
 0xfe4   :  { %v3773_v15 = vmul.f32 -1.442695, %v2035_v12  ;;  %v3774_v2 = vmul.f32 -1.442695, %v2036_v41 }
 0xfe5   :  { %616 = vst.msk [vmem:[#allocation2 + $0x26] ss:$8 sm:$0x3] %vm4309_vm0, %v614_v39  ;;  %v677_v39 = vld [vmem:[%s676_s18] ss:$8 sm:$0x3] }
 0xfe6   :  { %4038 = vpow2.f32 %v3773_v15  ;;  %s3710_s18 = sld [smem:[#allocation5 + $0xe]] }
 0xfe8   :  { %s704_s23 = sadd.s32 56, %s3701_s1  ;;  %s3716_s1 = sld [smem:[#allocation5 + $0x8e]] }
 0xfe9   :  { %s705_s8 = sshra.s32 %s704_s23, 3  ;;  %s708_s27 = sand.u32 7, %s704_s23 }
 0xfea   :  { %s3866_s3 = sshll.u32 %s705_s8, 4 }
 0xfeb   :  { %s711_s10 = sadd.s32 %s3866_s3, %s708_s27 }
 0xfec   :  { %v4039_v17 = vpop.eup %4038  ;;  %s712_s14 = scalar_lea.vmem [#allocation8], %s711_s10 }
 0xfed   :  { %v2040_v24 = vadd.f32 1.0, %v4039_v17 }
 0xfef   :  { %4040 = vrcp.f32 %v2040_v24  ;;  %v2052_v45 = vand.u32 2147483648, %v2040_v24  ;;  %v2050_v47 = vand.u32 2147483647, %v2040_v24  ;;  %vm2046_vm4 = vweird.f32 %v2040_v24 }
 0xff0   :  { %4042 = vtanh.f32 %v2036_v41  ;;  %v638_v41 = vld [vmem:[%s637_s21] ss:$8 sm:$0x3]  ;;  %s3707_s21 = sld [smem:[#allocation5 + $0x82]] }
 0xff1   :  { %v2053_v49 = vor.u32 1.1754944e-38, %v2052_v45  ;;  %vm2051_vm6 = vcmp.eq.f32.partialorder %v2050_v47, 8.507059e+37  ;;  %4044 = vpow2.f32 %v3774_v2 }
 0xff5   :  { %v4041_v40 = vpop.eup %4040 }
 0xff6   :  { %v2042_v43 = vmul.f32 %v4041_v40, %v2040_v24  ;;  %vm2047_vm3 = vweird.f32 %v4041_v40  ;;  %v4043_v52 = vpop.eup %4042  ;;  %s729_s6 = sadd.s32 56, %s3707_s21  ;;  %s744_s21 = sshra.s32 %s3710_s18, 3 }
 0xff7   :  { %vm2048_vm5 = vmor %vm2046_vm4, %vm2047_vm3  ;;  %v4045_v4 = vpop.eup %4044  ;;  %s730_s26 = sshra.s32 %s729_s6, 3  ;;  %s733_s4 = sand.u32 7, %s729_s6 }
 0xff8   :  { %v2043_v44 = vsub.f32 1.0, %v2042_v43  ;;  %v2060_v6 = vadd.f32 1.0, %v4045_v4  ;;  %s3868_s28 = sshll.u32 %s730_s26, 4  ;;  %s769_s6 = sshra.s32 %s3716_s1, 3 }
 0xff9   :  { %s736_s12 = sadd.s32 %s3868_s28, %s733_s4  ;;  %s3869_s8 = sshll.u32 %s744_s21, 4 }
 0xffa   :  { %v2044_v46 = vmul.f32 %v4041_v40, %v2043_v44  ;;  %4046 = vrcp.f32 %v2060_v6  ;;  %v2072_v8 = vand.u32 2147483648, %v2060_v6  ;;  %vm2066_vm8 = vweird.f32 %v2060_v6  ;;  %s772_s26 = sand.u32 7, %s3716_s1  ;;  %s3871_s27 = sshll.u32 %s769_s6, 4 }
 0xffb   :  { %v2070_v9 = vand.u32 2147483647, %v2060_v6  ;;  %s775_s28 = sadd.s32 %s3871_s27, %s772_s26 }
 0xffc   :  { %v2045_v48 = vadd.f32 %v4041_v40, %v2044_v46  ;;  %v2073_v11 = vor.u32 1.1754944e-38, %v2072_v8 }
 0xffd   :  { %vm2071_vm12 = vcmp.eq.f32.partialorder %v2070_v9, 8.507059e+37 }
 0xffe   :  { %v2049_v38 = vsel %vm2048_vm5, %v4041_v40, %v2045_v48  ;;  %v627_v40 = vld [vmem:[%s626_s20] ss:$8 sm:$0x3]  ;;  %s3698_s20 = sld [smem:[#allocation5 + $0xd]] }
 0xfff   :  { %v2054_v56 = vsel %vm2051_vm6, %v2053_v49, %v2049_v38  ;;  %v639_v43 = vadd.f32 %v638_v41, %v627_v40  ;;  %v688_v40 = vld [vmem:[%s687_s19] ss:$8 sm:$0x3]  ;;  %s3719_s19 = sld [smem:[#allocation5 + $0x81]] }
0x1000   :  { %v2080_v0 = vmul.f32 %v4043_v52, %v2054_v56  ;;  %v2079_v1 = vmul.f32 %v2077_v50, %v2054_v56  ;;  %v4047_v7 = vpop.eup %4046  ;;  %v689_v41 = vadd.f32 %v688_v40, %v677_v39 }
0x1001   :  { %v2062_v59 = vmul.f32 %v4047_v7, %v2060_v6  ;;  %vm2067_vm7 = vweird.f32 %v4047_v7  ;;  %641 = vst.msk [vmem:[#allocation2 + $0x27] ss:$8 sm:$0x3] %vm4309_vm0, %v639_v43 }
0x1002   :  { %2082 = vrot.lane.b32.xlu2 %v2080_v0, %s5186_s0  ;;  %vm2068_vm11 = vmor %vm2066_vm8, %vm2067_vm7  ;;  %691 = vst.msk [vmem:[#allocation2 + $0x31] ss:$8 sm:$0x3] %vm4309_vm0, %v689_v41 }
0x1003   :  { %v2063_v19 = vsub.f32 1.0, %v2062_v59 }
0x1004   :  { %s694_s24 = sshra.s32 %s3698_s20, 3  ;;  %s697_s5 = sand.u32 7, %s3698_s20 }
0x1005   :  { %v2064_v22 = vmul.f32 %v4047_v7, %v2063_v19  ;;  %s3865_s25 = sshll.u32 %s694_s24, 4  ;;  %s754_s20 = sadd.s32 56, %s3713_s17 }
0x1006   :  { %s700_s29 = sadd.s32 %s3865_s25, %s697_s5  ;;  %s779_s22 = sadd.s32 56, %s3719_s19 }
0x1007   :  { %v2065_v51 = vadd.f32 %v4047_v7, %v2064_v22  ;;  %s701_s13 = scalar_lea.vmem [#allocation8], %s700_s29  ;;  %s755_s23 = sshra.s32 %s754_s20, 3 }
0x1008   :  { %s747_s24 = sand.u32 7, %s3710_s18  ;;  %s780_s5 = sshra.s32 %s779_s22, 3 }
0x1009   :  { %v2069_v10 = vsel %vm2068_vm11, %v4047_v7, %v2065_v51  ;;  %s758_s7 = sand.u32 7, %s754_s20  ;;  %s3870_s25 = sshll.u32 %s755_s23, 4 }
0x100a   :  { %v2074_v15 = vsel %vm2071_vm12, %v2073_v11, %v2069_v10  ;;  %s783_s3 = sand.u32 7, %s779_s22  ;;  %s3872_s9 = sshll.u32 %s780_s5, 4 }
0x100b   :  { %s750_s30 = sadd.s32 %s3869_s8, %s747_s24  ;;  %s761_s4 = sadd.s32 %s3870_s25, %s758_s7 }
0x100c   :  { %s786_s29 = sadd.s32 %s3872_s9, %s783_s3  ;;  %s751_s10 = scalar_lea.vmem [#allocation8], %s750_s30 }
0x100d   :  { %s762_s11 = scalar_lea.vmem [#allocation8], %s761_s4  ;;  %s3722_s17 = sld [smem:[#allocation5 + $0xf]] }
0x100e   :  { %s3730_s18 = sld [smem:[#allocation5 + $0x80]] }
0x100f   :  { %s3727_s19 = sld [smem:[#allocation5 + $0x8f]] }
0x1013   :  { %s794_s20 = sshra.s32 %s3722_s17, 3  ;;  %s797_s23 = sand.u32 7, %s3722_s17 }
0x1014   :  { %s829_s21 = sadd.s32 56, %s3730_s18  ;;  %s3873_s6 = sshll.u32 %s794_s20, 4 }
0x1015   :  { %s819_s24 = sshra.s32 %s3727_s19, 3  ;;  %s830_s8 = sshra.s32 %s829_s21, 3 }
0x1016   :  { %s822_s25 = sand.u32 7, %s3727_s19  ;;  %s3875_s26 = sshll.u32 %s819_s24, 4 }
0x1017   :  { %s833_s27 = sand.u32 7, %s829_s21  ;;  %s3876_s3 = sshll.u32 %s830_s8, 4 }
0x1018   :  { %s800_s9 = sadd.s32 %s3873_s6, %s797_s23  ;;  %s825_s4 = sadd.s32 %s3875_s26, %s822_s25 }
0x105c   :  { %v2083_v60 = vpop.permute.xlu2 %2082 }
0x105d   :  { %v4793_v25 = vadd.f32 %v2083_v60, %v2079_v1 }
0x105f   :  { %4048 = vtanh.f32 %v4793_v25  ;;  %v2192_v48 = vrot.slane %v4793_v25, 6 }
0x1065   :  { %v4049_v12 = vpop.eup %4048 }
0x1066   :  { %v4796_v17 = vmul.f32 %v4049_v12, %v2074_v15 }
0x1068   :  { %v2099_v24 = vrot.slane %v4796_v17, 4 }
0x106a   :  { %2100 = vrot.lane.b32.xlu0 %v2099_v24, %s5186_s0  ;;  %v652_v24 = vld [vmem:[%s651_s16] ss:$8 sm:$0x3]  ;;  %s737_s16 = scalar_lea.vmem [#allocation8], %s736_s12  ;;  %s776_s12 = scalar_lea.vmem [#allocation8], %s775_s28 }
0x106b   :  { %v664_v37 = vadd.f32 %v663_v18, %v652_v24  ;;  %v727_v24 = vld [vmem:[%s726_s15] ss:$8 sm:$0x3]  ;;  %s4201_s15 = smov 96   ;;  %s836_s28 = sadd.s32 %s3876_s3, %s833_s27 }
0x106c   :  { %v738_v18 = vld [vmem:[%s737_s16] ss:$8 sm:$0x3]  ;;  %s803_s16 = sld [smem:[#allocation5]] }
0x106d   :  { %666 = vst.msk [vmem:[#allocation2 + $0x30] ss:$8 sm:$0x3] %vm4309_vm0, %v664_v37  ;;  %v739_v37 = vadd.f32 %v738_v18, %v727_v24  ;;  %v777_v18 = vld [vmem:[%s776_s12] ss:$8 sm:$0x3] }
0x106e   :  { %s837_s12 = scalar_lea.vmem [#allocation8], %s836_s28 }
0x106f   :  { %741 = vst.msk [vmem:[#allocation2 + $0x33] ss:$8 sm:$0x3] %vm4309_vm0, %v739_v37 }
0x1072   :  { %s804_s1 = sadd.s32 56, %s803_s16 }
0x1073   :  { %s805_s22 = sshra.s32 %s804_s1, 3  ;;  %s808_s5 = sand.u32 7, %s804_s1 }
0x1074   :  { %s3874_s7 = sshll.u32 %s805_s22, 4 }
0x1075   :  { %s811_s30 = sadd.s32 %s3874_s7, %s808_s5 }
0x10dc   :  { %v2101_v44 = vpop.permute.xlu0 %2100 }
0x10dd   :  { %3775 = vmatmul.msk.f32.vlgmr.msra.gmra.mxu2 %vm861_vm10, %v2101_v44  ;;  %3776 = vmatmul.msk.f32.vlgmr.msra.gmra.mxu3 %vm861_vm10, %v2101_v44  ;;  %v2212_v44 = vld [vmem:[#allocation2 + $0x30] sm:$0x3] }
0x10de   :  { %2563 = vmatpush.msra.mxu2 %v4712_v57  ;;  %2583 = vmatpush.msra.mxu3 %v4715_v58  ;;  %v2097_v57 = vld [vmem:[#allocation2 + $0x20] sm:$0xc0] }
0x10e0   :  { %2564 = vmatpush.msra.mxu2 %v4718_v55  ;;  %2584 = vmatpush.msra.mxu3 %v4721_v53 }
0x10e2   :  { %2565 = vmatpush.msra.mxu2 %v4724_v61  ;;  %2585 = vmatpush.msra.mxu3 %v4727_v3 }
0x10e4   :  { %2566 = vmatpush.msra.mxu2 %v4730_v16  ;;  %2586 = vmatpush.msra.mxu3 %v4733_v26 }
0x10e6   :  { %2567 = vmatpush.msra.mxu2 %v4736_v28  ;;  %2587 = vmatpush.msra.mxu3 %v4739_v29  ;;  %v2098_v29 = vld [vmem:[#allocation2 + $0x28] sm:$0xc0] }
0x10e8   :  { %2568 = vmatpush.msra.mxu2 %v4742_v30  ;;  %2588 = vmatpush.msra.mxu3 %v4745_v31 }
0x10ea   :  { %2569 = vmatpush.msra.mxu2 %v4748_v32  ;;  %2589 = vmatpush.msra.mxu3 %v4751_v33 }
0x10ec   :  { %2570 = vmatpush.msra.mxu2 %v4754_v34  ;;  %2590 = vmatpush.msra.mxu3 %v4757_v35 }
0x1160   :  { %v2121_v58 = vpop.f32.mrf.mxu2  ;;  %v2141_v26 = vpop.f32.mrf.mxu3 }
0x1161   :  { %v2146_v55 = vrot.slane %v2121_v58, 2  ;;  %v2147_v28 = vrot.slane %v2141_v26, 2 }
0x1163   :  { %v2150_v53 = vadd.f32 %v2146_v55, %v2097_v57  ;;  %v2151_v31 = vadd.f32 %v2147_v28, %v2098_v29 }
0x1165   :  { %v3777_v61 = vmul.f32 -1.442695, %v2150_v53  ;;  %v3778_v0 = vmul.f32 -1.442695, %v2151_v31 }
0x1167   :  { %4050 = vpow2.f32 %v3777_v61 }
0x116d   :  { %v4051_v3 = vpop.eup %4050 }
0x116e   :  { %v2155_v16 = vadd.f32 1.0, %v4051_v3  ;;  %v2213_v3 = vld [vmem:[#allocation2 + $0x38] sm:$0x3] }
0x1170   :  { %4052 = vrcp.f32 %v2155_v16  ;;  %v2167_v34 = vand.u32 2147483648, %v2155_v16  ;;  %v2165_v35 = vand.u32 2147483647, %v2155_v16  ;;  %vm2161_vm14 = vweird.f32 %v2155_v16 }
0x1171   :  { %4054 = vtanh.f32 %v2151_v31 }
0x1172   :  { %v2168_v47 = vor.u32 1.1754944e-38, %v2167_v34  ;;  %vm2166_vm1 = vcmp.eq.f32.partialorder %v2165_v35, 8.507059e+37  ;;  %4056 = vpow2.f32 %v3778_v0 }
0x1176   :  { %v4053_v30 = vpop.eup %4052 }
0x1177   :  { %v2157_v32 = vmul.f32 %v4053_v30, %v2155_v16  ;;  %vm2162_vm13 = vweird.f32 %v4053_v30  ;;  %v4055_v50 = vpop.eup %4054 }
0x1178   :  { %vm2163_vm15 = vmor %vm2161_vm14, %vm2162_vm13  ;;  %v4057_v1 = vpop.eup %4056 }
0x1179   :  { %v2158_v33 = vsub.f32 1.0, %v2157_v32  ;;  %v2175_v2 = vadd.f32 1.0, %v4057_v1 }
0x117b   :  { %v2159_v45 = vmul.f32 %v4053_v30, %v2158_v33  ;;  %4058 = vrcp.f32 %v2175_v2  ;;  %v2187_v25 = vand.u32 2147483648, %v2175_v2  ;;  %vm2181_vm3 = vweird.f32 %v2175_v2 }
0x117c   :  { %v2185_v51 = vand.u32 2147483647, %v2175_v2 }
0x117d   :  { %v2160_v46 = vadd.f32 %v4053_v30, %v2159_v45  ;;  %v2188_v9 = vor.u32 1.1754944e-38, %v2187_v25 }
0x117e   :  { %vm2186_vm5 = vcmp.eq.f32.partialorder %v2185_v51, 8.507059e+37 }
0x117f   :  { %v2164_v49 = vsel %vm2163_vm15, %v4053_v30, %v2160_v46 }
0x1180   :  { %v2169_v38 = vsel %vm2166_vm1, %v2168_v47, %v2164_v49 }
0x1181   :  { %v2195_v52 = vmul.f32 %v4055_v50, %v2169_v38  ;;  %v2194_v56 = vmul.f32 %v2192_v48, %v2169_v38  ;;  %v4059_v4 = vpop.eup %4058 }
0x1182   :  { %v2177_v6 = vmul.f32 %v4059_v4, %v2175_v2  ;;  %vm2182_vm2 = vweird.f32 %v4059_v4 }
0x1183   :  { %2197 = vrot.lane.b32.xlu1 %v2195_v52, %s5186_s0  ;;  %vm2183_vm4 = vmor %vm2181_vm3, %vm2182_vm2 }
0x1184   :  { %v2178_v7 = vsub.f32 1.0, %v2177_v6 }
0x1186   :  { %v2179_v59 = vmul.f32 %v4059_v4, %v2178_v7 }
0x1188   :  { %v2180_v60 = vadd.f32 %v4059_v4, %v2179_v59 }
0x118a   :  { %v2184_v8 = vsel %vm2183_vm4, %v4059_v4, %v2180_v60 }
0x118b   :  { %v2189_v11 = vsel %vm2186_vm5, %v2188_v9, %v2184_v8 }
0x11f5   :  { %v2198_v19 = vpop.permute.xlu1 %2197 }
0x11f6   :  { %v4824_v22 = vadd.f32 %v2198_v19, %v2194_v56 }
0x11f8   :  { %4060 = vtanh.f32 %v4824_v22  ;;  %v2301_v35 = vrot.slane %v4824_v22, 6 }
0x11fe   :  { %v4061_v10 = vpop.eup %4060 }
0x11ff   :  { %v4827_v12 = vmul.f32 %v4061_v10, %v2189_v11  ;;  %v702_v10 = vld [vmem:[%s701_s13] ss:$8 sm:$0x3]  ;;  %s787_s13 = scalar_lea.vmem [#allocation8], %s786_s29  ;;  %s801_s29 = scalar_lea.vmem [#allocation8], %s800_s9 }
0x1200   :  { %v713_v11 = vld [vmem:[%s712_s14] ss:$8 sm:$0x3]  ;;  %s4200_s14 = smov 32  }
0x1201   :  { %v2214_v15 = vrot.slane %v4827_v12, 6  ;;  %v788_v37 = vld [vmem:[%s787_s13] ss:$8 sm:$0x3] }
0x1203   :  { %2215 = vrot.lane.b32.xlu2 %v2214_v15, %s5186_s0  ;;  %v714_v15 = vadd.f32 %v713_v11, %v702_v10  ;;  %v752_v11 = vld [vmem:[%s751_s10] ss:$8 sm:$0x3]  ;;  %s812_s10 = scalar_lea.vmem [#allocation8], %s811_s30 }
0x1205   :  { %716 = vst.msk [vmem:[#allocation2 + $0x32] ss:$8 sm:$0x3] %vm4309_vm0, %v714_v15  ;;  %v763_v15 = vld [vmem:[%s762_s11] ss:$8 sm:$0x3] }
0x1206   :  { %v764_v24 = vadd.f32 %v763_v15, %v752_v11  ;;  %s826_s11 = scalar_lea.vmem [#allocation8], %s825_s4 }
0x1208   :  { %766 = vst.msk [vmem:[#allocation2 + $0x34] ss:$8 sm:$0x3] %vm4309_vm0, %v764_v24 }
0x120c   :  { %v2321_v40 = vld [vmem:[#allocation2 + $0x30] sm:$0xc] }
0x125d   :  { %v2216_v43 = vpop.permute.xlu2 %2215 }
0x125e   :  { %3779 = vmatmul.msk.f32.vlgmr.msrb.gmra.mxu0 %vm861_vm10, %v2216_v43  ;;  %3780 = vmatmul.msk.f32.vlgmr.msrb.gmra.mxu1 %vm861_vm10, %v2216_v43 }
0x12db   :  { %v2236_v57 = vpop.f32.mrf.mxu0  ;;  %v2256_v16 = vpop.f32.mrf.mxu1 }
0x12dc   :  { %v2259_v58 = vadd.f32 %v2236_v57, %v2212_v44  ;;  %v2260_v28 = vadd.f32 %v2256_v16, %v2213_v3  ;;  %v2322_v3 = vld [vmem:[#allocation2 + $0x38] sm:$0xc] }
0x12de   :  { %v3781_v55 = vmul.f32 -1.442695, %v2259_v58  ;;  %v3782_v38 = vmul.f32 -1.442695, %v2260_v28 }
0x12e0   :  { %4062 = vpow2.f32 %v3781_v55 }
0x12e6   :  { %v4063_v53 = vpop.eup %4062 }
0x12e7   :  { %v2264_v61 = vadd.f32 1.0, %v4063_v53 }
0x12e9   :  { %4064 = vrcp.f32 %v2264_v61  ;;  %v2276_v31 = vand.u32 2147483648, %v2264_v61  ;;  %v2274_v33 = vand.u32 2147483647, %v2264_v61  ;;  %vm2270_vm7 = vweird.f32 %v2264_v61 }
0x12ea   :  { %4066 = vtanh.f32 %v2260_v28 }
0x12eb   :  { %v2277_v45 = vor.u32 1.1754944e-38, %v2276_v31  ;;  %vm2275_vm11 = vcmp.eq.f32.partialorder %v2274_v33, 8.507059e+37  ;;  %4068 = vpow2.f32 %v3782_v38 }
0x12ef   :  { %v4065_v26 = vpop.eup %4064 }
0x12f0   :  { %v2266_v29 = vmul.f32 %v4065_v26, %v2264_v61  ;;  %vm2271_vm6 = vweird.f32 %v4065_v26  ;;  %v4067_v47 = vpop.eup %4066 }
0x12f1   :  { %vm2272_vm8 = vmor %vm2270_vm7, %vm2271_vm6  ;;  %v4069_v52 = vpop.eup %4068 }
0x12f2   :  { %v2267_v30 = vsub.f32 1.0, %v2266_v29  ;;  %v2284_v56 = vadd.f32 1.0, %v4069_v52 }
0x12f4   :  { %v2268_v32 = vmul.f32 %v4065_v26, %v2267_v30  ;;  %4070 = vrcp.f32 %v2284_v56  ;;  %v2296_v19 = vand.u32 2147483648, %v2284_v56  ;;  %vm2290_vm13 = vweird.f32 %v2284_v56 }
0x12f5   :  { %v2294_v22 = vand.u32 2147483647, %v2284_v56 }
0x12f6   :  { %v2269_v34 = vadd.f32 %v4065_v26, %v2268_v32  ;;  %v2297_v25 = vor.u32 1.1754944e-38, %v2296_v19 }
0x12f7   :  { %vm2295_vm15 = vcmp.eq.f32.partialorder %v2294_v22, 8.507059e+37 }
0x12f8   :  { %v2273_v46 = vsel %vm2272_vm8, %v4065_v26, %v2269_v34 }
0x12f9   :  { %v2278_v48 = vsel %vm2275_vm11, %v2277_v45, %v2273_v46 }
0x12fa   :  { %v2304_v49 = vmul.f32 %v4067_v47, %v2278_v48  ;;  %v2303_v50 = vmul.f32 %v2301_v35, %v2278_v48  ;;  %v4071_v0 = vpop.eup %4070 }
0x12fb   :  { %v2286_v1 = vmul.f32 %v4071_v0, %v2284_v56  ;;  %vm2291_vm12 = vweird.f32 %v4071_v0 }
0x12fc   :  { %2306 = vrot.lane.b32.xlu0 %v2304_v49, %s5186_s0  ;;  %vm2292_vm14 = vmor %vm2290_vm13, %vm2291_vm12 }
0x12fd   :  { %v2287_v2 = vsub.f32 1.0, %v2286_v1 }
0x12ff   :  { %v2288_v4 = vmul.f32 %v4071_v0, %v2287_v2 }
0x1301   :  { %v2289_v59 = vadd.f32 %v4071_v0, %v2288_v4 }
0x1303   :  { %v2293_v60 = vsel %vm2292_vm14, %v4071_v0, %v2289_v59 }
0x1304   :  { %v2298_v8 = vsel %vm2295_vm15, %v2297_v25, %v2293_v60 }
0x136e   :  { %v2307_v6 = vpop.permute.xlu0 %2306 }
0x136f   :  { %v4839_v7 = vadd.f32 %v2307_v6, %v2303_v50 }
0x1371   :  { %4072 = vtanh.f32 %v4839_v7  ;;  %v2413_v45 = vrot.slane %v4839_v7, 6 }
0x1377   :  { %v4073_v51 = vpop.eup %4072 }
0x1378   :  { %v4842_v9 = vmul.f32 %v4073_v51, %v2298_v8 }
0x137a   :  { %2313 = vrot.lane.b32.xlu1 %v4842_v9, %s5186_s0 }
0x13ec   :  { %v2314_v39 = vpop.permute.xlu1 %2313 }
0x13ed   :  { %2316 = vst.msk [vmem:[#allocation3 + $0x18] sm:$0x3] %vm959_vm9, %v2314_v39  ;;  %3783 = vmatmul.msk.f32.vlgmr.msrb.gmra.mxu2 %vm861_vm10, %v2314_v39  ;;  %3784 = vmatmul.msk.f32.vlgmr.msrb.gmra.mxu3 %vm861_vm10, %v2314_v39  ;;  %v789_v39 = vadd.f32 %v788_v37, %v777_v18 }
0x13ef   :  { %791 = vst.msk [vmem:[#allocation2 + $0x35] ss:$8 sm:$0x3] %vm4309_vm0, %v789_v39 }
0x1470   :  { %v2342_v41 = vpop.f32.mrf.mxu2  ;;  %v2362_v53 = vpop.f32.mrf.mxu3 }
0x1471   :  { %v2367_v43 = vrot.slane %v2342_v41, 6  ;;  %v2368_v61 = vrot.slane %v2362_v53, 6  ;;  %v2433_v41 = vld [vmem:[#allocation2 + $0x30] sm:$0x30] }
0x1473   :  { %v2371_v44 = vadd.f32 %v2367_v43, %v2321_v40  ;;  %v2372_v26 = vadd.f32 %v2368_v61, %v2322_v3 }
0x1475   :  { %v3785_v57 = vmul.f32 -1.442695, %v2371_v44  ;;  %v3786_v50 = vmul.f32 -1.442695, %v2372_v26 }
0x1477   :  { %4074 = vpow2.f32 %v3785_v57 }
0x147d   :  { %v4075_v58 = vpop.eup %4074 }
0x147e   :  { %v2376_v55 = vadd.f32 1.0, %v4075_v58 }
0x1480   :  { %4076 = vrcp.f32 %v2376_v55  ;;  %v2388_v30 = vand.u32 2147483648, %v2376_v55  ;;  %v2386_v32 = vand.u32 2147483647, %v2376_v55  ;;  %vm2382_vm2 = vweird.f32 %v2376_v55 }
0x1481   :  { %4078 = vtanh.f32 %v2372_v26 }
0x1482   :  { %v2389_v34 = vor.u32 1.1754944e-38, %v2388_v30  ;;  %vm2387_vm4 = vcmp.eq.f32.partialorder %v2386_v32, 8.507059e+37  ;;  %4080 = vpow2.f32 %v3786_v50 }
0x1486   :  { %v4077_v16 = vpop.eup %4076 }
0x1487   :  { %v2378_v28 = vmul.f32 %v4077_v16, %v2376_v55  ;;  %vm2383_vm1 = vweird.f32 %v4077_v16  ;;  %v4079_v46 = vpop.eup %4078 }
0x1488   :  { %vm2384_vm3 = vmor %vm2382_vm2, %vm2383_vm1  ;;  %v4081_v38 = vpop.eup %4080 }
0x1489   :  { %v2379_v29 = vsub.f32 1.0, %v2378_v28  ;;  %v2396_v52 = vadd.f32 1.0, %v4081_v38 }
0x148b   :  { %v2380_v31 = vmul.f32 %v4077_v16, %v2379_v29  ;;  %4082 = vrcp.f32 %v2396_v52  ;;  %v2408_v59 = vand.u32 2147483648, %v2396_v52  ;;  %vm2402_vm6 = vweird.f32 %v2396_v52 }
0x148c   :  { %v2406_v19 = vand.u32 2147483647, %v2396_v52 }
0x148d   :  { %v2381_v33 = vadd.f32 %v4077_v16, %v2380_v31  ;;  %v2409_v60 = vor.u32 1.1754944e-38, %v2408_v59 }
0x148e   :  { %vm2407_vm8 = vcmp.eq.f32.partialorder %v2406_v19, 8.507059e+37  ;;  %v2665_v19 = vld [vmem:[#allocation8 + $0x180] sm:$0xff] }
0x148f   :  { %v2385_v35 = vsel %vm2384_vm3, %v4077_v16, %v2381_v33  ;;  %v2434_v16 = vld [vmem:[#allocation2 + $0x38] sm:$0x30]  ;;  %vm1072_vm3 = vcmask 257026  }
0x1490   :  { %v2390_v47 = vsel %vm2387_vm4, %v2389_v34, %v2385_v35 }
0x1491   :  { %v2416_v48 = vmul.f32 %v4079_v46, %v2390_v47  ;;  %v2415_v49 = vmul.f32 %v2413_v45, %v2390_v47  ;;  %v4083_v56 = vpop.eup %4082 }
0x1492   :  { %v2398_v0 = vmul.f32 %v4083_v56, %v2396_v52  ;;  %vm2403_vm5 = vweird.f32 %v4083_v56 }
0x1493   :  { %2418 = vrot.lane.b32.xlu2 %v2416_v48, %s5186_s0  ;;  %vm2404_vm7 = vmor %vm2402_vm6, %vm2403_vm5  ;;  %vm1304_vm5 = vcmask 261126   ;;  %vm1188_vm6 = vcmask 259076  }
0x1494   :  { %v2399_v1 = vsub.f32 1.0, %v2398_v0 }
0x1496   :  { %v2400_v2 = vmul.f32 %v4083_v56, %v2399_v1 }
0x1498   :  { %v2401_v7 = vadd.f32 %v4083_v56, %v2400_v2 }
0x149a   :  { %v2405_v22 = vsel %vm2404_vm7, %v4083_v56, %v2401_v7  ;;  %v2666_v7 = vld [vmem:[#allocation8 + $0x190] sm:$0xff] }
0x149b   :  { %v2410_v51 = vsel %vm2407_vm8, %v2409_v60, %v2405_v22  ;;  %2761 = vmatpush.msrb.mxu1 %v2666_v7 }
0x149d   :  { %2762 = vmatpush.msrb.mxu1 %v2665_v19 }
0x14ed   :  { %v2419_v4 = vpop.permute.xlu2 %2418 }
0x14ee   :  { %v4855_v6 = vadd.f32 %v2419_v4, %v2415_v49 }
0x14f0   :  { %4084 = vtanh.f32 %v4855_v6  ;;  %v2528_v35 = vrot.slane %v4855_v6, 6 }
0x14f6   :  { %v4085_v25 = vpop.eup %4084 }
0x14f7   :  { %v4858_v8 = vmul.f32 %v4085_v25, %v2410_v51 }
0x14f9   :  { %v2435_v10 = vrot.slane %v4858_v8, 2 }
0x14fb   :  { %2436 = vrot.lane.b32.xlu0 %v2435_v10, %s5186_s0 }
0x156d   :  { %v2437_v40 = vpop.permute.xlu0 %2436 }
0x156e   :  { %3787 = vmatmul.msk.f32.vlgmr.msra.gmra.mxu0 %vm861_vm10, %v2437_v40  ;;  %3788 = vmatmul.msk.f32.vlgmr.msra.gmra.mxu1 %vm861_vm10, %v2437_v40  ;;  %v4897_v40 = vpack.i.bf16 %v2665_v19, %v2666_v7 }
0x15eb   :  { %v2457_v43 = vpop.f32.mrf.mxu0  ;;  %v2477_v61 = vpop.f32.mrf.mxu1 }
0x15ec   :  { %v2482_v44 = vrot.slane %v2457_v43, 4  ;;  %v2483_v3 = vrot.slane %v2477_v61, 4  ;;  %v802_v61 = vld [vmem:[%s801_s29] ss:$8 sm:$0x3] }
0x15ee   :  { %v2486_v57 = vadd.f32 %v2482_v44, %v2433_v41  ;;  %v2487_v28 = vadd.f32 %v2483_v3, %v2434_v16  ;;  %v813_v3 = vld [vmem:[%s812_s10] ss:$8 sm:$0x3] }
0x15ef   :  { %v827_v16 = vld [vmem:[%s826_s11] ss:$8 sm:$0x3] }
0x15f0   :  { %v3789_v58 = vmul.f32 -1.442695, %v2486_v57  ;;  %v3790_v38 = vmul.f32 -1.442695, %v2487_v28 }
0x15f2   :  { %4086 = vpow2.f32 %v3789_v58 }
0x15f8   :  { %v4087_v55 = vpop.eup %4086 }
0x15f9   :  { %v2491_v53 = vadd.f32 1.0, %v4087_v55 }
0x15fb   :  { %4088 = vrcp.f32 %v2491_v53  ;;  %v2503_v31 = vand.u32 2147483648, %v2491_v53  ;;  %v2501_v33 = vand.u32 2147483647, %v2491_v53  ;;  %vm2497_vm12 = vweird.f32 %v2491_v53 }
0x15fc   :  { %4090 = vtanh.f32 %v2487_v28  ;;  %v838_v28 = vld [vmem:[%s837_s12] ss:$8 sm:$0x3] }
0x15fd   :  { %v2504_v45 = vor.u32 1.1754944e-38, %v2503_v31  ;;  %vm2502_vm14 = vcmp.eq.f32.partialorder %v2501_v33, 8.507059e+37  ;;  %4092 = vpow2.f32 %v3790_v38 }
0x1601   :  { %v4089_v26 = vpop.eup %4088 }
0x1602   :  { %v2493_v29 = vmul.f32 %v4089_v26, %v2491_v53  ;;  %vm2498_vm11 = vweird.f32 %v4089_v26  ;;  %v4091_v47 = vpop.eup %4090 }
0x1603   :  { %vm2499_vm13 = vmor %vm2497_vm12, %vm2498_vm11  ;;  %v4093_v52 = vpop.eup %4092 }
0x1604   :  { %v2494_v30 = vsub.f32 1.0, %v2493_v29  ;;  %v2511_v56 = vadd.f32 1.0, %v4093_v52  ;;  %v839_v29 = vadd.f32 %v838_v28, %v827_v16  ;;  %v2664_v52 = vld [vmem:[#allocation8 + $0x170] sm:$0xff] }
0x1605   :  { %2763 = vmatpush.msrb.mxu1 %v2664_v52 }
0x1606   :  { %v2495_v32 = vmul.f32 %v4089_v26, %v2494_v30  ;;  %4094 = vrcp.f32 %v2511_v56  ;;  %v2523_v59 = vand.u32 2147483648, %v2511_v56  ;;  %vm2517_vm1 = vweird.f32 %v2511_v56  ;;  %841 = vst.msk [vmem:[#allocation2 + $0x37] ss:$8 sm:$0x3] %vm4309_vm0, %v839_v29 }
0x1607   :  { %v2521_v22 = vand.u32 2147483647, %v2511_v56 }
0x1608   :  { %v2496_v34 = vadd.f32 %v4089_v26, %v2495_v32  ;;  %v2524_v25 = vor.u32 1.1754944e-38, %v2523_v59 }
0x1609   :  { %vm2522_vm4 = vcmp.eq.f32.partialorder %v2521_v22, 8.507059e+37 }
0x160a   :  { %v2500_v46 = vsel %vm2499_vm13, %v4089_v26, %v2496_v34  ;;  %v814_v26 = vadd.f32 %v813_v3, %v802_v61 }
0x160b   :  { %v2505_v48 = vsel %vm2502_vm14, %v2504_v45, %v2500_v46 }
0x160c   :  { %v2531_v49 = vmul.f32 %v4091_v47, %v2505_v48  ;;  %v2530_v50 = vmul.f32 %v2528_v35, %v2505_v48  ;;  %v4095_v0 = vpop.eup %4094  ;;  %816 = vst.msk [vmem:[#allocation2 + $0x36] ss:$8 sm:$0x3] %vm4309_vm0, %v814_v26 }
0x160d   :  { %v2513_v1 = vmul.f32 %v4095_v0, %v2511_v56  ;;  %vm2518_vm15 = vweird.f32 %v4095_v0  ;;  %v2663_v56 = vld [vmem:[#allocation8 + $0x160] sm:$0xff] }
0x160e   :  { %2533 = vrot.lane.b32.xlu1 %v2531_v49, %s5186_s0  ;;  %vm2519_vm2 = vmor %vm2517_vm1, %vm2518_vm15  ;;  %2764 = vmatpush.msrb.mxu1 %v2663_v56  ;;  %vm2695_vm15 = vcmask 261120   ;;  %vm2930_vm1 = vcmask 257024  }
0x1613   :  { %v2548_v34 = vld [vmem:[#allocation2 + $0x30] sm:$0xc0]  ;;  %v2549_v38 = vld [vmem:[#allocation2 + $0x38] sm:$0xc0] }
0x1616   :  { %1069 = vrot.lane.b32.xlu1 %v4411_v21, %s5186_s0 }
0x161e   :  { %2317 = vrot.lane.b32.xlu1 %v4842_v9, %s4200_s14  ;;  %v2514_v9 = vsub.f32 1.0, %v2513_v1 }
0x1620   :  { %v2515_v2 = vmul.f32 %v4095_v0, %v2514_v9 }
0x1626   :  { %1523 = vrot.lane.b32.xlu1 %v4568_v14, %s5186_s0 }
0x162e   :  { %1866 = vrot.lane.b32.xlu1 %v4695_v36, %s4200_s14  ;;  %v2516_v36 = vadd.f32 %v4095_v0, %v2515_v2 }
0x1630   :  { %v2520_v60 = vsel %vm2519_vm2, %v4095_v0, %v2516_v36  ;;  %vm2995_vm2 = vcmask 1041409  }
0x1631   :  { %v2525_v11 = vsel %vm2522_vm4, %v2524_v25, %v2520_v60  ;;  %vm2999_vm4 = vcmask 1043459  }
0x1636   :  { %2208 = vrot.lane.b32.xlu1 %v4827_v12, %s4200_s14 }
0x163e   :  { %1642 = vrot.lane.b32.xlu1 %v4613_v42, %s4200_s14 }
0x1680   :  { %v2534_v4 = vpop.permute.xlu1 %2533 }
0x1681   :  { %v4882_v6 = vadd.f32 %v2534_v4, %v2530_v50 }
0x1683   :  { %4096 = vtanh.f32 %v4882_v6  ;;  %v2643_v22 = vrot.slane %v4882_v6, 6 }
0x1688   :  { %v1070_v51 = vpop.permute.xlu1 %1069 }
0x1689   :  { %v4097_v10 = vpop.eup %4096  ;;  %1073 = vst.msk [vmem:[#allocation3] sm:$0xc] %vm1072_vm3, %v1070_v51 }
0x168a   :  { %v4886_v15 = vmul.f32 %v4097_v10, %v2525_v11 }
0x168c   :  { %v2550_v24 = vrot.slane %v4886_v15, 4 }
0x168e   :  { %2551 = vrot.lane.b32.xlu2 %v2550_v24, %s5186_s0  ;;  %v4938_v24 = vpack.i.bf16 %v2663_v56, %v2664_v52 }
0x1690   :  { %v2318_v18 = vpop.permute.xlu1 %2317 }
0x1691   :  { %2320 = vst.msk [vmem:[#allocation4 + $0x6] sm:$0x3] %vm959_vm9, %v2318_v18 }
0x1696   :  { %1185 = vrot.lane.b32.xlu2 %v4442_v27, %s5186_s0 }
0x1698   :  { %v1524_v37 = vpop.permute.xlu1 %1523 }
0x1699   :  { %1526 = vst.msk [vmem:[#allocation3 + $0x8] sm:$0xc] %vm1072_vm3, %v1524_v37 }
0x169e   :  { %2429 = vrot.lane.b32.xlu2 %v4858_v8, %s4200_s14 }
0x16a0   :  { %v1867_v39 = vpop.permute.xlu1 %1866 }
0x16a1   :  { %1869 = vst.msk [vmem:[#allocation4 + $0xe] sm:$0x3] %vm959_vm9, %v1867_v39 }
0x16a6   :  { %3893 = vrot.lane.b32.xlu2 %v4897_v40, %s4201_s15 }
0x16a8   :  { %v2209_v41 = vpop.permute.xlu1 %2208 }
0x16a9   :  { %2211 = vst.msk [vmem:[#allocation4 + $0x2] sm:$0xc0] %vm1304_vm5, %v2209_v41 }
0x16ae   :  { %1638 = vrot.lane.b32.xlu2 %v4613_v42, %s5186_s0 }
0x16b0   :  { %v1643_v43 = vpop.permute.xlu1 %1642 }
0x16b1   :  { %1645 = vst.msk [vmem:[#allocation4 + $0xe] sm:$0x30] %vm1188_vm6, %v1643_v43 }
0x16b6   :  { %1978 = vrot.lane.b32.xlu2 %v4765_v5, %s4200_s14 }
0x16be   :  { %1415 = vrot.lane.b32.xlu2 %v4536_v23, %s4200_s14 }
0x16c6   :  { %1757 = vrot.lane.b32.xlu2 %v4658_v54, %s4200_s14 }
0x16ce   :  { %2204 = vrot.lane.b32.xlu2 %v4827_v12, %s5186_s0 }
0x16d6   :  { %1190 = vrot.lane.b32.xlu2 %v4442_v27, %s4200_s14 }
0x16de   :  { %2540 = vrot.lane.b32.xlu2 %v4886_v15, %s5186_s0 }
0x16e8   :  { %v2552_v42 = vpop.permute.xlu2 %2551 }
0x16e9   :  { %3791 = vmatmul.msk.f32.vlgmr.msra.gmra.mxu2 %vm861_vm10, %v2552_v42  ;;  %3792 = vmatmul.msk.f32.vlgmr.msra.gmra.mxu3 %vm861_vm10, %v2552_v42 }
0x16f0   :  { %v1186_v44 = vpop.permute.xlu2 %1185 }
0x16f1   :  { %1189 = vst.msk [vmem:[#allocation3] sm:$0x30] %vm1188_vm6, %v1186_v44 }
0x16f8   :  { %v2430_v23 = vpop.permute.xlu2 %2429 }
0x16f9   :  { %2432 = vst.msk [vmem:[#allocation4 + $0x2] sm:$0xc] %vm1072_vm3, %v2430_v23 }
0x1700   :  { %v3894_v57 = vpop.permute.xlu2 %3893 }
0x1701   :  { %v3896_v58 = vunpack.i.h.bf16 %v3894_v57  ;;  %v3895_v12 = vunpack.i.l.bf16 %v3894_v57 }
0x1703   :  { %2720 = vmatpush.msrb.mxu0 %v3895_v12 }
0x1705   :  { %2721 = vmatpush.msrb.mxu0 %v3896_v58 }
0x1708   :  { %v1639_v27 = vpop.permute.xlu2 %1638 }
0x1709   :  { %1641 = vst.msk [vmem:[#allocation3 + $0x8] sm:$0x30] %vm1188_vm6, %v1639_v27 }
0x1710   :  { %v1979_v55 = vpop.permute.xlu2 %1978 }
0x1711   :  { %1981 = vst.msk [vmem:[#allocation4 + $0xa] sm:$0xc] %vm1072_vm3, %v1979_v55 }
0x1718   :  { %v1416_v53 = vpop.permute.xlu2 %1415 }
0x1719   :  { %1418 = vst.msk [vmem:[#allocation4 + $0x16] sm:$0x3] %vm959_vm9, %v1416_v53 }
0x1720   :  { %v1758_v30 = vpop.permute.xlu2 %1757 }
0x1721   :  { %1760 = vst.msk [vmem:[#allocation4 + $0xa] sm:$0xc0] %vm1304_vm5, %v1758_v30 }
0x1728   :  { %v2205_v31 = vpop.permute.xlu2 %2204 }
0x1729   :  { %2207 = vst.msk [vmem:[#allocation3 + $0x10] sm:$0xc0] %vm1304_vm5, %v2205_v31  ;;  %v2670_v31 = vld [vmem:[#allocation8 + $0x1a3] ss:$0 sm:$0xff] }
0x1730   :  { %v1191_v32 = vpop.permute.xlu2 %1190 }
0x1731   :  { %1193 = vst.msk [vmem:[#allocation4 + $0x16] sm:$0x30] %vm1188_vm6, %v1191_v32  ;;  %v3162_v32 = vshrl.u32 %v62_v13, 7 }
0x1738   :  { %v2541_v33 = vpop.permute.xlu2 %2540 }
0x1739   :  { %2543 = vst.msk [vmem:[#allocation3 + $0x18] sm:$0x30] %vm1188_vm6, %v2541_v33  ;;  %v2669_v33 = vld [vmem:[#allocation8 + $0x1a2] ss:$0 sm:$0xff] }
0x176c   :  { %v2572_v45 = vpop.f32.mrf.mxu2  ;;  %v2592_v49 = vpop.f32.mrf.mxu3 }
0x176d   :  { %v2597_v35 = vrot.slane %v2572_v45, 2  ;;  %v2598_v50 = vrot.slane %v2592_v49, 2 }
0x176f   :  { %v2601_v46 = vadd.f32 %v2597_v35, %v2548_v34  ;;  %v2602_v1 = vadd.f32 %v2598_v50, %v2549_v38  ;;  %v3169_v35 = vadd.s32 8, %v3162_v32  ;;  %v4203_v50 = vmov 1  }
0x1771   :  { %v3793_v47 = vmul.f32 -1.442695, %v2601_v46  ;;  %v3794_v6 = vmul.f32 -1.442695, %v2602_v1 }
0x1773   :  { %4098 = vpow2.f32 %v3793_v47 }
0x1779   :  { %v4099_v20 = vpop.eup %4098 }
0x177a   :  { %v2606_v48 = vadd.f32 1.0, %v4099_v20 }
0x177c   :  { %4100 = vrcp.f32 %v2606_v48  ;;  %v2618_v4 = vand.u32 2147483648, %v2606_v48  ;;  %v2616_v36 = vand.u32 2147483647, %v2606_v48  ;;  %vm2612_vm10 = vweird.f32 %v2606_v48 }
0x177d   :  { %4102 = vtanh.f32 %v2602_v1 }
0x177e   :  { %v2619_v19 = vor.u32 1.1754944e-38, %v2618_v4  ;;  %vm2617_vm8 = vcmp.eq.f32.partialorder %v2616_v36, 8.507059e+37  ;;  %4104 = vpow2.f32 %v3794_v6 }
0x1782   :  { %v4101_v0 = vpop.eup %4100 }
0x1783   :  { %v2608_v9 = vmul.f32 %v4101_v0, %v2606_v48  ;;  %vm2613_vm0 = vweird.f32 %v4101_v0  ;;  %v4103_v25 = vpop.eup %4102 }
0x1784   :  { %vm2614_vm7 = vmor %vm2612_vm10, %vm2613_vm0  ;;  %vm3005_vm0 = vcmask 1046534   ;;  %vm3007_vm10 = vcmask 1047559  }
0x1785   :  { %v2609_v2 = vsub.f32 1.0, %v2608_v9  ;;  %v2667_v9 = vld [vmem:[#allocation8 + $0x1a0] ss:$0 sm:$0xff] }
0x1787   :  { %v2610_v7 = vmul.f32 %v4101_v0, %v2609_v2 }
0x1789   :  { %v2611_v59 = vadd.f32 %v4101_v0, %v2610_v7  ;;  %v4204_v7 = vmov 1934713408  }
0x178a   :  { %v2818_v36 = vunpack.c.l.s4 %v4204_v7 }
0x178b   :  { %v2615_v60 = vsel %vm2614_vm7, %v4101_v0, %v2611_v59  ;;  %vm3096_vm7 = vcmask 25600  }
0x178c   :  { %v2620_v51 = vsel %vm2617_vm8, %v2619_v19, %v2615_v60  ;;  %vm3329_vm8 = vcmask 31744  }
0x178d   :  { %v2646_v10 = vmul.f32 %v4103_v25, %v2620_v51  ;;  %v2645_v11 = vmul.f32 %v2643_v22, %v2620_v51  ;;  %v2819_v22 = vunpack.c.0.s8 %v2818_v36 }
0x178f   :  { %2648 = vrot.lane.b32.xlu0 %v2646_v10, %s5186_s0 }
0x1797   :  { %1301 = vrot.lane.b32.xlu0 %v4473_v62, %s5186_s0 }
0x179f   :  { %2544 = vrot.lane.b32.xlu0 %v4886_v15, %s4200_s14  ;;  %v4105_v15 = vpop.eup %4104 }
0x17a0   :  { %v2626_v18 = vadd.f32 1.0, %v4105_v15 }
0x17a2   :  { %4106 = vrcp.f32 %v2626_v18  ;;  %vm2632_vm12 = vweird.f32 %v2626_v18 }
0x17a7   :  { %3898 = vrot.lane.b32.xlu0 %v4938_v24, %s4201_s15 }
0x17af   :  { %1753 = vrot.lane.b32.xlu0 %v4658_v54, %s5186_s0  ;;  %v4107_v54 = vpop.eup %4106 }
0x17b0   :  { %v2628_v37 = vmul.f32 %v4107_v54, %v2626_v18  ;;  %vm2633_vm11 = vweird.f32 %v4107_v54 }
0x17b1   :  { %vm2634_vm13 = vmor %vm2632_vm12, %vm2633_vm11 }
0x17b2   :  { %v2629_v39 = vsub.f32 1.0, %v2628_v37 }
0x17b4   :  { %v2630_v41 = vmul.f32 %v4107_v54, %v2629_v39 }
0x17b6   :  { %v2631_v42 = vadd.f32 %v4107_v54, %v2630_v41 }
0x17b7   :  { %2093 = vrot.lane.b32.xlu0 %v4796_v17, %s4200_s14 }
0x17b8   :  { %v2635_v44 = vsel %vm2634_vm13, %v4107_v54, %v2631_v42 }
0x17bf   :  { %1527 = vrot.lane.b32.xlu0 %v4568_v14, %s4200_s14 }
0x17c7   :  { %1974 = vrot.lane.b32.xlu0 %v4765_v5, %s5186_s0  ;;  %v2638_v5 = vand.u32 2147483648, %v2626_v18 }
0x17cf   :  { %961 = vrot.lane.b32.xlu0 %v4379_v63, %s4200_s14  ;;  %v2636_v63 = vand.u32 2147483647, %v2626_v18 }
0x17d1   :  { %vm2637_vm14 = vcmp.eq.f32.partialorder %v2636_v63, 8.507059e+37 }
0x17d7   :  { %1306 = vrot.lane.b32.xlu0 %v4473_v62, %s4200_s14  ;;  %v2639_v62 = vor.u32 1.1754944e-38, %v2638_v5 }
0x17d9   :  { %v2640_v58 = vsel %vm2637_vm14, %v2639_v62, %v2635_v44 }
0x1801   :  { %v2649_v43 = vpop.permute.xlu0 %2648 }
0x1802   :  { %v2651_v14 = vadd.f32 %v2649_v43, %v2645_v11 }
0x1804   :  { %4108 = vtanh.f32 %v2651_v14 }
0x1809   :  { %v1302_v23 = vpop.permute.xlu0 %1301 }
0x180a   :  { %v4109_v57 = vpop.eup %4108  ;;  %1305 = vst.msk [vmem:[#allocation3] sm:$0xc0] %vm1304_vm5, %v1302_v23 }
0x180b   :  { %v2653_v12 = vmul.f32 %v4109_v57, %v2640_v58 }
0x180d   :  { %2655 = vrot.lane.b32.xlu0 %v2653_v12, %s5186_s0  ;;  %2659 = vrot.lane.b32.xlu1 %v2653_v12, %s4200_s14 }
0x1811   :  { %v2545_v27 = vpop.permute.xlu0 %2544  ;;  %v2671_v55 = vld [vmem:[#allocation3] sm:$0xff] }
0x1812   :  { %2547 = vst.msk [vmem:[#allocation4 - $0x2] sm:$0x30] %vm1188_vm6, %v2545_v27  ;;  %3799 = vmatmul.msk.f32.vlgmr.msrb.gmra.mxu1 %vm2695_vm15, %v2671_v55 }
0x1815   :  { %2089 = vrot.lane.b32.xlu1 %v4796_v17, %s5186_s0 }
0x1819   :  { %v3899_v53 = vpop.permute.xlu0 %3898 }
0x181a   :  { %v3901_v61 = vunpack.i.h.bf16 %v3899_v53  ;;  %v3900_v3 = vunpack.i.l.bf16 %v3899_v53 }
0x181c   :  { %2722 = vmatpush.msrb.mxu0 %v3900_v3 }
0x181d   :  { %1074 = vrot.lane.b32.xlu1 %v4411_v21, %s4200_s14 }
0x181e   :  { %2723 = vmatpush.msrb.mxu0 %v3901_v61 }
0x1821   :  { %v1754_v16 = vpop.permute.xlu0 %1753 }
0x1822   :  { %1756 = vst.msk [vmem:[#allocation3 + $0x8] sm:$0xc0] %vm1304_vm5, %v1754_v16 }
0x1825   :  { %2425 = vrot.lane.b32.xlu1 %v4858_v8, %s5186_s0  ;;  %v4202_v8 = vmov 0  }
0x1826   :  { %3902 = vset.pattern.permute.xlu0 %v4202_v8  ;;  %3916 = vset.pattern.permute.xlu1 %v4202_v8 }
0x1827   :  { %3081 = vperm.xlu0 %3902, %v2670_v31  }
0x1829   :  { %v2094_v26 = vpop.permute.xlu0 %2093  ;;  %v2672_v28 = vld [vmem:[#allocation3 + $0x8] sm:$0xff] }
0x182a   :  { %2096 = vst.msk [vmem:[#allocation4 + $0x6] sm:$0x30] %vm1188_vm6, %v2094_v26  ;;  %3800 = vmatmul.msk.f32.gmra.mxu1 %vm2695_vm15, %v2672_v28 }
0x182f   :  { %3903 = vset.pattern.permute.xlu0 %v3162_v32 }
0x1831   :  { %v1528_v17 = vpop.permute.xlu0 %1527  ;;  %v2676_v49 = vld [vmem:[#allocation4 + $0x8] sm:$0xff] }
0x1832   :  { %1530 = vst.msk [vmem:[#allocation4 + $0x12] sm:$0xc] %vm1072_vm3, %v1528_v17 }
0x1837   :  { %3165 = vperm.xlu0 %3903, %v2669_v33  }
0x1839   :  { %v1975_v29 = vpop.permute.xlu0 %1974  ;;  %v2677_v52 = vld [vmem:[#allocation4 + $0x10] sm:$0xff] }
0x183a   :  { %1977 = vst.msk [vmem:[#allocation3 + $0x10] sm:$0xc] %vm1072_vm3, %v1975_v29 }
0x183f   :  { %3904 = vset.pattern.permute.xlu0 %v3169_v35 }
0x1841   :  { %v962_v21 = vpop.permute.xlu0 %961 }
0x1842   :  { %964 = vst.msk [vmem:[#allocation4 + $0x1e] sm:$0x3] %vm959_vm9, %v962_v21  ;;  %vm2815_vm9 = vcmask 1047556  }
0x1847   :  { %3171 = vperm.xlu0 %3904, %v2669_v33  }
0x1849   :  { %v1307_v30 = vpop.permute.xlu0 %1306 }
0x184a   :  { %1309 = vst.msk [vmem:[#allocation4 + $0x12] sm:$0xc0] %vm1304_vm5, %v1307_v30 }
0x184f   :  { %3915 = vset.pattern.permute.xlu0 %v4203_v50 }
0x1850   :  { %3297 = vperm.xlu0 %3915, %v2670_v31  }
0x1858   :  { %3917 = vset.pattern.permute.xlu0 %v4202_v8 }
0x187f   :  { %v2656_v34 = vpop.permute.xlu0 %2655  ;;  %v2660_v45 = vpop.permute.xlu1 %2659 }
0x1880   :  { %2658 = vst.msk [vmem:[#allocation3 + $0x18] sm:$0xc0] %vm1304_vm5, %v2656_v34 }
0x1881   :  { %2662 = vst.msk [vmem:[#allocation4 - $0x6] sm:$0xc0] %vm1304_vm5, %v2660_v45  ;;  %vm3001_vm5 = vcmask 1044484  }
0x1887   :  { %v2090_v46 = vpop.permute.xlu1 %2089 }
0x1888   :  { %2092 = vst.msk [vmem:[#allocation3 + $0x10] sm:$0x30] %vm1188_vm6, %v2090_v46  ;;  %v2675_v47 = vld [vmem:[#allocation4] sm:$0xff]  ;;  %vm3003_vm6 = vcmask 1045509  }
0x1889   :  { %3795 = vmatmul.msk.f32.vlgmr.msrb.gmra.mxu0 %vm2695_vm15, %v2675_v47 }
0x188f   :  { %v1075_v20 = vpop.permute.xlu1 %1074  ;;  %v2673_v48 = vld [vmem:[#allocation3 + $0x10] sm:$0xff]  ;;  %v2766_v1 = vpop.f32.mrf.mxu1 }
0x1890   :  { %1077 = vst.msk [vmem:[#allocation4 + $0x1a] sm:$0xc] %vm1072_vm3, %v1075_v20  ;;  %3801 = vmatmul.msk.f32.gmra.mxu1 %vm2695_vm15, %v2673_v48 }
0x1891   :  { %3796 = vmatmul.msk.f32.gmra.mxu0 %vm2695_vm15, %v2676_v49 }
0x1897   :  { %v2426_v38 = vpop.permute.xlu1 %2425  ;;  %v2678_v0 = vld [vmem:[#allocation4 + $0x18] sm:$0xff] }
0x1898   :  { %2428 = vst.msk [vmem:[#allocation3 + $0x18] sm:$0xc] %vm1072_vm3, %v2426_v38  ;;  %vm2997_vm3 = vcmask 1042434  }
0x1899   :  { %3797 = vmatmul.msk.f32.gmra.mxu0 %vm2695_vm15, %v2677_v52  ;;  %v5009_v35 = vpop.permute.xlu0 %3081 }
0x189f   :  { %v2674_v56 = vld [vmem:[#allocation3 + $0x18] sm:$0xff] }
0x18a0   :  { %3802 = vmatmul.msk.f32.gmra.mxu1 %vm2695_vm15, %v2674_v56 }
0x18a1   :  { %3798 = vmatmul.msk.f32.gmra.mxu0 %vm2695_vm15, %v2678_v0 }
0x18a7   :  { %v2769_v60 = vpop.f32.mrf.mxu1 }
0x1906   :  { %v2725_v2 = vpop.f32.mrf.mxu0 }
0x1907   :  { %v2767_v4 = vadd.f32 %v2766_v1, %v2725_v2 }
0x1909   :  { %v2778_v59 = vadd.f32 %v2767_v4, %v2667_v9 }
0x190b   :  { %v2782_v19 = vmax.f32 %v2778_v59, 0.0 }
0x190d   :  { %v2791_v25 = vrot.slane %v2782_v19, 4  ;;  %v3803_v51 = vrot.slane %v2782_v19, 6  ;;  %v3804_v10 = vrot.slane %v2782_v19, 10  ;;  %v2772_v5 = vpop.f32.mrf.mxu1 }
0x190e   :  { %v2728_v11 = vpop.f32.mrf.mxu0 }
0x190f   :  { %v2816_v6 = vsel %vm2815_vm9, %v3803_v51, %v2782_v19  ;;  %v2770_v15 = vadd.f32 %v2769_v60, %v2728_v11  ;;  %v2824_v18 = vsel %vm2815_vm9, %v3804_v10, %v2791_v25  ;;  %v4205_v10 = vmov 269488144  }
0x1910   :  { %v4986_v54 = vperm.slane %v2816_v6, %v2819_v22  ;;  %v4988_v37 = vperm.slane %v2824_v18, %v2819_v22  ;;  %v3176_v11 = vunpack.c.l.s4 %v4205_v10  ;;  %v4206_v6 = vmov 842150450   ;;  %v3166_v18 = vpop.permute.xlu0 %3165 }
0x1911   :  { %v2779_v39 = vadd.f32 %v2770_v15, %v2667_v9  ;;  %v3180_v15 = vunpack.c.l.s4 %v4206_v6 }
0x1912   :  { %2895 = vst [vmem:[#allocation1] ss:$4 sm:$0xff] %v4986_v54  ;;  %v2821_v50 = vrot.slane %v4986_v54, 4  ;;  %v2829_v0 = vrot.slane %v4988_v37, 4 }
0x1913   :  { %v2783_v41 = vmax.f32 %v2779_v39, 0.0  ;;  %2897 = vst [vmem:[#allocation1 + $0x1] ss:$4 sm:$0xff] %v4988_v37 }
0x1914   :  { %v5021_v7 = vsel %vm2815_vm9, 0.0, %v2821_v50  ;;  %v5026_v19 = vsel %vm2815_vm9, 0.0, %v2829_v0 }
0x1915   :  { %v2794_v43 = vrot.slane %v2783_v41, 4  ;;  %v3805_v14 = vrot.slane %v2783_v41, 6  ;;  %v3806_v42 = vrot.slane %v2783_v41, 10 }
0x1916   :  { %v2731_v63 = vpop.f32.mrf.mxu0 }
0x1917   :  { %v2832_v44 = vsel %vm2815_vm9, %v3805_v14, %v2783_v41  ;;  %v2840_v62 = vsel %vm2815_vm9, %v3806_v42, %v2794_v43  ;;  %v2773_v23 = vadd.f32 %v2772_v5, %v2731_v63  ;;  %v4207_v5 = vmov 1414812756  }
0x1918   :  { %v4994_v57 = vperm.slane %v2832_v44, %v2819_v22  ;;  %v4996_v58 = vperm.slane %v2840_v62, %v2819_v22  ;;  %v3184_v63 = vunpack.c.l.s4 %v4207_v5  ;;  %v4208_v44 = vmov 1987475062  }
0x1919   :  { %v2780_v12 = vadd.f32 %v2773_v23, %v2667_v9  ;;  %v5034_v62 = vunpack.c.l.s4 %v4208_v44 }
0x191a   :  { %2900 = vst [vmem:[#allocation1 + $0x20] ss:$4 sm:$0xff] %v4994_v57  ;;  %v2898_v27 = vld.sshfl [vmem:[#allocation1] sm:$0xff pattern:$0x73625140]  ;;  %v2837_v39 = vrot.slane %v4994_v57, 4 }
0x191b   :  { %2902 = vst [vmem:[#allocation1 + $0x21] ss:$4 sm:$0xff] %v4996_v58  ;;  %v2784_v55 = vmax.f32 %v2780_v12, 0.0  ;;  %v2931_v53 = vsel %vm2930_vm1, %v2898_v27, -inf  ;;  %v2845_v41 = vrot.slane %v4996_v58, 4 }
0x191c   :  { %v2932_v17 = vrot.slane %v2931_v53, 4 }
0x191d   :  { %v2797_v61 = vrot.slane %v2784_v55, 4  ;;  %v3807_v3 = vrot.slane %v2784_v55, 6  ;;  %v2775_v16 = vpop.f32.mrf.mxu1  ;;  %v3808_v26 = vrot.slane %v2784_v55, 10 }
0x191e   :  { %v2734_v28 = vpop.f32.mrf.mxu0  ;;  %v2933_v33 = vmax.f32 %v2931_v53, %v2932_v17  ;;  %v3177_v53 = vunpack.c.0.s8 %v3176_v11 }
0x191f   :  { %v2848_v29 = vsel %vm2815_vm9, %v3807_v3, %v2784_v55  ;;  %v2776_v21 = vadd.f32 %v2775_v16, %v2734_v28  ;;  %v2856_v31 = vsel %vm2815_vm9, %v3808_v26, %v2797_v61  ;;  %v3181_v61 = vunpack.c.0.s8 %v3180_v15 }
0x1920   :  { %v5002_v30 = vperm.slane %v2848_v29, %v2819_v22  ;;  %v5005_v32 = vperm.slane %v2856_v31, %v2819_v22  ;;  %v2934_v49 = vrot.slane %v2933_v33, 2  ;;  %v5040_v3 = vsel %vm2815_vm9, 0.0, %v2837_v39 }
0x1921   :  { %v2781_v8 = vadd.f32 %v2776_v21, %v2667_v9  ;;  %v5043_v16 = vsel %vm2815_vm9, 0.0, %v2845_v41  ;;  %v3185_v31 = vunpack.c.0.s8 %v3184_v63  ;;  %v5060_v50 = vperm.slane %v3166_v18, %v3177_v53 }
0x1922   :  { %v2903_v34 = vld.sshfl [vmem:[#allocation1 + $0x20] sm:$0xff pattern:$0x73625140]  ;;  %2904 = vst [vmem:[#allocation1] ss:$4 sm:$0xff] %v5002_v30  ;;  %v2935_v4 = vmax.f32 %v2933_v33, %v2934_v49  ;;  %v2853_v43 = vrot.slane %v5002_v30, 4 }
0x1923   :  { %v2785_v45 = vmax.f32 %v2781_v8, 0.0  ;;  %2905 = vst [vmem:[#allocation1 + $0x1] ss:$4 sm:$0xff] %v5005_v32  ;;  %v2938_v46 = vsel %vm2930_vm1, %v2903_v34, -inf  ;;  %v2861_v23 = vrot.slane %v5005_v32, 4  ;;  %v3189_v34 = vunpack.c.0.s8 %v5034_v62 }
0x1924   :  { %v2939_v38 = vrot.slane %v2938_v46, 4  ;;  %v5046_v28 = vsel %vm2815_vm9, 0.0, %v2853_v43  ;;  %v5065_v0 = vperm.slane %v3166_v18, %v3185_v31  ;;  %v3215_v39 = vmul.f32 %v5060_v50, %v4986_v54 }
0x1925   :  { %v2800_v47 = vrot.slane %v2785_v45, 4  ;;  %v3809_v20 = vrot.slane %v2785_v45, 6  ;;  %v3810_v48 = vrot.slane %v2785_v45, 10 }
0x1926   :  { %v2940_v2 = vmax.f32 %v2938_v46, %v2939_v38  ;;  %v5062_v38 = vperm.slane %v3166_v18, %v3181_v61  ;;  %v3217_v54 = vmul.f32 %v5065_v0, %v4994_v57 }
0x1927   :  { %v2864_v52 = vsel %vm2815_vm9, %v3809_v20, %v2785_v45  ;;  %v2872_v56 = vsel %vm2815_vm9, %v3810_v48, %v2800_v47  ;;  %v5055_v45 = vsel %vm2815_vm9, 0.0, %v2861_v23  ;;  %v3172_v20 = vpop.permute.xlu0 %3171 }
0x1928   :  { %v5016_v1 = vperm.slane %v2864_v52, %v2819_v22  ;;  %v5018_v9 = vperm.slane %v2872_v56, %v2819_v22  ;;  %v2941_v59 = vrot.slane %v2940_v2, 2  ;;  %v2936_v22 = vrot.slane %v2935_v4, 1 }
0x1929   :  { %v5077_v10 = vperm.slane %v3172_v20, %v3185_v31  ;;  %v3216_v44 = vmul.f32 %v5062_v38, %v4988_v37 }
0x192a   :  { %2907 = vst [vmem:[#allocation1 + $0x20] ss:$4 sm:$0xff] %v5016_v1  ;;  %v2906_v36 = vld.sshfl [vmem:[#allocation1] sm:$0xff pattern:$0x73625140]  ;;  %v2942_v25 = vmax.f32 %v2940_v2, %v2941_v59  ;;  %v5037_v12 = vmax.f32 %v2935_v4, %v2936_v22  ;;  %v2869_v52 = vrot.slane %v5016_v1, 4  ;;  %v5068_v59 = vperm.slane %v3166_v18, %v3189_v34 }
0x192b   :  { %2908 = vst [vmem:[#allocation1 + $0x21] ss:$4 sm:$0xff] %v5018_v9  ;;  %v2945_v60 = vsel %vm2930_vm1, %v2906_v36, -inf  ;;  %v2877_v2 = vrot.slane %v5018_v9, 4  ;;  %v5072_v22 = vperm.slane %v3172_v20, %v3181_v61 }
0x192c   :  { %2910 = vst [vmem:[#allocation1] ss:$4 sm:$0xff] %v5021_v7  ;;  %v2946_v51 = vrot.slane %v2945_v60, 4  ;;  %v2943_v14 = vrot.slane %v2942_v25, 1  ;;  %v5083_v18 = vsel %vm2815_vm9, 0.0, %v2869_v52  ;;  %v3218_v62 = vmul.f32 %v5068_v59, %v4996_v58 }
0x192d   :  { %2911 = vst [vmem:[#allocation1 + $0x1] ss:$4 sm:$0xff] %v5026_v19 }
0x192e   :  { %v2947_v42 = vmax.f32 %v2945_v60, %v2946_v51  ;;  %v2944_v27 = vmax.f32 %v2942_v25, %v2943_v14  ;;  %v5070_v60 = vperm.slane %v3172_v20, %v3177_v53  ;;  %v5074_v25 = vld [vmem:[#allocation8 + $0x1a1] ss:$0 sm:$0xff]  ;;  %v5087_v14 = vsel %vm2815_vm9, 0.0, %v2877_v2 }
0x192f   :  { %v3043_v57 = vmul.f32 %v5037_v12, %v5074_v25 }
0x1930   :  { %v2948_v55 = vrot.slane %v2947_v42, 2  ;;  %v2996_v21 = vsel %vm2995_vm2, %v2944_v27, %v5037_v12  ;;  %v3044_v6 = vmul.f32 %v2944_v27, %v5074_v25  ;;  %v3219_v52 = vmul.f32 %v5070_v60, %v5002_v30 }
0x1932   :  { %v2909_v26 = vld.sshfl [vmem:[#allocation1 + $0x20] sm:$0xff pattern:$0x73625140]  ;;  %v2949_v17 = vmax.f32 %v2947_v42, %v2948_v55  ;;  %v3059_v53 = vrot.slane %v3044_v6, 7 }
0x1933   :  { %2913 = vst [vmem:[#allocation1 + $0x20] ss:$4 sm:$0xff] %v5040_v3  ;;  %v2952_v29 = vsel %vm2930_vm1, %v2909_v26, -inf }
0x1934   :  { %v2912_v8 = vld.sshfl [vmem:[#allocation1] sm:$0xff pattern:$0x73625140]  ;;  %2914 = vst [vmem:[#allocation1 + $0x21] ss:$4 sm:$0xff] %v5043_v16  ;;  %v2953_v33 = vrot.slane %v2952_v29, 4 }
0x1935   :  { %2916 = vst [vmem:[#allocation1] ss:$4 sm:$0xff] %v5046_v28  ;;  %v2950_v46 = vrot.slane %v2949_v17, 1  ;;  %v2959_v47 = vsel %vm2930_vm1, %v2912_v8, -inf }
0x1936   :  { %2917 = vst [vmem:[#allocation1 + $0x1] ss:$4 sm:$0xff] %v5055_v45  ;;  %v2954_v48 = vmax.f32 %v2952_v29, %v2953_v33  ;;  %v2960_v49 = vrot.slane %v2959_v47, 4 }
0x1937   :  { %v2951_v56 = vmax.f32 %v2949_v17, %v2950_v46  ;;  %v3206_v46 = vperm.slane %v3172_v20, %v3189_v34 }
0x1938   :  { %v2955_v4 = vrot.slane %v2954_v48, 2  ;;  %v2961_v36 = vmax.f32 %v2959_v47, %v2960_v49  ;;  %v3060_v47 = vsel %vm2995_vm2, %v3059_v53, %v3043_v57 }
0x1939   :  { %v2998_v51 = vsel %vm2997_vm3, %v2951_v56, %v2996_v21  ;;  %v3045_v43 = vmul.f32 %v2951_v56, %v5074_v25 }
0x193a   :  { %v2956_v11 = vmax.f32 %v2954_v48, %v2955_v4  ;;  %v2962_v15 = vrot.slane %v2961_v36, 2 }
0x193b   :  { %v2915_v41 = vld.sshfl [vmem:[#allocation1 + $0x20] sm:$0xff pattern:$0x73625140]  ;;  %v3061_v17 = vrot.slane %v3045_v43, 6  ;;  %v3224_v43 = vmul.f32 %v5062_v38, %v5026_v19 }
0x193c   :  { %2919 = vst [vmem:[#allocation1 + $0x20] ss:$4 sm:$0xff] %v5083_v18  ;;  %v2957_v42 = vrot.slane %v2956_v11, 1  ;;  %v2963_v5 = vmax.f32 %v2961_v36, %v2962_v15  ;;  %v2966_v63 = vsel %vm2930_vm1, %v2915_v41, -inf  ;;  %v3220_v36 = vmul.f32 %v5072_v22, %v5005_v32 }
0x193d   :  { %v2918_v23 = vld.sshfl [vmem:[#allocation1] sm:$0xff pattern:$0x73625140]  ;;  %2920 = vst [vmem:[#allocation1 + $0x21] ss:$4 sm:$0xff] %v5087_v14  ;;  %v2967_v27 = vrot.slane %v2966_v63, 4  ;;  %v3062_v56 = vsel %vm2997_vm3, %v3061_v17, %v3060_v47  ;;  %v3222_v15 = vmul.f32 %v3206_v46, %v5018_v9  ;;  %v3223_v32 = vmul.f32 %v5060_v50, %v5021_v7 }
0x193e   :  { %3247 = vst [vmem:[#allocation1] ss:$4 sm:$0xff] %v3215_v39  ;;  %v2958_v55 = vmax.f32 %v2956_v11, %v2957_v42  ;;  %v2964_v61 = vrot.slane %v2963_v5, 1  ;;  %v2973_v26 = vsel %vm2930_vm1, %v2918_v23, -inf  ;;  %v3225_v9 = vmul.f32 %v5065_v0, %v5040_v3 }
0x193f   :  { %3249 = vst [vmem:[#allocation1 + $0x1] ss:$4 sm:$0xff] %v3216_v44  ;;  %v2968_v37 = vmax.f32 %v2966_v63, %v2967_v27  ;;  %v2974_v29 = vrot.slane %v2973_v26, 4  ;;  %v3227_v23 = vmul.f32 %v5070_v60, %v5046_v28  ;;  %v3228_v27 = vmul.f32 %v5072_v22, %v5055_v45 }
0x1940   :  { %3251 = vst [vmem:[#allocation1 + $0x2] ss:$4 sm:$0xff] %v3217_v54  ;;  %v3046_v58 = vmul.f32 %v2958_v55, %v5074_v25  ;;  %v2965_v21 = vmax.f32 %v2963_v5, %v2964_v61  ;;  %v3000_v31 = vsel %vm2999_vm4, %v2958_v55, %v2998_v51  ;;  %v3221_v51 = vmul.f32 %v5077_v10, %v5016_v1 }
0x1941   :  { %3253 = vst [vmem:[#allocation1 + $0x3] ss:$4 sm:$0xff] %v3218_v62  ;;  %v2969_v8 = vrot.slane %v2968_v37, 2  ;;  %v2975_v33 = vmax.f32 %v2973_v26, %v2974_v29  ;;  %v3226_v54 = vmul.f32 %v5068_v59, %v5043_v16  ;;  %v3229_v16 = vmul.f32 %v5077_v10, %v5083_v18 }
0x1942   :  { %v3063_v48 = vrot.slane %v3046_v58, 5  ;;  %v3002_v49 = vsel %vm3001_vm5, %v2965_v21, %v3000_v31  ;;  %v3047_v53 = vmul.f32 %v2965_v21, %v5074_v25  ;;  %v3230_v28 = vmul.f32 %v3206_v46, %v5087_v14 }
0x1943   :  { %v2970_v2 = vmax.f32 %v2968_v37, %v2969_v8  ;;  %v2976_v12 = vrot.slane %v2975_v33, 2  ;;  %v5147_v31 = vand.u32 127, %v62_v13 }
0x1944   :  { %v2921_v4 = vld.sshfl [vmem:[#allocation1 + $0x20] sm:$0xff pattern:$0x73625140]  ;;  %v3064_v34 = vsel %vm2999_vm4, %v3063_v48, %v3062_v56 }
0x1945   :  { %3255 = vst [vmem:[#allocation1 + $0x20] ss:$4 sm:$0xff] %v3219_v52  ;;  %v3073_v20 = vsel %vm2930_vm1, %v3064_v34, 0.0  ;;  %v2971_v11 = vrot.slane %v2970_v2, 1  ;;  %v2977_v6 = vmax.f32 %v2975_v33, %v2976_v12  ;;  %v2980_v30 = vsel %vm2930_vm1, %v2921_v4, -inf }
0x1946   :  { %3257 = vst [vmem:[#allocation1 + $0x21] ss:$4 sm:$0xff] %v3220_v36  ;;  %3074 = vadd.xlane.f32.xlu1 %v3073_v20  ;;  %v2981_v39 = vrot.slane %v2980_v30, 4 }
0x1947   :  { %3259 = vst [vmem:[#allocation1 + $0x22] ss:$4 sm:$0xff] %v3221_v51  ;;  %v2972_v1 = vmax.f32 %v2970_v2, %v2971_v11  ;;  %v2978_v41 = vrot.slane %v2977_v6, 1 }
0x1948   :  { %3261 = vst [vmem:[#allocation1 + $0x23] ss:$4 sm:$0xff] %v3222_v15  ;;  %v2982_v42 = vmax.f32 %v2980_v30, %v2981_v39  ;;  %v3262_v5 = vld.sshfl [vmem:[#allocation1] sm:$0xff pattern:$0x73625140] }
0x1949   :  { %v2979_v63 = vmax.f32 %v2977_v6, %v2978_v41  ;;  %3264 = vst [vmem:[#allocation1] ss:$4 sm:$0xff] %v3223_v32  ;;  %v3004_v44 = vsel %vm3003_vm6, %v2972_v1, %v3002_v49  ;;  %v3048_v50 = vmul.f32 %v2972_v1, %v5074_v25  ;;  %v3278_v61 = vsel %vm2695_vm15, %v3262_v5, 0.0 }
0x194a   :  { %v2983_v7 = vrot.slane %v2982_v42, 2  ;;  %3265 = vst [vmem:[#allocation1 + $0x1] ss:$4 sm:$0xff] %v3224_v43 }
0x194b   :  { %3266 = vst [vmem:[#allocation1 + $0x2] ss:$4 sm:$0xff] %v3225_v9  ;;  %v3006_v62 = vsel %vm3005_vm0, %v2979_v63, %v3004_v44  ;;  %v3049_v38 = vmul.f32 %v2979_v63, %v5074_v25  ;;  %v3065_v0 = vrot.slane %v3048_v50, 7 }
0x194c   :  { %v2984_v19 = vmax.f32 %v2982_v42, %v2983_v7  ;;  %3267 = vst [vmem:[#allocation1 + $0x3] ss:$4 sm:$0xff] %v3226_v54  ;;  %v3298_v7 = vpop.permute.xlu0 %3297 }
0x194d   :  { %v3067_v60 = vrot.slane %v3049_v38, 6  ;;  %v3066_v22 = vsel %vm2995_vm2, %v3065_v0, %v3047_v53 }
0x194e   :  { %v2985_v3 = vrot.slane %v2984_v19, 1 }
0x194f   :  { %v3263_v59 = vld.sshfl [vmem:[#allocation1 + $0x20] sm:$0xff pattern:$0x73625140]  ;;  %v3068_v37 = vsel %vm2997_vm3, %v3067_v60, %v3066_v22 }
0x1950   :  { %v2986_v55 = vmax.f32 %v2984_v19, %v2985_v3  ;;  %3268 = vst [vmem:[#allocation1 + $0x20] ss:$4 sm:$0xff] %v3227_v23  ;;  %v3279_v26 = vsel %vm2695_vm15, %v3263_v59, 0.0 }
0x1951   :  { %3269 = vst [vmem:[#allocation1 + $0x21] ss:$4 sm:$0xff] %v3228_v27  ;;  %v3280_v17 = vadd.f32 %v3279_v26, %v3278_v61 }
0x1952   :  { %v3050_v45 = vmul.f32 %v2986_v55, %v5074_v25  ;;  %3270 = vst [vmem:[#allocation1 + $0x22] ss:$4 sm:$0xff] %v3229_v16  ;;  %v5137_v10 = vsel %vm3007_vm10, %v2986_v55, %v3006_v62 }
0x1953   :  { %3271 = vst [vmem:[#allocation1 + $0x23] ss:$4 sm:$0xff] %v3230_v28  ;;  %v3272_v56 = vld.sshfl [vmem:[#allocation1] sm:$0xff pattern:$0x73625140]  ;;  %v3281_v51 = vrot.slane %v3280_v17, 4 }
0x1954   :  { %v3069_v18 = vrot.slane %v3050_v45, 5  ;;  %v3287_v12 = vsel %vm2695_vm15, %v3272_v56, 0.0 }
0x1955   :  { %v3282_v20 = vadd.f32 %v3281_v51, %v3280_v17 }
0x1956   :  { %v3070_v29 = vsel %vm2999_vm4, %v3069_v18, %v3068_v37 }
0x1957   :  { %v3076_v57 = vsel %vm2930_vm1, %v3070_v29, 0.0 }
0x1958   :  { %3077 = vadd.xlane.f32.xlu2 %v3076_v57 }
0x195f   :  { %3906 = vrot.lane.b32.xlu1 %v4897_v40, %s5186_s0 }
0x19b9   :  { %v3075_v14 = vpop.xlane.xlu1 %3074 }
0x19ba   :  { %v3084_v25 = vadd.f32 %v5009_v35, %v3075_v14 }
0x19bc   :  { %4110 = vtanh.f32 %v3084_v25 }
0x19c2   :  { %v4111_v8 = vpop.eup %4110 }
0x19c3   :  { %v3092_v46 = vperm.slane %v4111_v8, %v5147_v31 }
0x19cb   :  { %v3078_v58 = vpop.xlane.xlu2 %3077 }
0x19cc   :  { %v3085_v21 = vadd.f32 %v5009_v35, %v3078_v58  ;;  %v3273_v35 = vld.sshfl [vmem:[#allocation1 + $0x20] sm:$0xff pattern:$0x73625140] }
0x19cd   :  { %v3288_v2 = vsel %vm2695_vm15, %v3273_v35, 0.0 }
0x19ce   :  { %4112 = vtanh.f32 %v3085_v21  ;;  %v3289_v4 = vadd.f32 %v3288_v2, %v3287_v12 }
0x19d0   :  { %v3290_v36 = vrot.slane %v3289_v4, 4 }
0x19d1   :  { %v3907_v49 = vpop.permute.xlu1 %3906 }
0x19d2   :  { %v3909_v52 = vunpack.i.h.bf16 %v3907_v49  ;;  %v3908_v13 = vunpack.i.l.bf16 %v3907_v49  ;;  %v3291_v34 = vadd.f32 %v3290_v36, %v3289_v4 }
0x19d4   :  { %v4113_v33 = vpop.eup %4112  ;;  %3035 = vmatpush.msrb.mxu2 %v3908_v13  ;;  %3319 = vmatpush.msrb.mxu3 %v3908_v13  ;;  %v3292_v11 = vrot.slane %v3291_v34, 2 }
0x19d5   :  { %v3093_v47 = vperm.slane %v4113_v33, %v5147_v31 }
0x19d6   :  { %3036 = vmatpush.msrb.mxu2 %v3909_v52  ;;  %3320 = vmatpush.msrb.mxu3 %v3909_v52  ;;  %v3293_v6 = vadd.f32 %v3292_v11, %v3291_v34 }
0x19d7   :  { %v3094_v40 = vsel %vm2995_vm2, %v3093_v47, %v3092_v46 }
0x19d8   :  { %v3097_v48 = vsel %vm3096_vm7, %v3094_v40, -inf  ;;  %v3294_v1 = vrot.slane %v3293_v6, 1 }
0x19d9   :  { %3098 = vmax.xlane.f32.xlu2 %v3097_v48 }
0x19da   :  { %v3295_v63 = vadd.f32 %v3294_v1, %v3293_v6 }
0x19dc   :  { %v3301_v19 = vadd.f32 %v3298_v7, %v3295_v63 }
0x19f1   :  { %3911 = vrot.lane.b32.xlu2 %v4938_v24, %s5186_s0  ;;  %v3283_v24 = vrot.slane %v3282_v20, 2 }
0x19f3   :  { %v3284_v30 = vadd.f32 %v3283_v24, %v3282_v20 }
0x19f5   :  { %v3285_v42 = vrot.slane %v3284_v30, 1 }
0x19f7   :  { %v3286_v44 = vadd.f32 %v3285_v42, %v3284_v30 }
0x19f9   :  { %v3300_v38 = vadd.f32 %v3298_v7, %v3286_v44 }
0x19fb   :  { %v3304_v0 = vsel %vm2995_vm2, %v3301_v19, %v3300_v38 }
0x1a4c   :  { %v3099_v15 = vpop.xlane.xlu2 %3098 }
0x1a4d   :  { %v3101_v39 = vperm.slane %v3099_v15, 0  ;;  %v3102_v32 = vperm.slane %v3099_v15, 1 }
0x1a4f   :  { %v3105_v41 = vsub.f32 %v4111_v8, %v3101_v39  ;;  %v3106_v43 = vsub.f32 %v4113_v33, %v3102_v32 }
0x1a51   :  { %v3107_v5 = vmul.f32 1.442695, %v3105_v41  ;;  %v3109_v9 = vmul.f32 1.442695, %v3106_v43 }
0x1a53   :  { %4114 = vpow2.f32 %v3107_v5 }
0x1a54   :  { %4116 = vpow2.f32 %v3109_v9  ;;  %v3912_v54 = vpop.permute.xlu2 %3911 }
0x1a55   :  { %v3914_v50 = vunpack.i.h.bf16 %v3912_v54  ;;  %v3913_v62 = vunpack.i.l.bf16 %v3912_v54 }
0x1a57   :  { %3037 = vmatpush.msrb.mxu2 %v3913_v62  ;;  %3321 = vmatpush.msrb.mxu3 %v3913_v62 }
0x1a59   :  { %v4115_v23 = vpop.eup %4114  ;;  %3038 = vmatpush.msrb.mxu2 %v3914_v50  ;;  %3322 = vmatpush.msrb.mxu3 %v3914_v50 }
0x1a5a   :  { %v4117_v3 = vpop.eup %4116  ;;  %3114 = vperm.xlu1 %3916, %v4115_v23   ;;  %3811 = vmatmul.msk.f32.vlgmr.msrb.gmra.mxu2 %vm2695_vm15, %v5137_v10 }
0x1a5b   :  { %3117 = vperm.xlu0 %3917, %v4117_v3   ;;  %3812 = vmatmul.msk.f32.vlgmr.msrb.gmra.mxu3 %vm2695_vm15, %v3304_v0 }
0x1acc   :  { %v3115_v27 = vpop.permute.xlu1 %3114 }
0x1acd   :  { %v3118_v16 = vpop.permute.xlu0 %3117  ;;  %v3119_v59 = vperm.slane %v3115_v27, %v5147_v31 }
0x1ace   :  { %v3120_v55 = vperm.slane %v3118_v16, %v5147_v31 }
0x1ad0   :  { %v3121_v53 = vsel %vm2995_vm2, %v3120_v55, %v3119_v59 }
0x1ad1   :  { %v3123_v61 = vsel %vm3096_vm7, %v3121_v53, 0.0 }
0x1ad2   :  { %3124 = vadd.xlane.f32.xlu2 %v3123_v61 }
0x1add   :  { %v3040_v26 = vpop.f32.mrf.mxu2 }
0x1ade   :  { %3330 = vst.msk [vmem:[%s5181_s2] sm:$0xff] %vm3329_vm8, %v3040_v26  ;;  %v3324_v28 = vpop.f32.mrf.mxu3 }
0x1adf   :  { %3331 = vst.msk [vmem:[%s5181_s2 + $0x8] sm:$0x3] %vm3096_vm7, %v3324_v28 }
0x1b45   :  { %v3125_v60 = vpop.xlane.xlu2 %3124 }
0x1b46   :  { %v3127_v17 = vperm.slane %v3125_v60, 0  ;;  %v3128_v45 = vperm.slane %v3125_v60, 1 }
0x1b48   :  { %4118 = vrcp.f32 %v3127_v17  ;;  %v3142_v14 = vand.u32 2147483648, %v3127_v17  ;;  %v3140_v58 = vand.u32 2147483647, %v3127_v17  ;;  %vm3136_vm12 = vweird.f32 %v3127_v17 }
0x1b49   :  { %4120 = vrcp.f32 %v3128_v45  ;;  %v3157_v48 = vand.u32 2147483648, %v3128_v45  ;;  %vm3151_vm9 = vweird.f32 %v3128_v45  ;;  %v3155_v49 = vand.u32 2147483647, %v3128_v45 }
0x1b4a   :  { %v3143_v33 = vor.u32 1.1754944e-38, %v3142_v14  ;;  %vm3141_vm14 = vcmp.eq.f32.partialorder %v3140_v58, 8.507059e+37 }
0x1b4b   :  { %v3158_v13 = vor.u32 1.1754944e-38, %v3157_v48  ;;  %vm3156_vm3 = vcmp.eq.f32.partialorder %v3155_v49, 8.507059e+37 }
0x1b4e   :  { %v4119_v22 = vpop.eup %4118 }
0x1b4f   :  { %v4121_v10 = vpop.eup %4120  ;;  %v3132_v18 = vmul.f32 %v4119_v22, %v3127_v17  ;;  %vm3137_vm11 = vweird.f32 %v4119_v22 }
0x1b50   :  { %v3147_v37 = vmul.f32 %v4121_v10, %v3128_v45  ;;  %vm3138_vm13 = vmor %vm3136_vm12, %vm3137_vm11  ;;  %vm3152_vm15 = vweird.f32 %v4121_v10 }
0x1b51   :  { %v3133_v29 = vsub.f32 1.0, %v3132_v18  ;;  %vm3153_vm1 = vmor %vm3151_vm9, %vm3152_vm15 }
0x1b52   :  { %v3148_v57 = vsub.f32 1.0, %v3147_v37 }
0x1b53   :  { %v3134_v25 = vmul.f32 %v4119_v22, %v3133_v29 }
0x1b54   :  { %v3149_v21 = vmul.f32 %v4121_v10, %v3148_v57 }
0x1b55   :  { %v3135_v8 = vadd.f32 %v4119_v22, %v3134_v25 }
0x1b56   :  { %v3150_v47 = vadd.f32 %v4121_v10, %v3149_v21 }
0x1b57   :  { %v3139_v46 = vsel %vm3138_vm13, %v4119_v22, %v3135_v8 }
0x1b58   :  { %v3144_v40 = vsel %vm3141_vm14, %v3143_v33, %v3139_v46  ;;  %v3154_v52 = vsel %vm3153_vm1, %v4121_v10, %v3150_v47 }
0x1b59   :  { %v3145_v35 = vmul.f32 %v4115_v23, %v3144_v40  ;;  %v3159_v56 = vsel %vm3156_vm3, %v3158_v13, %v3154_v52 }
0x1b5a   :  { %v3160_v2 = vmul.f32 %v4117_v3, %v3159_v56 }
0x1b5b   :  { %3335 = vperm.xlu1 %3916, %v3145_v35  }
0x1b63   :  { %3338 = vperm.xlu1 %3916, %v3160_v2  }
0x1bcd   :  { %v3336_v12 = vpop.permute.xlu1 %3335 }
0x1bce   :  { %v3340_v36 = vperm.slane %v3336_v12, %v5147_v31 }
0x1bd5   :  { %v3339_v4 = vpop.permute.xlu1 %3338 }
0x1bd6   :  { %v3341_v51 = vperm.slane %v3339_v4, %v5147_v31 }
0x1bd8   :  { %v3342_v34 = vsel %vm2995_vm2, %v3341_v51, %v3340_v36 }
0x1bd9   :  { %3344 = vst.msk [vmem:[%s5181_s2 + $0xa] sm:$0x3] %vm3096_vm7, %v3342_v34 }
0x1bda   :  { %3349 = vsyncpa [#allocation6], 1 }
0x1bdb   :  { %3350 = vsyncpa [#allocation7], 1 }

</bundles_post_ra>
